<compile_context>
chip_gen: v6e
topology: v6e:2x2x1
jax: 0.10.0
libtpu: 0.0.40
codegen_flags: <defaults>
</compile_context>

<pallas_src>
import functools

import jax
import jax.numpy as jnp
from jax import lax
from jax.experimental import pallas as pl
from jax.experimental.pallas import tpu as pltpu


# 3x3 conv taps (pad=1), dh-major.  Stacked-window row / wconv column layout
# is k = tap_index * C + channel.
_TAPS = tuple((dh, dw) for dh in (-1, 0, 1) for dw in (-1, 0, 1))


def _round_up(x, m):
    return ((x + m - 1) // m) * m


# ----------------------------------------------------------------------------
# In-kernel fused encoder for one block of BN samples
# ----------------------------------------------------------------------------
def _encode_block(x_ref, stack_ref, poolm, wconv, bconv, alpha, wfc, bfc,
                  *, C, H, W, BN):
    """conv3x3(pad=1) -> PReLU -> global-avg-pool -> FC for BN samples.

    x_ref : VMEM ref, block (1, C, L_ext) bf16.  Each sample is a zero-padded
            (H+2, W+2) frame flattened on the lane axis; BN frames laid
            back-to-back with an extra (W+3)-lane zero halo at both ends so
            every 3x3 tap is a static in-bounds lane window (no border masks).
    stack_ref : VMEM scratch (Kstack, L) bf16 holding the 9*C shifted tap
            windows (MXU contraction operand; padded rows are zeroed).
    poolm : (BN, L) bf16 block-diagonal averaging matrix (1/(H*W) on interior
            lanes, 0 on pad / junk lanes) -- grid-invariant, fetched once.
    wconv : (Ch, Kstack) bf16, bconv/alpha: (Ch, 1) f32, wfc: (Ch, Dpad) f32,
            bfc: (1, Dpad) f32.  Returns (BN, Dpad) f32.
    """
    wp = W + 2
    pp = (H + 2) * wp
    L = BN * pp
    halo = wp + 1
    ntaps = 9 * C
    kstack = stack_ref.shape[0]

    # Stack the 9*C shifted bf16 tap windows.  No per-tap masks: 2D zero-pad
    # in the layout + zero weights in poolm make junk border lanes harmless.
    for t, (dh, dw) in enumerate(_TAPS):
        start = halo + dh * wp + dw                  # static, always in-bounds
        stack_ref[pl.ds(t * C, C), :] = x_ref[0, :, pl.ds(start, L)]
    if kstack > ntaps:                               # keep pad rows NaN-free
        stack_ref[pl.ds(ntaps, kstack - ntaps), :] = jnp.zeros(
            (kstack - ntaps, L), jnp.bfloat16)

    # 3x3 conv as a single bf16 MXU contraction (K = Kstack) instead of 9*C
    # broadcast-FMAs on the VPU.
    h = lax.dot_general(wconv, stack_ref[...], (((1,), (0,)), ((), ())),
                        preferred_element_type=jnp.float32)          # (Ch, L)
    h = h + bconv
    h = jnp.where(h > 0.0, h, alpha * h)             # PReLU (alpha=0 -> ReLU)

    # Global average pool per sample: bf16 block-diagonal averaging matmul,
    # contracting the lane axes of both operands.  poolm also zero-masks the
    # pad / junk lanes.
    pooled = lax.dot_general(poolm, h.astype(jnp.bfloat16),
                             (((1,), (1,)), ((), ())),
                             preferred_element_type=jnp.float32)     # (BN, Ch)

    # FC head, output padded to Dpad=128 lanes -> unmasked full-lane stores.
    return jnp.dot(pooled, wfc, preferred_element_type=jnp.float32) + bfc


def _avts_kernel(v_dims, a_dims, bn,
                 v_ref, a_ref, vpool_ref, apool_ref,
                 vwc_ref, vbc_ref, vak_ref, vwf_ref, vbf_ref,
                 awc_ref, abc_ref, aak_ref, awf_ref, abf_ref,
                 vout_ref, aout_ref,
                 vstack_ref, astack_ref):
    vc, vh, vw = v_dims
    ac, ah, aw = a_dims
    vout_ref[...] = _encode_block(
        v_ref, vstack_ref, vpool_ref[...], vwc_ref[...], vbc_ref[...],
        vak_ref[...], vwf_ref[...], vbf_ref[...], C=vc, H=vh, W=vw, BN=bn)
    aout_ref[...] = _encode_block(
        a_ref, astack_ref, apool_ref[...], awc_ref[...], abc_ref[...],
        aak_ref[...], awf_ref[...], abf_ref[...], C=ac, H=ah, W=aw, BN=bn)


# ----------------------------------------------------------------------------
# Host-side helpers
# ----------------------------------------------------------------------------
def _padded_sizes(c, h, w, bn):
    wp = w + 2
    pp = (h + 2) * wp
    l = bn * pp
    l_ext = l + 2 * (wp + 1)
    kstack = _round_up(9 * c, 8)
    return pp, l, l_ext, kstack


def _vmem_bytes(bn, dims, hidden, d_pad):
    """Rough per-step live-set estimate (both modalities)."""
    total = 0
    for (c, h, w) in dims:
        _, l, l_ext, kst = _padded_sizes(c, h, w, bn)
        total += 2 * c * l_ext * 2        # double-buffered input block (bf16)
        total += kst * l * 2              # stacked tap windows (bf16 scratch)
        total += hidden * l * (4 + 2)     # conv activations f32 + bf16 copy
        total += bn * l * 2               # pool matrix (bf16, fetched once)
        total += 2 * bn * d_pad * 4       # double-buffered output block (f32)
    return total


def _pick_block_n(n, dims, hidden, d_pad, vmem_budget=16 << 20):
    # >=4 grid steps when n allows (both v7x TensorCores get >=2 steps each),
    # capped so the per-step live set stays well inside v7x's 64 MiB VMEM.
    bn = int(min(64, max(8, pl.next_power_of_2(pl.cdiv(n, 4)))))
    while bn > 8 and _vmem_bytes(bn, dims, hidden, d_pad) > vmem_budget:
        bn //= 2
    return bn


def _to_blocks(x, bn, g):
    """(N,C,H,W) f32 -> (G, C, BN*(H+2)*(W+2) + 2*(W+3)) bf16 blocks.

    Single fused pad -> transpose -> bf16-cast pass over the frames in HLO.
    # TODO(synk): for very large frames express the interleave/halo via the
    # BlockSpec index_map instead of a materialized host-side transpose.
    """
    n, c, h, w = x.shape
    wp = w + 2
    pp = (h + 2) * wp
    halo = wp + 1
    x = jnp.pad(x, ((0, 0), (0, 0), (1, 1), (1, 1)))     # 2D zero pad / frame
    x = x.reshape(n, c, pp)
    x = jnp.pad(x, ((0, g * bn - n), (0, 0), (0, 0)))    # pad sample axis
    x = x.reshape(g, bn, c, pp).transpose(0, 2, 1, 3).reshape(g, c, bn * pp)
    x = jnp.pad(x, ((0, 0), (0, 0), (halo, halo)))       # block-edge halo
    return x.astype(jnp.bfloat16)                        # half the HBM DMA


def _pool_matrix(bn, h, w):
    """(BN, BN*(H+2)*(W+2)) bf16 block-diagonal averaging matrix (hoisted)."""
    wp = w + 2
    pp = (h + 2) * wp
    lane = jnp.arange(bn * pp, dtype=jnp.int32)
    pos = lane % pp
    r, c = pos // wp, pos % wp
    interior = (r >= 1) & (r <= h) & (c >= 1) & (c <= w)
    same = (lane // pp)[None, :] == jnp.arange(bn, dtype=jnp.int32)[:, None]
    m = jnp.where(same & interior[None, :], 1.0 / (h * w), 0.0)
    return m.astype(jnp.bfloat16)      # 1/256, 1/128 are exact in bf16


def avts_encoders_pallas(vid, aud, params, *, block_n):
    """vid: (N, Cv, Hv, Wv) f32, aud: (N, Ca, Ha, Wa) f32 -> (Npad, Dpad) x2."""
    n = vid.shape[0]
    cv, hv, wv = vid.shape[1:]
    ca, ha, wa = aud.shape[1:]
    g = max(2, pl.cdiv(n, block_n))
    n_pad = g * block_n
    _, lv, lv_ext, kv = _padded_sizes(cv, hv, wv, block_n)
    _, la, la_ext, ka = _padded_sizes(ca, ha, wa, block_n)

    vid_blk = _to_blocks(vid, block_n, g)                 # (G, Cv, Lv_ext) bf16
    aud_blk = _to_blocks(aud, block_n, g)                 # (G, Ca, La_ext) bf16
    poolm_v = _pool_matrix(block_n, hv, wv)               # (BN, Lv) bf16
    poolm_a = _pool_matrix(block_n, ha, wa)               # (BN, La) bf16

    vp, ap = params["v_encoder"], params["a_encoder"]
    hidden = vp["wconv"].shape[0]
    d_pad = vp["wfc"].shape[1]

    kernel = functools.partial(_avts_kernel, (cv, hv, wv), (ca, ha, wa), block_n)

    def full(shape):
        nd = len(shape)
        return pl.BlockSpec(tuple(shape), lambda gi, _nd=nd: (0,) * _nd)

    vmem_est = _vmem_bytes(block_n, ((cv, hv, wv), (ca, ha, wa)), hidden, d_pad)
    vmem_limit = int(min(48 << 20, max(16 << 20, 2 * vmem_est)))

    v_out, a_out = pl.pallas_call(
        kernel,
        out_shape=(jax.ShapeDtypeStruct((n_pad, d_pad), jnp.float32),
                   jax.ShapeDtypeStruct((n_pad, d_pad), jnp.float32)),
        grid=(g,),
        in_specs=[
            pl.BlockSpec((1, cv, lv_ext), lambda gi: (gi, 0, 0)),
            pl.BlockSpec((1, ca, la_ext), lambda gi: (gi, 0, 0)),
            full(poolm_v.shape), full(poolm_a.shape),
            full(vp["wconv"].shape), full(vp["bconv"].shape), full(vp["alpha"].shape),
            full(vp["wfc"].shape), full(vp["bfc"].shape),
            full(ap["wconv"].shape), full(ap["bconv"].shape), full(ap["alpha"].shape),
            full(ap["wfc"].shape), full(ap["bfc"].shape),
        ],
        out_specs=[
            pl.BlockSpec((block_n, d_pad), lambda gi: (gi, 0)),
            pl.BlockSpec((block_n, d_pad), lambda gi: (gi, 0)),
        ],
        scratch_shapes=[
            pltpu.VMEM((kv, lv), jnp.bfloat16),
            pltpu.VMEM((ka, la), jnp.bfloat16),
        ],
        compiler_params=pltpu.CompilerParams(
            dimension_semantics=("parallel",),
            vmem_limit_bytes=vmem_limit),
    )(vid_blk, aud_blk, poolm_v, poolm_a,
      vp["wconv"], vp["bconv"], vp["alpha"], vp["wfc"], vp["bfc"],
      ap["wconv"], ap["bconv"], ap["alpha"], ap["wfc"], ap["bfc"])
    return v_out, a_out


# ----------------------------------------------------------------------------
# Parameter construction (deterministic)
# ----------------------------------------------------------------------------
def init_encoder_params(key, in_ch, hidden_ch, last_dim, d_pad, prelu):
    if last_dim > d_pad:
        raise ValueError(f"last_dim={last_dim} must be <= d_pad={d_pad}")
    k1, k2 = jax.random.split(key)
    ntaps = 9 * in_ch
    kstack = _round_up(ntaps, 8)
    wconv = jax.random.normal(k1, (hidden_ch, ntaps), jnp.float32) * (1.0 / ntaps) ** 0.5
    wconv = jnp.concatenate(
        [wconv, jnp.zeros((hidden_ch, kstack - ntaps), jnp.float32)],
        axis=1).astype(jnp.bfloat16)                 # bf16 MXU conv operand
    bconv = jnp.zeros((hidden_ch, 1), jnp.float32)
    # nn.PReLU default init alpha = 0.25; ReLU (audio VGG style) -> alpha = 0
    alpha = jnp.full((hidden_ch, 1), 0.25 if prelu else 0.0, jnp.float32)
    wfc = jax.random.normal(k2, (hidden_ch, last_dim), jnp.float32) * (1.0 / hidden_ch) ** 0.5
    wfc = jnp.concatenate(
        [wfc, jnp.zeros((hidden_ch, d_pad - last_dim), jnp.float32)], axis=1)
    bfc = jnp.zeros((1, d_pad), jnp.float32)
    return {"wconv": wconv, "bconv": bconv, "alpha": alpha, "wfc": wfc, "bfc": bfc}


# ----------------------------------------------------------------------------
# AVTSNet forward (out_feat=True path)
# ----------------------------------------------------------------------------
@functools.partial(jax.jit, static_argnames=("last_dim", "out_feat", "block_n"))
def avtsnet_forward(vid, aud, params, *, last_dim, out_feat=True, block_n=None):
    output = {}
    b, clips = vid.shape[:2]
    n = b * clips
    # rearrange 'b clips ... -> (b clips) ...'
    vid = vid.reshape((n,) + vid.shape[2:])
    aud = aud.reshape((n,) + aud.shape[2:])
    dims = (tuple(vid.shape[1:]), tuple(aud.shape[1:]))
    hidden = params["v_encoder"]["wconv"].shape[0]
    d_pad = params["v_encoder"]["wfc"].shape[1]
    bn = block_n if block_n is not None else _pick_block_n(n, dims, hidden, d_pad)
    v_out, a_out = avts_encoders_pallas(vid, aud, params, block_n=bn)
    v_feats = v_out[:n, :last_dim]
    a_feats = a_out[:n, :last_dim]
    if out_feat:
        output["vid"] = v_feats
        output["aud"] = a_feats
    # TODO(synk): NTXentLoss ('AVTS' setting, y is not None branch) is not
    # defined in the reference source, so the metric-loss branch is omitted.
    return output


# ----------------------------------------------------------------------------
# Pure-JAX reference of one encoder (same math, casts and weight layout)
# ----------------------------------------------------------------------------
def _encoder_ref(x, p, last_dim):
    n, c, h, w = x.shape
    ntaps = 9 * c
    xb = x.astype(jnp.bfloat16)                       # kernel reads bf16 frames
    xp = jnp.pad(xb, ((0, 0), (0, 0), (1, 1), (1, 1)))
    cols = []
    for dh in range(3):                               # tap-major, channel-minor
        for dw in range(3):
            for ci in range(c):
                cols.append(xp[:, ci, dh:dh + h, dw:dw + w].reshape(n, h * w))
    patches = jnp.stack(cols, axis=-1)                # (n, P, 9c) bf16
    hh = jnp.einsum("npk,ok->npo", patches, p["wconv"][:, :ntaps],
                    preferred_element_type=jnp.float32)              # bf16 conv
    hh = hh + p["bconv"][:, 0][None, None, :]
    a = p["alpha"][:, 0][None, None, :]
    hh = jnp.where(hh > 0.0, hh, a * hh)
    pooled = jnp.mean(hh.astype(jnp.bfloat16).astype(jnp.float32), axis=1)
    out = pooled @ p["wfc"] + p["bfc"]                               # (n, Dpad)
    return out[:, :last_dim]


if __name__ == "__main__":
    key = jax.random.PRNGKey(0)
    k_vid, k_aud, k_pv, k_pa = jax.random.split(key, 4)

    # Small shapes consistent with the module:
    #   batch=2, clips=2, img_in_dim=1, video frame 16x16, mfcc-style 8x16
    B, CLIPS = 2, 2
    IMG_IN_DIM = 1
    LAST_DIM = 32
    HIDDEN = 16
    D_PAD = 128          # FC output padded to a full 128-lane block

    vid = jax.random.normal(k_vid, (B, CLIPS, IMG_IN_DIM, 16, 16), jnp.float32)
    aud = jax.random.normal(k_aud, (B, CLIPS, 1, 8, 16), jnp.float32)

    params = {
        "v_encoder": init_encoder_params(k_pv, IMG_IN_DIM, HIDDEN, LAST_DIM, D_PAD,
                                         prelu=True),   # relu_type='prelu'
        "a_encoder": init_encoder_params(k_pa, 1, HIDDEN, LAST_DIM, D_PAD,
                                         prelu=False),  # audio VGG-style ReLU
    }

    out = avtsnet_forward(vid, aud, params, last_dim=LAST_DIM, out_feat=True)
    jax.block_until_ready(out)

    assert out["vid"].shape == (B * CLIPS, LAST_DIM)
    assert out["aud"].shape == (B * CLIPS, LAST_DIM)

    # Correctness check vs pure-JAX reference (bf16 inputs/weights into the
    # conv and pool, f32 accumulation; outputs differ from a pure-f32 model).
    ref_v = _encoder_ref(vid.reshape((B * CLIPS,) + vid.shape[2:]),
                         params["v_encoder"], LAST_DIM)
    ref_a = _encoder_ref(aud.reshape((B * CLIPS,) + aud.shape[2:]),
                         params["a_encoder"], LAST_DIM)
    assert jnp.allclose(out["vid"], ref_v, atol=2e-2, rtol=2e-2), (
        float(jnp.max(jnp.abs(out["vid"] - ref_v))))
    assert jnp.allclose(out["aud"], ref_a, atol=2e-2, rtol=2e-2), (
        float(jnp.max(jnp.abs(out["aud"] - ref_a))))

    print("KERNEL_OK")
</pallas_src>

<mosaic_0001>
module attributes {stable_mosaic.version = 11 : i64} {
  func.func @_avts_kernel(%arg0: i32, %arg1: memref<1x1x2630xbf16, #tpu.memory_space<vmem>>, %arg2: memref<1x1x1478xbf16, #tpu.memory_space<vmem>>, %arg3: memref<8x2592xbf16, #tpu.memory_space<vmem>>, %arg4: memref<8x1440xbf16, #tpu.memory_space<vmem>>, %arg5: memref<16x16xbf16, #tpu.memory_space<vmem>>, %arg6: memref<16x1xf32, #tpu.memory_space<vmem>>, %arg7: memref<16x1xf32, #tpu.memory_space<vmem>>, %arg8: memref<16x128xf32, #tpu.memory_space<vmem>>, %arg9: memref<1x128xf32, #tpu.memory_space<vmem>>, %arg10: memref<16x16xbf16, #tpu.memory_space<vmem>>, %arg11: memref<16x1xf32, #tpu.memory_space<vmem>>, %arg12: memref<16x1xf32, #tpu.memory_space<vmem>>, %arg13: memref<16x128xf32, #tpu.memory_space<vmem>>, %arg14: memref<1x128xf32, #tpu.memory_space<vmem>>, %arg15: memref<8x128xf32, #tpu.memory_space<vmem>>, %arg16: memref<8x128xf32, #tpu.memory_space<vmem>>, %arg17: memref<16x2592xbf16, #tpu.memory_space<vmem>>, %arg18: memref<16x1440xbf16, #tpu.memory_space<vmem>>) attributes {dimension_semantics = [#tpu.dimension_semantics<parallel>], iteration_bounds = array<i64: 2>, scalar_prefetch = 0 : i64, scratch_operands = 2 : i64, tpu.core_type = #tpu.core_type<tc>, window_params = [{transform_indices = @transform_0, window_bounds = array<i64: 1, 1, 2630>}, {transform_indices = @transform_1, window_bounds = array<i64: 1, 1, 1478>}, {pipeline_mode = #tpu.pipeline_mode<synchronous>, transform_indices = @transform_2, window_bounds = array<i64: 8, 2592>}, {pipeline_mode = #tpu.pipeline_mode<synchronous>, transform_indices = @transform_3, window_bounds = array<i64: 8, 1440>}, {pipeline_mode = #tpu.pipeline_mode<synchronous>, transform_indices = @transform_4, window_bounds = array<i64: 16, 16>}, {pipeline_mode = #tpu.pipeline_mode<synchronous>, transform_indices = @transform_5, window_bounds = array<i64: 16, 1>}, {pipeline_mode = #tpu.pipeline_mode<synchronous>, transform_indices = @transform_6, window_bounds = array<i64: 16, 1>}, {pipeline_mode = #tpu.pipeline_mode<synchronous>, transform_indices = @transform_7, window_bounds = array<i64: 16, 128>}, {pipeline_mode = #tpu.pipeline_mode<synchronous>, transform_indices = @transform_8, window_bounds = array<i64: 1, 128>}, {pipeline_mode = #tpu.pipeline_mode<synchronous>, transform_indices = @transform_9, window_bounds = array<i64: 16, 16>}, {pipeline_mode = #tpu.pipeline_mode<synchronous>, transform_indices = @transform_10, window_bounds = array<i64: 16, 1>}, {pipeline_mode = #tpu.pipeline_mode<synchronous>, transform_indices = @transform_11, window_bounds = array<i64: 16, 1>}, {pipeline_mode = #tpu.pipeline_mode<synchronous>, transform_indices = @transform_12, window_bounds = array<i64: 16, 128>}, {pipeline_mode = #tpu.pipeline_mode<synchronous>, transform_indices = @transform_13, window_bounds = array<i64: 1, 128>}, {transform_indices = @transform_14, window_bounds = array<i64: 8, 128>}, {transform_indices = @transform_15, window_bounds = array<i64: 8, 128>}]} {
    %c0 = arith.constant 0 : index
    %c0_0 = arith.constant 0 : index
    %0 = vector.load %arg3[%c0, %c0_0] : memref<8x2592xbf16, #tpu.memory_space<vmem>>, vector<8x2592xbf16>
    %c0_1 = arith.constant 0 : index
    %c0_2 = arith.constant 0 : index
    %1 = vector.load %arg5[%c0_1, %c0_2] : memref<16x16xbf16, #tpu.memory_space<vmem>>, vector<16x16xbf16>
    %c0_3 = arith.constant 0 : index
    %c0_4 = arith.constant 0 : index
    %2 = vector.load %arg6[%c0_3, %c0_4] : memref<16x1xf32, #tpu.memory_space<vmem>>, vector<16x1xf32>
    %c0_5 = arith.constant 0 : index
    %c0_6 = arith.constant 0 : index
    %3 = vector.load %arg7[%c0_5, %c0_6] : memref<16x1xf32, #tpu.memory_space<vmem>>, vector<16x1xf32>
    %c0_7 = arith.constant 0 : index
    %c0_8 = arith.constant 0 : index
    %4 = vector.load %arg8[%c0_7, %c0_8] : memref<16x128xf32, #tpu.memory_space<vmem>>, vector<16x128xf32>
    %c0_9 = arith.constant 0 : index
    %c0_10 = arith.constant 0 : index
    %5 = vector.load %arg9[%c0_9, %c0_10] : memref<1x128xf32, #tpu.memory_space<vmem>>, vector<1x128xf32>
    %c0_11 = arith.constant 0 : index
    %c0_12 = arith.constant 0 : index
    %c0_13 = arith.constant 0 : index
    %6 = vector.load %arg1[%c0_11, %c0_12, %c0_13] : memref<1x1x2630xbf16, #tpu.memory_space<vmem>>, vector<1x1x2592xbf16>
    %7 = vector.shape_cast %6 : vector<1x1x2592xbf16> to vector<1x2592xbf16>
    %c0_14 = arith.constant 0 : index
    %c0_15 = arith.constant 0 : index
    %8 = vector.load %arg17[%c0_14, %c0_15] : memref<16x2592xbf16, #tpu.memory_space<vmem>>, vector<1x2592xbf16>
    tpu.vector_store %arg17[%c0_14, %c0_15], %7 {strides = array<i32>} : memref<16x2592xbf16, #tpu.memory_space<vmem>>, vector<1x2592xbf16>,
    %c0_16 = arith.constant 0 : index
    %c0_17 = arith.constant 0 : index
    %c1 = arith.constant 1 : index
    %9 = vector.load %arg1[%c0_16, %c0_17, %c1] : memref<1x1x2630xbf16, #tpu.memory_space<vmem>>, vector<1x1x2592xbf16>
    %10 = vector.shape_cast %9 : vector<1x1x2592xbf16> to vector<1x2592xbf16>
    %c1_18 = arith.constant 1 : index
    %c0_19 = arith.constant 0 : index
    %11 = vector.load %arg17[%c1_18, %c0_19] : memref<16x2592xbf16, #tpu.memory_space<vmem>>, vector<1x2592xbf16>
    tpu.vector_store %arg17[%c1_18, %c0_19], %10 {strides = array<i32>} : memref<16x2592xbf16, #tpu.memory_space<vmem>>, vector<1x2592xbf16>,
    %c0_20 = arith.constant 0 : index
    %c0_21 = arith.constant 0 : index
    %c2 = arith.constant 2 : index
    %12 = vector.load %arg1[%c0_20, %c0_21, %c2] : memref<1x1x2630xbf16, #tpu.memory_space<vmem>>, vector<1x1x2592xbf16>
    %13 = vector.shape_cast %12 : vector<1x1x2592xbf16> to vector<1x2592xbf16>
    %c2_22 = arith.constant 2 : index
    %c0_23 = arith.constant 0 : index
    %14 = vector.load %arg17[%c2_22, %c0_23] : memref<16x2592xbf16, #tpu.memory_space<vmem>>, vector<1x2592xbf16>
    tpu.vector_store %arg17[%c2_22, %c0_23], %13 {strides = array<i32>} : memref<16x2592xbf16, #tpu.memory_space<vmem>>, vector<1x2592xbf16>,
    %c0_24 = arith.constant 0 : index
    %c0_25 = arith.constant 0 : index
    %c18 = arith.constant 18 : index
    %15 = vector.load %arg1[%c0_24, %c0_25, %c18] : memref<1x1x2630xbf16, #tpu.memory_space<vmem>>, vector<1x1x2592xbf16>
    %16 = vector.shape_cast %15 : vector<1x1x2592xbf16> to vector<1x2592xbf16>
    %c3 = arith.constant 3 : index
    %c0_26 = arith.constant 0 : index
    %17 = vector.load %arg17[%c3, %c0_26] : memref<16x2592xbf16, #tpu.memory_space<vmem>>, vector<1x2592xbf16>
    tpu.vector_store %arg17[%c3, %c0_26], %16 {strides = array<i32>} : memref<16x2592xbf16, #tpu.memory_space<vmem>>, vector<1x2592xbf16>,
    %c0_27 = arith.constant 0 : index
    %c0_28 = arith.constant 0 : index
    %c19 = arith.constant 19 : index
    %18 = vector.load %arg1[%c0_27, %c0_28, %c19] : memref<1x1x2630xbf16, #tpu.memory_space<vmem>>, vector<1x1x2592xbf16>
    %19 = vector.shape_cast %18 : vector<1x1x2592xbf16> to vector<1x2592xbf16>
    %c4 = arith.constant 4 : index
    %c0_29 = arith.constant 0 : index
    %20 = vector.load %arg17[%c4, %c0_29] : memref<16x2592xbf16, #tpu.memory_space<vmem>>, vector<1x2592xbf16>
    tpu.vector_store %arg17[%c4, %c0_29], %19 {strides = array<i32>} : memref<16x2592xbf16, #tpu.memory_space<vmem>>, vector<1x2592xbf16>,
    %c0_30 = arith.constant 0 : index
    %c0_31 = arith.constant 0 : index
    %c20 = arith.constant 20 : index
    %21 = vector.load %arg1[%c0_30, %c0_31, %c20] : memref<1x1x2630xbf16, #tpu.memory_space<vmem>>, vector<1x1x2592xbf16>
    %22 = vector.shape_cast %21 : vector<1x1x2592xbf16> to vector<1x2592xbf16>
    %c5 = arith.constant 5 : index
    %c0_32 = arith.constant 0 : index
    %23 = vector.load %arg17[%c5, %c0_32] : memref<16x2592xbf16, #tpu.memory_space<vmem>>, vector<1x2592xbf16>
    tpu.vector_store %arg17[%c5, %c0_32], %22 {strides = array<i32>} : memref<16x2592xbf16, #tpu.memory_space<vmem>>, vector<1x2592xbf16>,
    %c0_33 = arith.constant 0 : index
    %c0_34 = arith.constant 0 : index
    %c36 = arith.constant 36 : index
    %24 = vector.load %arg1[%c0_33, %c0_34, %c36] : memref<1x1x2630xbf16, #tpu.memory_space<vmem>>, vector<1x1x2592xbf16>
    %25 = vector.shape_cast %24 : vector<1x1x2592xbf16> to vector<1x2592xbf16>
    %c6 = arith.constant 6 : index
    %c0_35 = arith.constant 0 : index
    %26 = vector.load %arg17[%c6, %c0_35] : memref<16x2592xbf16, #tpu.memory_space<vmem>>, vector<1x2592xbf16>
    tpu.vector_store %arg17[%c6, %c0_35], %25 {strides = array<i32>} : memref<16x2592xbf16, #tpu.memory_space<vmem>>, vector<1x2592xbf16>,
    %c0_36 = arith.constant 0 : index
    %c0_37 = arith.constant 0 : index
    %c37 = arith.constant 37 : index
    %27 = vector.load %arg1[%c0_36, %c0_37, %c37] : memref<1x1x2630xbf16, #tpu.memory_space<vmem>>, vector<1x1x2592xbf16>
    %28 = vector.shape_cast %27 : vector<1x1x2592xbf16> to vector<1x2592xbf16>
    %c7 = arith.constant 7 : index
    %c0_38 = arith.constant 0 : index
    %29 = vector.load %arg17[%c7, %c0_38] : memref<16x2592xbf16, #tpu.memory_space<vmem>>, vector<1x2592xbf16>
    tpu.vector_store %arg17[%c7, %c0_38], %28 {strides = array<i32>} : memref<16x2592xbf16, #tpu.memory_space<vmem>>, vector<1x2592xbf16>,
    %c0_39 = arith.constant 0 : index
    %c0_40 = arith.constant 0 : index
    %c38 = arith.constant 38 : index
    %30 = vector.load %arg1[%c0_39, %c0_40, %c38] : memref<1x1x2630xbf16, #tpu.memory_space<vmem>>, vector<1x1x2592xbf16>
    %31 = vector.shape_cast %30 : vector<1x1x2592xbf16> to vector<1x2592xbf16>
    %c8 = arith.constant 8 : index
    %c0_41 = arith.constant 0 : index
    %32 = vector.load %arg17[%c8, %c0_41] : memref<16x2592xbf16, #tpu.memory_space<vmem>>, vector<1x2592xbf16>
    tpu.vector_store %arg17[%c8, %c0_41], %31 {strides = array<i32>} : memref<16x2592xbf16, #tpu.memory_space<vmem>>, vector<1x2592xbf16>,
    %cst = arith.constant 0.000000e+00 : bf16
    %33 = vector.broadcast %cst : bf16 to vector<7x2592xbf16>
    %c9 = arith.constant 9 : index
    %c0_42 = arith.constant 0 : index
    %34 = vector.load %arg17[%c9, %c0_42] : memref<16x2592xbf16, #tpu.memory_space<vmem>>, vector<7x2592xbf16>
    tpu.vector_store %arg17[%c9, %c0_42], %33 {strides = array<i32>} : memref<16x2592xbf16, #tpu.memory_space<vmem>>, vector<7x2592xbf16>,
    %c0_43 = arith.constant 0 : index
    %c0_44 = arith.constant 0 : index
    %35 = vector.load %arg17[%c0_43, %c0_44] : memref<16x2592xbf16, #tpu.memory_space<vmem>>, vector<16x2592xbf16>
    %cst_45 = arith.constant dense<0.000000e+00> : vector<16x2592xf32>
    %36 = tpu.matmul %1, %35, %cst_45 {dimension_numbers = #tpu.dot_dimension_numbers<[1], [0], [0], [1], [0, 0, 1, 1], [], []>} : vector<16x16xbf16>, vector<16x2592xbf16>, vector<16x2592xf32> -> vector<16x2592xf32>
    %37 = vector.broadcast %2 : vector<16x1xf32> to vector<16x2592xf32>
    %38 = arith.addf %36, %37 : vector<16x2592xf32>
    %cst_46 = arith.constant 0.000000e+00 : f32
    %39 = vector.broadcast %cst_46 : f32 to vector<16x2592xf32>
    %40 = arith.cmpf ogt, %38, %39 : vector<16x2592xf32>
    %41 = vector.broadcast %3 : vector<16x1xf32> to vector<16x2592xf32>
    %42 = arith.mulf %41, %38 : vector<16x2592xf32>
    %43 = arith.select %40, %38, %42 : vector<16x2592xi1>, vector<16x2592xf32>
    %44 = arith.truncf %43 : vector<16x2592xf32> to vector<16x2592xbf16>
    %cst_47 = arith.constant dense<0.000000e+00> : vector<8x16xf32>
    %45 = tpu.matmul %0, %44, %cst_47 {dimension_numbers = #tpu.dot_dimension_numbers<[1], [1], [0], [0], [0, 0, 1, 0], [], []>} : vector<8x2592xbf16>, vector<16x2592xbf16>, vector<8x16xf32> -> vector<8x16xf32>
    %cst_48 = arith.constant dense<0.000000e+00> : vector<8x128xf32>
    %46 = tpu.matmul %45, %4, %cst_48 {dimension_numbers = #tpu.dot_dimension_numbers<[1], [0], [0], [1], [0, 0, 1, 1], [], []>} : vector<8x16xf32>, vector<16x128xf32>, vector<8x128xf32> -> vector<8x128xf32>
    %47 = vector.broadcast %5 : vector<1x128xf32> to vector<8x128xf32>
    %48 = arith.addf %46, %47 : vector<8x128xf32>
    %c0_49 = arith.constant 0 : index
    %c0_50 = arith.constant 0 : index
    %49 = vector.load %arg15[%c0_49, %c0_50] : memref<8x128xf32, #tpu.memory_space<vmem>>, vector<8x128xf32>
    tpu.vector_store %arg15[%c0_49, %c0_50], %48 {strides = array<i32>} : memref<8x128xf32, #tpu.memory_space<vmem>>, vector<8x128xf32>,
    %c0_51 = arith.constant 0 : index
    %c0_52 = arith.constant 0 : index
    %50 = vector.load %arg4[%c0_51, %c0_52] : memref<8x1440xbf16, #tpu.memory_space<vmem>>, vector<8x1440xbf16>
    %c0_53 = arith.constant 0 : index
    %c0_54 = arith.constant 0 : index
    %51 = vector.load %arg10[%c0_53, %c0_54] : memref<16x16xbf16, #tpu.memory_space<vmem>>, vector<16x16xbf16>
    %c0_55 = arith.constant 0 : index
    %c0_56 = arith.constant 0 : index
    %52 = vector.load %arg11[%c0_55, %c0_56] : memref<16x1xf32, #tpu.memory_space<vmem>>, vector<16x1xf32>
    %c0_57 = arith.constant 0 : index
    %c0_58 = arith.constant 0 : index
    %53 = vector.load %arg12[%c0_57, %c0_58] : memref<16x1xf32, #tpu.memory_space<vmem>>, vector<16x1xf32>
    %c0_59 = arith.constant 0 : index
    %c0_60 = arith.constant 0 : index
    %54 = vector.load %arg13[%c0_59, %c0_60] : memref<16x128xf32, #tpu.memory_space<vmem>>, vector<16x128xf32>
    %c0_61 = arith.constant 0 : index
    %c0_62 = arith.constant 0 : index
    %55 = vector.load %arg14[%c0_61, %c0_62] : memref<1x128xf32, #tpu.memory_space<vmem>>, vector<1x128xf32>
    %c0_63 = arith.constant 0 : index
    %c0_64 = arith.constant 0 : index
    %c0_65 = arith.constant 0 : index
    %56 = vector.load %arg2[%c0_63, %c0_64, %c0_65] : memref<1x1x1478xbf16, #tpu.memory_space<vmem>>, vector<1x1x1440xbf16>
    %57 = vector.shape_cast %56 : vector<1x1x1440xbf16> to vector<1x1440xbf16>
    %c0_66 = arith.constant 0 : index
    %c0_67 = arith.constant 0 : index
    %58 = vector.load %arg18[%c0_66, %c0_67] : memref<16x1440xbf16, #tpu.memory_space<vmem>>, vector<1x1440xbf16>
    tpu.vector_store %arg18[%c0_66, %c0_67], %57 {strides = array<i32>} : memref<16x1440xbf16, #tpu.memory_space<vmem>>, vector<1x1440xbf16>,
    %c0_68 = arith.constant 0 : index
    %c0_69 = arith.constant 0 : index
    %c1_70 = arith.constant 1 : index
    %59 = vector.load %arg2[%c0_68, %c0_69, %c1_70] : memref<1x1x1478xbf16, #tpu.memory_space<vmem>>, vector<1x1x1440xbf16>
    %60 = vector.shape_cast %59 : vector<1x1x1440xbf16> to vector<1x1440xbf16>
    %c1_71 = arith.constant 1 : index
    %c0_72 = arith.constant 0 : index
    %61 = vector.load %arg18[%c1_71, %c0_72] : memref<16x1440xbf16, #tpu.memory_space<vmem>>, vector<1x1440xbf16>
    tpu.vector_store %arg18[%c1_71, %c0_72], %60 {strides = array<i32>} : memref<16x1440xbf16, #tpu.memory_space<vmem>>, vector<1x1440xbf16>,
    %c0_73 = arith.constant 0 : index
    %c0_74 = arith.constant 0 : index
    %c2_75 = arith.constant 2 : index
    %62 = vector.load %arg2[%c0_73, %c0_74, %c2_75] : memref<1x1x1478xbf16, #tpu.memory_space<vmem>>, vector<1x1x1440xbf16>
    %63 = vector.shape_cast %62 : vector<1x1x1440xbf16> to vector<1x1440xbf16>
    %c2_76 = arith.constant 2 : index
    %c0_77 = arith.constant 0 : index
    %64 = vector.load %arg18[%c2_76, %c0_77] : memref<16x1440xbf16, #tpu.memory_space<vmem>>, vector<1x1440xbf16>
    tpu.vector_store %arg18[%c2_76, %c0_77], %63 {strides = array<i32>} : memref<16x1440xbf16, #tpu.memory_space<vmem>>, vector<1x1440xbf16>,
    %c0_78 = arith.constant 0 : index
    %c0_79 = arith.constant 0 : index
    %c18_80 = arith.constant 18 : index
    %65 = vector.load %arg2[%c0_78, %c0_79, %c18_80] : memref<1x1x1478xbf16, #tpu.memory_space<vmem>>, vector<1x1x1440xbf16>
    %66 = vector.shape_cast %65 : vector<1x1x1440xbf16> to vector<1x1440xbf16>
    %c3_81 = arith.constant 3 : index
    %c0_82 = arith.constant 0 : index
    %67 = vector.load %arg18[%c3_81, %c0_82] : memref<16x1440xbf16, #tpu.memory_space<vmem>>, vector<1x1440xbf16>
    tpu.vector_store %arg18[%c3_81, %c0_82], %66 {strides = array<i32>} : memref<16x1440xbf16, #tpu.memory_space<vmem>>, vector<1x1440xbf16>,
    %c0_83 = arith.constant 0 : index
    %c0_84 = arith.constant 0 : index
    %c19_85 = arith.constant 19 : index
    %68 = vector.load %arg2[%c0_83, %c0_84, %c19_85] : memref<1x1x1478xbf16, #tpu.memory_space<vmem>>, vector<1x1x1440xbf16>
    %69 = vector.shape_cast %68 : vector<1x1x1440xbf16> to vector<1x1440xbf16>
    %c4_86 = arith.constant 4 : index
    %c0_87 = arith.constant 0 : index
    %70 = vector.load %arg18[%c4_86, %c0_87] : memref<16x1440xbf16, #tpu.memory_space<vmem>>, vector<1x1440xbf16>
    tpu.vector_store %arg18[%c4_86, %c0_87], %69 {strides = array<i32>} : memref<16x1440xbf16, #tpu.memory_space<vmem>>, vector<1x1440xbf16>,
    %c0_88 = arith.constant 0 : index
    %c0_89 = arith.constant 0 : index
    %c20_90 = arith.constant 20 : index
    %71 = vector.load %arg2[%c0_88, %c0_89, %c20_90] : memref<1x1x1478xbf16, #tpu.memory_space<vmem>>, vector<1x1x1440xbf16>
    %72 = vector.shape_cast %71 : vector<1x1x1440xbf16> to vector<1x1440xbf16>
    %c5_91 = arith.constant 5 : index
    %c0_92 = arith.constant 0 : index
    %73 = vector.load %arg18[%c5_91, %c0_92] : memref<16x1440xbf16, #tpu.memory_space<vmem>>, vector<1x1440xbf16>
    tpu.vector_store %arg18[%c5_91, %c0_92], %72 {strides = array<i32>} : memref<16x1440xbf16, #tpu.memory_space<vmem>>, vector<1x1440xbf16>,
    %c0_93 = arith.constant 0 : index
    %c0_94 = arith.constant 0 : index
    %c36_95 = arith.constant 36 : index
    %74 = vector.load %arg2[%c0_93, %c0_94, %c36_95] : memref<1x1x1478xbf16, #tpu.memory_space<vmem>>, vector<1x1x1440xbf16>
    %75 = vector.shape_cast %74 : vector<1x1x1440xbf16> to vector<1x1440xbf16>
    %c6_96 = arith.constant 6 : index
    %c0_97 = arith.constant 0 : index
    %76 = vector.load %arg18[%c6_96, %c0_97] : memref<16x1440xbf16, #tpu.memory_space<vmem>>, vector<1x1440xbf16>
    tpu.vector_store %arg18[%c6_96, %c0_97], %75 {strides = array<i32>} : memref<16x1440xbf16, #tpu.memory_space<vmem>>, vector<1x1440xbf16>,
    %c0_98 = arith.constant 0 : index
    %c0_99 = arith.constant 0 : index
    %c37_100 = arith.constant 37 : index
    %77 = vector.load %arg2[%c0_98, %c0_99, %c37_100] : memref<1x1x1478xbf16, #tpu.memory_space<vmem>>, vector<1x1x1440xbf16>
    %78 = vector.shape_cast %77 : vector<1x1x1440xbf16> to vector<1x1440xbf16>
    %c7_101 = arith.constant 7 : index
    %c0_102 = arith.constant 0 : index
    %79 = vector.load %arg18[%c7_101, %c0_102] : memref<16x1440xbf16, #tpu.memory_space<vmem>>, vector<1x1440xbf16>
    tpu.vector_store %arg18[%c7_101, %c0_102], %78 {strides = array<i32>} : memref<16x1440xbf16, #tpu.memory_space<vmem>>, vector<1x1440xbf16>,
    %c0_103 = arith.constant 0 : index
    %c0_104 = arith.constant 0 : index
    %c38_105 = arith.constant 38 : index
    %80 = vector.load %arg2[%c0_103, %c0_104, %c38_105] : memref<1x1x1478xbf16, #tpu.memory_space<vmem>>, vector<1x1x1440xbf16>
    %81 = vector.shape_cast %80 : vector<1x1x1440xbf16> to vector<1x1440xbf16>
    %c8_106 = arith.constant 8 : index
    %c0_107 = arith.constant 0 : index
    %82 = vector.load %arg18[%c8_106, %c0_107] : memref<16x1440xbf16, #tpu.memory_space<vmem>>, vector<1x1440xbf16>
    tpu.vector_store %arg18[%c8_106, %c0_107], %81 {strides = array<i32>} : memref<16x1440xbf16, #tpu.memory_space<vmem>>, vector<1x1440xbf16>,
    %cst_108 = arith.constant 0.000000e+00 : bf16
    %83 = vector.broadcast %cst_108 : bf16 to vector<7x1440xbf16>
    %c9_109 = arith.constant 9 : index
    %c0_110 = arith.constant 0 : index
    %84 = vector.load %arg18[%c9_109, %c0_110] : memref<16x1440xbf16, #tpu.memory_space<vmem>>, vector<7x1440xbf16>
    tpu.vector_store %arg18[%c9_109, %c0_110], %83 {strides = array<i32>} : memref<16x1440xbf16, #tpu.memory_space<vmem>>, vector<7x1440xbf16>,
    %c0_111 = arith.constant 0 : index
    %c0_112 = arith.constant 0 : index
    %85 = vector.load %arg18[%c0_111, %c0_112] : memref<16x1440xbf16, #tpu.memory_space<vmem>>, vector<16x1440xbf16>
    %cst_113 = arith.constant dense<0.000000e+00> : vector<16x1440xf32>
    %86 = tpu.matmul %51, %85, %cst_113 {dimension_numbers = #tpu.dot_dimension_numbers<[1], [0], [0], [1], [0, 0, 1, 1], [], []>} : vector<16x16xbf16>, vector<16x1440xbf16>, vector<16x1440xf32> -> vector<16x1440xf32>
    %87 = vector.broadcast %52 : vector<16x1xf32> to vector<16x1440xf32>
    %88 = arith.addf %86, %87 : vector<16x1440xf32>
    %cst_114 = arith.constant 0.000000e+00 : f32
    %89 = vector.broadcast %cst_114 : f32 to vector<16x1440xf32>
    %90 = arith.cmpf ogt, %88, %89 : vector<16x1440xf32>
    %91 = vector.broadcast %53 : vector<16x1xf32> to vector<16x1440xf32>
    %92 = arith.mulf %91, %88 : vector<16x1440xf32>
    %93 = arith.select %90, %88, %92 : vector<16x1440xi1>, vector<16x1440xf32>
    %94 = arith.truncf %93 : vector<16x1440xf32> to vector<16x1440xbf16>
    %cst_115 = arith.constant dense<0.000000e+00> : vector<8x16xf32>
    %95 = tpu.matmul %50, %94, %cst_115 {dimension_numbers = #tpu.dot_dimension_numbers<[1], [1], [0], [0], [0, 0, 1, 0], [], []>} : vector<8x1440xbf16>, vector<16x1440xbf16>, vector<8x16xf32> -> vector<8x16xf32>
    %cst_116 = arith.constant dense<0.000000e+00> : vector<8x128xf32>
    %96 = tpu.matmul %95, %54, %cst_116 {dimension_numbers = #tpu.dot_dimension_numbers<[1], [0], [0], [1], [0, 0, 1, 1], [], []>} : vector<8x16xf32>, vector<16x128xf32>, vector<8x128xf32> -> vector<8x128xf32>
    %97 = vector.broadcast %55 : vector<1x128xf32> to vector<8x128xf32>
    %98 = arith.addf %96, %97 : vector<8x128xf32>
    %c0_117 = arith.constant 0 : index
    %c0_118 = arith.constant 0 : index
    %99 = vector.load %arg16[%c0_117, %c0_118] : memref<8x128xf32, #tpu.memory_space<vmem>>, vector<8x128xf32>
    tpu.vector_store %arg16[%c0_117, %c0_118], %98 {strides = array<i32>} : memref<8x128xf32, #tpu.memory_space<vmem>>, vector<8x128xf32>,
    return
  }
  func.func @transform_0(%arg0: i32) -> (i32, i32, i32) {
    %c0_i32 = arith.constant 0 : i32
    %c0_i32_0 = arith.constant 0 : i32
    %c0_i32_1 = arith.constant 0 : i32
    return %arg0, %c0_i32, %c0_i32_0 : i32, i32, i32
  }
  func.func @transform_1(%arg0: i32) -> (i32, i32, i32) {
    %c0_i32 = arith.constant 0 : i32
    %c0_i32_0 = arith.constant 0 : i32
    %c0_i32_1 = arith.constant 0 : i32
    return %arg0, %c0_i32, %c0_i32_0 : i32, i32, i32
  }
  func.func @transform_2(%arg0: i32) -> (i32, i32) {
    %c0_i32 = arith.constant 0 : i32
    %c0_i32_0 = arith.constant 0 : i32
    %c0_i32_1 = arith.constant 0 : i32
    return %c0_i32, %c0_i32_0 : i32, i32
  }
  func.func @transform_3(%arg0: i32) -> (i32, i32) {
    %c0_i32 = arith.constant 0 : i32
    %c0_i32_0 = arith.constant 0 : i32
    %c0_i32_1 = arith.constant 0 : i32
    return %c0_i32, %c0_i32_0 : i32, i32
  }
  func.func @transform_4(%arg0: i32) -> (i32, i32) {
    %c0_i32 = arith.constant 0 : i32
    %c0_i32_0 = arith.constant 0 : i32
    %c0_i32_1 = arith.constant 0 : i32
    return %c0_i32, %c0_i32_0 : i32, i32
  }
  func.func @transform_5(%arg0: i32) -> (i32, i32) {
    %c0_i32 = arith.constant 0 : i32
    %c0_i32_0 = arith.constant 0 : i32
    %c0_i32_1 = arith.constant 0 : i32
    return %c0_i32, %c0_i32_0 : i32, i32
  }
  func.func @transform_6(%arg0: i32) -> (i32, i32) {
    %c0_i32 = arith.constant 0 : i32
    %c0_i32_0 = arith.constant 0 : i32
    %c0_i32_1 = arith.constant 0 : i32
    return %c0_i32, %c0_i32_0 : i32, i32
  }
  func.func @transform_7(%arg0: i32) -> (i32, i32) {
    %c0_i32 = arith.constant 0 : i32
    %c0_i32_0 = arith.constant 0 : i32
    %c0_i32_1 = arith.constant 0 : i32
    return %c0_i32, %c0_i32_0 : i32, i32
  }
  func.func @transform_8(%arg0: i32) -> (i32, i32) {
    %c0_i32 = arith.constant 0 : i32
    %c0_i32_0 = arith.constant 0 : i32
    %c0_i32_1 = arith.constant 0 : i32
    return %c0_i32, %c0_i32_0 : i32, i32
  }
  func.func @transform_9(%arg0: i32) -> (i32, i32) {
    %c0_i32 = arith.constant 0 : i32
    %c0_i32_0 = arith.constant 0 : i32
    %c0_i32_1 = arith.constant 0 : i32
    return %c0_i32, %c0_i32_0 : i32, i32
  }
  func.func @transform_10(%arg0: i32) -> (i32, i32) {
    %c0_i32 = arith.constant 0 : i32
    %c0_i32_0 = arith.constant 0 : i32
    %c0_i32_1 = arith.constant 0 : i32
    return %c0_i32, %c0_i32_0 : i32, i32
  }
  func.func @transform_11(%arg0: i32) -> (i32, i32) {
    %c0_i32 = arith.constant 0 : i32
    %c0_i32_0 = arith.constant 0 : i32
    %c0_i32_1 = arith.constant 0 : i32
    return %c0_i32, %c0_i32_0 : i32, i32
  }
  func.func @transform_12(%arg0: i32) -> (i32, i32) {
    %c0_i32 = arith.constant 0 : i32
    %c0_i32_0 = arith.constant 0 : i32
    %c0_i32_1 = arith.constant 0 : i32
    return %c0_i32, %c0_i32_0 : i32, i32
  }
  func.func @transform_13(%arg0: i32) -> (i32, i32) {
    %c0_i32 = arith.constant 0 : i32
    %c0_i32_0 = arith.constant 0 : i32
    %c0_i32_1 = arith.constant 0 : i32
    return %c0_i32, %c0_i32_0 : i32, i32
  }
  func.func @transform_14(%arg0: i32) -> (i32, i32) {
    %c0_i32 = arith.constant 0 : i32
    %c0_i32_0 = arith.constant 0 : i32
    return %arg0, %c0_i32 : i32, i32
  }
  func.func @transform_15(%arg0: i32) -> (i32, i32) {
    %c0_i32 = arith.constant 0 : i32
    %c0_i32_0 = arith.constant 0 : i32
    return %arg0, %c0_i32 : i32, i32
  }
}

</mosaic_0001>

<bundles_post_ra>
// kernel: avtsnet_forward.1
= control target key start
LH: loop header
LB: loop body
LE: loop exit
PB: predicated region body
PF: predicated region fallthrough
CT: control target
= control target key end

     0   :  { %s6828_s18 = smov 0   ;;  %s9456_s0 = inlined_call_operand.vmem [shape: bf16[2,1,2630], index: 0, kind: input, shape index: {}]   ;;  %s9457_s1 = inlined_call_operand.vmem [shape: bf16[2,1,1478], index: 1, kind: input, shape index: {}]   ;;  %s9458_s2 = inlined_call_operand.vmem [shape: bf16[8,2592], index: 2, kind: input, shape index: {}]   ;;  %s9459_s3 = inlined_call_operand.vmem [shape: bf16[8,1440], index: 3, kind: input, shape index: {}]   ;;  %s9460_s4 = inlined_call_operand.vmem [shape: bf16[16,16], index: 4, kind: input, shape index: {}]   ;;  %s9461_s5 = inlined_call_operand.vmem [shape: f32[16,1], index: 5, kind: input, shape index: {}]   ;;  %s9462_s6 = inlined_call_operand.vmem [shape: f32[16,1], index: 6, kind: input, shape index: {}]   ;;  %s9463_s7 = inlined_call_operand.vmem [shape: f32[16,128], index: 7, kind: input, shape index: {}]   ;;  %s9464_s8 = inlined_call_operand.vmem [shape: f32[1,128], index: 8, kind: input, shape index: {}]   ;;  %s9465_s9 = inlined_call_operand.vmem [shape: bf16[16,16], index: 9, kind: input, shape index: {}]   ;;  %s9466_s10 = inlined_call_operand.vmem [shape: f32[16,1], index: 10, kind: input, shape index: {}]   ;;  %s9467_s11 = inlined_call_operand.vmem [shape: f32[16,1], index: 11, kind: input, shape index: {}]   ;;  %s9468_s12 = inlined_call_operand.vmem [shape: f32[16,128], index: 12, kind: input, shape index: {}]   ;;  %s9469_s13 = inlined_call_operand.vmem [shape: f32[1,128], index: 13, kind: input, shape index: {}]   ;;  %s9470_s14 = inlined_call_operand.vmem [shape: f32[16,128], index: 14, kind: output, shape index: {0}]   ;;  %s9471_s15 = inlined_call_operand.vmem [shape: f32[16,128], index: 15, kind: output, shape index: {1}]  }
   0x1 LB: > { %s6346_s19 = sadd.s32 4294967295, %s6734_s18   ;;  %p6350_p0 = scmp.ge.s32.totalorder %s6734_s18, 1  ;;  %s6734_s18 = sphi %s6828_s18, %s26_s18  }
   0x2   : > { %p448_p1 = scmp.lt.s32.totalorder %s6734_s18, 3 }
   0x4   : > { %p449_p2 = pnand %p6350_p0, %p448_p1 }
   0x6   : > { %452 = sbr.rel (%p449_p2) target bundleno = 1358 (0x54e), region = 76 }
   0xb   : > { %p502_p3 = scmp.lt.s32.totalorder %s6346_s19, 1  ;;  %v549_v0 = vlaneseq  ;;  %v6736_v1 = vmov 1935823168   ;;  %s6737_s24 = smov 109   ;;  %vm9475_vm0 = vcmask 1040384   ;;  %vm9474_vm2 = vcmask 1044484  }
   0xc   : > { %v547_v2 = vunpack.c.l.s4 %v6736_v1  ;;  %s6738_s25 = smov 126   ;;  %s6739_s26 = smov 90   ;;  %vm684_vm1 = vsmask.f32 256  ;;  %vm9472_vm3 = vsmask.f32 4352 }
   0xd   : > { %s10033_s19 = smov (!%p502_p3, %s6346_s19), 1  ;;  %v550_v3 = vshrl.u32 %v549_v0, 7  ;;  %s6740_s27 = smov 92   ;;  %vm6915_vm4 = vmand %vm9475_vm0, %vm684_vm1  ;;  %vm9477_vm7 = vcmask 1041409   ;;  %vm9476_vm8 = vsmask.f32 1280 }
   0xe   : > { %v548_v4 = vunpack.c.0.s8 %v547_v2  ;;  %s6490_s20 = smul.u32 21, %s10033_s19  ;;  %s6741_s28 = smov 110   ;;  %vm688_vm5 = vmand %vm9474_vm2, %vm9472_vm3  ;;  %vm9479_vm9 = vcmask 1045509   ;;  %vm9473_vm10 = vcmask 253952   ;;  %vm9478_vm11 = vsmask.f32 5376 }
   0xf   : > { %s6742_s29 = smov 127   ;;  %s6743_s30 = smov 91   ;;  %vm6938_vm6 = vmor %vm688_vm5, %vm6915_vm4  ;;  %vm9483_vm14 = vcmask 1043459   ;;  %vm9482_vm5 = vcmask 1047559   ;;  %vm9481_vm3 = vsmask.f32 7424 }
  0x10   : > { %v6839_v5 = vsub.s32 %v548_v4, %v550_v3  ;;  %s6844_s23 = scalar_lea.vmem %s9456_s0, %s6490_s20  ;;  %s6744_s16 = smov 108   ;;  %vm7137_vm12 = vmand %vm9473_vm10, %vm684_vm1  ;;  %vm9480_vm1 = vsmask.f32 3328  ;;  %vm9485_vm2 = vcmask 1042434   ;;  %vm9484_vm0 = vsmask.f32 2304 }
  0x11   : > { %v1518_v6 = vld [vmem:[%s6844_s23] sm:$0xff]  ;;  %v1519_v29 = vld [vmem:[%s6844_s23 + $0x8] sm:$0xff]  ;;  %s6491_s17 = smul.u32 12, %s10033_s19  ;;  %vm7176_vm10 = vmand %vm9477_vm7, %vm9476_vm8  ;;  %vm9594_vm7 = vcmask 736256  }
  0x12   : > { %v1538_v7 = vrot.slane %v1518_v6, %v6839_v5  ;;  %v1524_v8 = vcombine.low %v1518_v6, %v1518_v6  ;;  %v1002_v11 = vcombine.high %v1518_v6, %v1518_v6  ;;  %v1569_v32 = vcombine.low %v1519_v29, %v1519_v29  ;;  %v539_v3 = vld [vmem:[%s6844_s23] sm:$0xff]  ;;  %vm7186_vm15 = vmand %vm9479_vm9, %vm9478_vm11 }
  0x13   : > { %v1054_v33 = vrot.slane %v1519_v29, %v6839_v5  ;;  %v1047_v59 = vcombine.high %v1519_v29, %v1519_v29  ;;  %v9562_v6 = vmov 0  ;;  %s7044_s22 = scalar_lea.vmem %s9457_s1, %s6491_s17  ;;  %vm9486_vm11 = vsmask.f32 6400  ;;  %vm7207_vm9 = vmor %vm7186_vm15, %vm7176_vm10 }
  0x14   : > { %v1561_v9 = vrot.slane %v1538_v7, %v6839_v5  ;;  %v1531_v10 = vrot.slane %v1524_v8, %v6839_v5  ;;  %v1017_v12 = vcombine.low %v1538_v7, %v1538_v7  ;;  %v1540_v14 = vcombine.high %v1538_v7, %v1538_v7  ;;  %vm7225_vm8 = vmand %vm9483_vm14, %vm9480_vm1 }
  0x15   : > { %v1016_v15 = vrot.slane %v1002_v11, %v6839_v5  ;;  %v1576_v40 = vrot.slane %v1569_v32, %v6839_v5  ;;  %v1062_v43 = vcombine.low %v1054_v33, %v1054_v33  ;;  %v6887_v49 = vrot.slane %v1054_v33, %v6839_v5  ;;  %v690_v11 = vld [vmem:[#allocation2] sm:$0x11]  ;;  %vm7239_vm13 = vmand %vm9482_vm5, %vm9481_vm3 }
  0x16   : > { %1655 = vrot.lane.b32.xlu1 %v1561_v9, %s6737_s24  ;;  %1132 = vrot.lane.b32.xlu0 %v1561_v9, %s6738_s25  ;;  %v1547_v13 = vrot.slane %v1531_v10, %v6839_v5  ;;  %v1025_v16 = vrot.slane %v1017_v12, %v6839_v5  ;;  %v2060_v17 = vcombine.low %v1531_v10, %v1531_v10  ;;  %v1371_v25 = vshll.u32 %v1561_v9, 16 }
  0x17   : > { %v2597_v18 = vrot.slane %v1540_v14, %v6839_v5  ;;  %v1539_v20 = vcombine.high %v1531_v10, %v1531_v10  ;;  %v1018_v21 = vcombine.low %v1016_v15, %v1016_v15  ;;  %v2604_v24 = vrot.slane %v1016_v15, %v6839_v5 }
  0x18   : > { %v2068_v19 = vrot.slane %v2060_v17, %v6839_v5  ;;  %v2583_v26 = vcombine.high %v1016_v15, %v1016_v15  ;;  %v1373_v28 = vrot.slane %v1371_v25, 7  ;;  %v2416_v34 = vrot.slane %v1371_v25, 5 }
  0x19   : > { %v1554_v22 = vrot.slane %v1539_v20, %v6839_v5  ;;  %v1039_v23 = vrot.slane %v1018_v21, %v6839_v5  ;;  %v1375_v27 = vshll.u32 %v2597_v18, 16  ;;  %v1894_v36 = vrot.slane %v1371_v25, 6 }
  0x1a   : > { %1651 = vrot.lane.b32.xlu1 %v1547_v13, %s6737_s24  ;;  %2694 = vrot.lane.b32.xlu0 %v1561_v9, %s6739_s26  ;;  %v2611_v30 = vrot.slane %v2583_v26, %v6839_v5  ;;  %v2105_v44 = vcombine.low %v1576_v40, %v1576_v40  ;;  %v1592_v45 = vrot.slane %v1576_v40, %v6839_v5  ;;  %v1379_v47 = vshll.u32 %v2604_v24, 16 }
  0x1b   : > { %v1377_v31 = vrot.slane %v1375_v27, 7  ;;  %v2420_v35 = vrot.slane %v1375_v27, 5  ;;  %v1898_v37 = vrot.slane %v1375_v27, 6  ;;  %v6512_v39 = vpack.i.bf16 %v1375_v27, %v1371_v25 }
  0x1c   : > { %v6882_v46 = vrot.slane %v1062_v43, %v6839_v5  ;;  %v1383_v48 = vshll.u32 %v2611_v30, 16  ;;  %v2113_v50 = vrot.slane %v2105_v44, %v6839_v5  ;;  %v1381_v51 = vrot.slane %v1379_v47, 7  ;;  %v6971_v43 = vld [vmem:[%s6844_s23 + $0x10] sm:$0x1f] }
  0x1d   : > { %v6517_v38 = vpack.i.bf16 %v1377_v31, %v1373_v28  ;;  %v6527_v41 = vpack.i.bf16 %v2420_v35, %v2416_v34  ;;  %v6522_v42 = vpack.i.bf16 %v1898_v37, %v1894_v36  ;;  %v2424_v53 = vrot.slane %v1379_v47, 5  ;;  %v699_v31 = vld [vmem:[#allocation2 + $0x18] sm:$0x11]  ;;  %v6974_v44 = vld [vmem:[%s6844_s23 + $0x10] sm:$0x1f] }
  0x1e   : > { %2175 = vrot.lane.b32.xlu1 %v1547_v13, %s6740_s27  ;;  %1130 = vrot.lane.b32.xlu0 %v1025_v16, %s6738_s25  ;;  %v1385_v52 = vrot.slane %v1383_v48, 7  ;;  %v1902_v54 = vrot.slane %v1379_v47, 6  ;;  %v6532_v56 = vpack.i.bf16 %v1383_v48, %v1379_v47  ;;  %v2428_v57 = vrot.slane %v1383_v48, 5 }
  0x1f   : > { %v1906_v58 = vrot.slane %v1383_v48, 6  ;;  %v1584_v62 = vcombine.high %v1576_v40, %v1576_v40  ;;  %v6899_v63 = vrot.slane %v1047_v59, %v6839_v5  ;;  %v2627_v0 = vcombine.high %v1054_v33, %v1054_v33  ;;  %v2041_v48 = vld [vmem:[%s6844_s23 + $0x10] sm:$0x1f] }
  0x20   : > { %v6537_v55 = vpack.i.bf16 %v1385_v52, %v1381_v51  ;;  %v6547_v60 = vpack.i.bf16 %v2428_v57, %v2424_v53  ;;  %v9563_v6 = vsel %vm6915_vm4, 4294967295, %v9562_v6  ;;  %v1387_v7 = vshll.u32 %v6887_v49, 16 }
  0x21   : > { %v6542_v61 = vpack.i.bf16 %v1906_v58, %v1902_v54  ;;  %v1599_v1 = vrot.slane %v1584_v62, %v6839_v5  ;;  %v1063_v2 = vcombine.low %v6899_v63, %v6899_v63  ;;  %v6908_v4 = vrot.slane %v2627_v0, %v6839_v5  ;;  %9564 = vst [vmem:[#allocation4_spill] sm:$0xff] %v9563_v6 }
  0x22   : > { %2696 = vrot.lane.b32.xlu1 %v2597_v18, %s6739_s26  ;;  %2173 = vrot.lane.b32.xlu0 %v2068_v19, %s6740_s27  ;;  %v552_v8 = vrot.slane %v539_v3, %v6839_v5  ;;  %v6926_v10 = vrot.slane %v6899_v63, %v6839_v5  ;;  %v545_v15 = vcombine.high %v539_v3, %v539_v3  ;;  %v9565_v17 = vmov 0 }
  0x23   : > { %v1391_v12 = vshll.u32 %v6908_v4, 16  ;;  %v9566_v17 = vsel %vm6938_vm6, 4294967295, %v9565_v17  ;;  %v1389_v19 = vrot.slane %v1387_v7, 7  ;;  %v2432_v36 = vrot.slane %v1387_v7, 5 }
  0x24   : > { %v560_v13 = vcombine.high %v552_v8, %v552_v8  ;;  %v568_v14 = vrot.slane %v552_v8, %v6839_v5  ;;  %v559_v21 = vrot.slane %v545_v15, %v6839_v5  ;;  %v1910_v37 = vrot.slane %v1387_v7, 6  ;;  %v708_v8 = vld [vmem:[#allocation2 + $0x30] sm:$0x11] }
  0x25   : > { %v1393_v26 = vrot.slane %v1391_v12, 7  ;;  %v6552_v40 = vpack.i.bf16 %v1391_v12, %v1387_v7  ;;  %v6985_v51 = vrot.slane %v6974_v44, %v6839_v5  ;;  %v2135_v52 = vcombine.low %v2041_v48, %v2041_v48  ;;  %v705_v7 = vld [vmem:[#allocation2 + $0x28] sm:$0x11] }
  0x26   : > { %1653 = vrot.lane.b32.xlu1 %v1554_v22, %s6737_s24  ;;  %1134 = vrot.lane.b32.xlu0 %v1039_v23, %s6738_s25  ;;  %v691_v20 = vsel %vm6938_vm6, %v568_v14, %v690_v11  ;;  %v575_v22 = vrot.slane %v560_v13, %v6839_v5  ;;  %v9499_v23 = vmov 0   ;;  %v561_v27 = vcombine.high %v559_v21, %v559_v21  ;;  %v7035_v14 = vld [vmem:[%s6844_s23 + $0x10] sm:$0x1f] }
  0x27   : > { %3010 = vmatprep.mubr.bf16.mxu0 %v9499_v23  ;;  %3053 = vmatprep.mubr.bf16.mxu1 %v9499_v23  ;;  %692 = vst [vmem:[#allocation2] sm:$0x11] %v691_v20  ;;  %v582_v28 = vrot.slane %v559_v21, %v6839_v5  ;;  %v6997_v57 = vrot.slane %v2135_v52, %v6839_v5  ;;  %vm9582_vm1 = vcmask 1043456   ;;  %vm9583_vm3 = vcmask 1031168  }
  0x28   : > { %6613 = vset.pattern.permute.xlu1 %v9499_v23  ;;  %6612 = vset.pattern.permute.xlu0 %v9499_v23  ;;  %v589_v34 = vrot.slane %v561_v27, %v6839_v5  ;;  %v1092_v27 = vcombine.high %v6974_v44, %v6974_v44  ;;  %v1122_v44 = vrot.slane %v6985_v51, %v6839_v5  ;;  %vm9591_vm14 = vcmask 1046534  }
  0x29   : > { %v2150_v0 = vcombine.low %v6997_v57, %v6997_v57  ;;  %vm9595_vm15 = vcmask 752640  }
  0x2a   : > { %2698 = vrot.lane.b32.xlu1 %v2604_v24, %s6739_s26  ;;  %2177 = vrot.lane.b32.xlu0 %v1025_v16, %s6740_s27  ;;  %v6931_v16 = vld [vmem:[%s6844_s23 + $0x8] sm:$0xff] }
  0x2b   : > { %v597_v25 = vrot.slane %v6931_v16, %v6839_v5  ;;  %v590_v59 = vcombine.high %v6931_v16, %v6931_v16 }
  0x2d   : > { %v613_v32 = vrot.slane %v597_v25, %v6839_v5  ;;  %v605_v58 = vcombine.high %v597_v25, %v597_v25 }
  0x2e   : > { %1657 = vrot.lane.b32.xlu1 %v2597_v18, %s6737_s24  ;;  %1136 = vrot.lane.b32.xlu0 %v2604_v24, %s6738_s25  ;;  %v693_v18 = vld [vmem:[#allocation2 + $0x8] sm:$0x11]  ;;  %v696_v24 = vld [vmem:[#allocation2 + $0x10] sm:$0x11] }
  0x2f   : > { %v694_v29 = vsel %vm6938_vm6, %v575_v22, %v693_v18  ;;  %v697_v33 = vsel %vm6938_vm6, %v582_v28, %v696_v24  ;;  %v828_v18 = vrot.slane %v7035_v14, %v6839_v5 }
  0x30   : > { %695 = vst [vmem:[#allocation2 + $0x8] sm:$0x11] %v694_v29  ;;  %698 = vst [vmem:[#allocation2 + $0x10] sm:$0x11] %v697_v33  ;;  %v7056_v33 = vld [vmem:[%s6844_s23 + $0x10] sm:$0x1f] }
  0x31   : > { %v836_v29 = vcombine.high %v828_v18, %v828_v18 }
  0x32   : > { %2700 = vrot.lane.b32.xlu1 %v2611_v30, %s6739_s26  ;;  %2179 = vrot.lane.b32.xlu0 %v1561_v9, %s6740_s27  ;;  %v1084_v9 = vrot.slane %v1063_v2, %v6839_v5  ;;  %v702_v30 = vld [vmem:[#allocation2 + $0x20] sm:$0x11] }
  0x33   : > { %v703_v35 = vsel %vm6938_vm6, %v613_v32, %v702_v30  ;;  %v2149_v32 = vrot.slane %v2041_v48, %v6839_v5 }
  0x34   : > { %704 = vst [vmem:[#allocation2 + $0x20] sm:$0x11] %v703_v35 }
  0x36   : > { %6518 = vrot.lane.b32.xlu1 %v6517_v38, %s6741_s28  ;;  %6513 = vrot.lane.b32.xlu0 %v6512_v39, %s6742_s29  ;;  %v700_v38 = vsel %vm6938_vm6, %v589_v34, %v699_v31  ;;  %v6557_v39 = vpack.i.bf16 %v1393_v26, %v1389_v19 }
  0x37   : > { %701 = vst [vmem:[#allocation2 + $0x18] sm:$0x11] %v700_v38  ;;  %v1106_v38 = vrot.slane %v1092_v27, %v6839_v5 }
  0x3a   : > { %6528 = vrot.lane.b32.xlu1 %v6527_v41, %s6743_s30  ;;  %6523 = vrot.lane.b32.xlu0 %v6522_v42, %s6744_s16  ;;  %v2436_v41 = vrot.slane %v1391_v12, 5  ;;  %v1914_v42 = vrot.slane %v1391_v12, 6 }
  0x3c   : > { %v6562_v47 = vpack.i.bf16 %v1914_v42, %v1910_v37  ;;  %v7063_v37 = vld [vmem:[%s6844_s23 + $0x10] sm:$0x1f]  ;;  %v2383_v42 = vrot.slane %v7056_v33, %v6839_v5 }
  0x3d   : > { %v1861_v48 = vrot.slane %v7063_v37, %v6839_v5 }
  0x3e   : > { %1659 = vrot.lane.b32.xlu1 %v1592_v45, %s6737_s24  ;;  %1138 = vrot.lane.b32.xlu0 %v6882_v46, %s6738_s25 }
  0x42   : > { %2702 = vrot.lane.b32.xlu1 %v6887_v49, %s6739_s26  ;;  %2181 = vrot.lane.b32.xlu0 %v2113_v50, %s6740_s27  ;;  %v1614_v50 = vcombine.low %v6971_v43, %v6971_v43 }
  0x44   : > { %v1621_v54 = vrot.slane %v1614_v50, %v6839_v5  ;;  %v2151_v50 = vcombine.low %v2149_v32, %v2149_v32  ;;  %v722_v32 = vld [vmem:[#allocation2 + $0x50] sm:$0x1] }
  0x46   : > { %6538 = vrot.lane.b32.xlu1 %v6537_v55, %s6741_s28  ;;  %6533 = vrot.lane.b32.xlu0 %v6532_v56, %s6742_s29  ;;  %v1107_v55 = vcombine.low %v6985_v51, %v6985_v51  ;;  %v6994_v56 = vld [vmem:[%s6844_s23 + $0x10] sm:$0x1f]  ;;  %v1629_v28 = vcombine.high %v1621_v54, %v1621_v54  ;;  %v1108_v51 = vcombine.low %v1106_v38, %v1106_v38 }
  0x47   : > { %v7011_v62 = vrot.slane %v6994_v56, %v6839_v5  ;;  %v2657_v31 = vcombine.high %v6994_v56, %v6994_v56  ;;  %v2391_v56 = vcombine.high %v2383_v42, %v2383_v42 }
  0x48   : > { %v1115_v3 = vrot.slane %v1107_v55, %v6839_v5 }
  0x49   : > { %v2679_v12 = vrot.slane %v7011_v62, %v6839_v5 }
  0x4a   : > { %6548 = vrot.lane.b32.xlu1 %v6547_v60, %s6743_s30  ;;  %6543 = vrot.lane.b32.xlu0 %v6542_v61, %s6744_s16  ;;  %v7006_v60 = vrot.slane %v590_v59, %v6839_v5  ;;  %v1636_v61 = vrot.slane %v1621_v54, %v6839_v5  ;;  %v2165_v54 = vrot.slane %v6997_v57, %v6839_v5 }
  0x4b   : > { %v7095_v57 = vrot.slane %v2151_v50, %v6839_v5 }
  0x4c   : > { %v627_v2 = vrot.slane %v7006_v60, %v6839_v5 }
  0x4e   : > { %1661 = vrot.lane.b32.xlu1 %v1599_v1, %s6737_s24  ;;  %1140 = vrot.lane.b32.xlu0 %v6887_v49, %s6738_s25  ;;  %v620_v1 = vrot.slane %v605_v58, %v6839_v5  ;;  %v709_v11 = vsel %vm6938_vm6, %v627_v2, %v708_v8  ;;  %v541_v2 = vld [vmem:[%s6844_s23 + $0x10] sm:$0x1f] }
  0x4f   : > { %710 = vst [vmem:[#allocation2 + $0x30] sm:$0x11] %v709_v11  ;;  %v1876_v11 = vrot.slane %v1861_v48, %v6839_v5 }
  0x52   : > { %2704 = vrot.lane.b32.xlu1 %v6908_v4, %s6739_s26  ;;  %2183 = vrot.lane.b32.xlu0 %v1592_v45, %s6740_s27  ;;  %v6567_v45 = vpack.i.bf16 %v2436_v41, %v2432_v36  ;;  %v850_v41 = vrot.slane %v836_v29, %v6839_v5 }
  0x56   : > { %1663 = vrot.lane.b32.xlu1 %v6887_v49, %s6737_s24  ;;  %1142 = vrot.lane.b32.xlu0 %v1084_v9, %s6738_s25  ;;  %v7024_v9 = vld [vmem:[%s6844_s23 + $0x10] sm:$0x1f] }
  0x57   : > { %v1340_v16 = vrot.slane %v7024_v9, %v6839_v5 }
  0x59   : > { %v1348_v26 = vcombine.high %v1340_v16, %v1340_v16  ;;  %v1355_v35 = vrot.slane %v1340_v16, %v6839_v5 }
  0x5a   : > { %2706 = vrot.lane.b32.xlu1 %v6926_v10, %s6739_s26  ;;  %2185 = vrot.lane.b32.xlu0 %v6882_v46, %s6740_s27  ;;  %v2628_v46 = vcombine.high %v6899_v63, %v6899_v63  ;;  %v1395_v63 = vshll.u32 %v6926_v10, 16 }
  0x5b   : > { %v1362_v36 = vrot.slane %v1348_v26, %v6839_v5  ;;  %v1403_v52 = vshll.u32 %v1355_v35, 16  ;;  %v1924_v26 = vshll.u32 %v1876_v11, 16 }
  0x5c   : > { %v2656_v53 = vrot.slane %v2628_v46, %v6839_v5  ;;  %v1397_v13 = vrot.slane %v1395_v63, 7  ;;  %v2440_v19 = vrot.slane %v1395_v63, 5  ;;  %v1918_v21 = vrot.slane %v1395_v63, 6 }
  0x5d   : > { %v7082_v46 = vrot.slane %v2657_v31, %v6839_v5  ;;  %v4463_v31 = vld [vmem:[%s7044_s22] sm:$0xff] }
  0x5e   : > { %6558 = vrot.lane.b32.xlu1 %v6557_v39, %s6741_s28  ;;  %6553 = vrot.lane.b32.xlu0 %v6552_v40, %s6742_s29  ;;  %v1643_v39 = vrot.slane %v1629_v28, %v6839_v5  ;;  %v843_v40 = vrot.slane %v828_v18, %v6839_v5  ;;  %v821_v18 = vcombine.high %v7035_v14, %v7035_v14 }
  0x5f   : > { %v4467_v38 = vcombine.high %v4463_v31, %v4463_v31  ;;  %v7152_v50 = vrot.slane %v4463_v31, %v6839_v5 }
  0x60   : > { %v883_v55 = vshll.u32 %v843_v40, 16  ;;  %v835_v35 = vrot.slane %v821_v18, %v6839_v5  ;;  %v4744_v40 = vcombine.low %v4463_v31, %v4463_v31 }
  0x61   : > { %v4338_v11 = vcombine.high %v7152_v50, %v7152_v50 }
  0x62   : > { %6568 = vrot.lane.b32.xlu1 %v6567_v45, %s6743_s30  ;;  %6563 = vrot.lane.b32.xlu0 %v6562_v47, %s6744_s16  ;;  %v2672_v45 = vcombine.high %v7011_v62, %v7011_v62  ;;  %v1628_v47 = vrot.slane %v6971_v43, %v6839_v5  ;;  %v886_v43 = vshll.u32 %v850_v41, 16  ;;  %v606_v62 = vcombine.high %v7006_v60, %v7006_v60 }
  0x63   : > { %v1333_v60 = vcombine.high %v7024_v9, %v7024_v9 }
  0x64   : > { %v2686_v58 = vrot.slane %v2672_v45, %v6839_v5  ;;  %v1650_v59 = vrot.slane %v1628_v47, %v6839_v5  ;;  %v7103_v8 = vpack.i.bf16 %v886_v43, %v883_v55  ;;  %v634_v9 = vrot.slane %v606_v62, %v6839_v5 }
  0x66   : > { %1665 = vrot.lane.b32.xlu1 %v6908_v4, %s6737_s24  ;;  %1144 = vrot.lane.b32.xlu0 %v6926_v10, %s6738_s25  ;;  %v1399_v4 = vshll.u32 %v2656_v53, 16  ;;  %v706_v10 = vsel %vm6938_vm6, %v620_v1, %v705_v7  ;;  %v642_v7 = vrot.slane %v541_v2, %v6839_v5 }
  0x67   : > { %707 = vst [vmem:[#allocation2 + $0x28] sm:$0x11] %v706_v10  ;;  %v2405_v10 = vrot.slane %v2391_v56, %v6839_v5  ;;  %v7164_v56 = vrot.slane %v4467_v38, %v6839_v5 }
  0x68   : > { %v1401_v15 = vrot.slane %v1399_v4, 7  ;;  %v2444_v20 = vrot.slane %v1399_v4, 5  ;;  %v6572_v24 = vpack.i.bf16 %v1399_v4, %v1395_v63  ;;  %v1922_v25 = vrot.slane %v1399_v4, 6 }
  0x69   : > { %v2693_v63 = vrot.slane %v7082_v46, %v6839_v5  ;;  %v2398_v4 = vrot.slane %v2383_v42, %v6839_v5  ;;  %v2450_v29 = vshll.u32 %v2405_v10, 16  ;;  %v4483_v10 = vcombine.low %v7164_v56, %v7164_v56 }
  0x6a   : > { %2708 = vrot.lane.b32.xlu1 %v2656_v53, %s6739_s26  ;;  %2187 = vrot.lane.b32.xlu0 %v6887_v49, %s6740_s27  ;;  %v2158_v49 = vrot.slane %v2150_v0, %v6839_v5  ;;  %v6577_v22 = vpack.i.bf16 %v1401_v15, %v1397_v13  ;;  %v6587_v30 = vpack.i.bf16 %v2444_v20, %v2440_v19  ;;  %v1407_v53 = vshll.u32 %v1362_v36, 16 }
  0x6b   : > { %v6582_v34 = vpack.i.bf16 %v1922_v25, %v1918_v21  ;;  %v1405_v0 = vrot.slane %v1403_v52, 7  ;;  %v657_v15 = vrot.slane %v642_v7, %v6839_v5  ;;  %v1854_v19 = vcombine.high %v7063_v37, %v7063_v37  ;;  %v714_v25 = vld [vmem:[#allocation2 + $0x40] sm:$0x11]  ;;  %v717_v52 = vld [vmem:[#allocation2 + $0x48] sm:$0x11] }
  0x6c   : > { %v1409_v1 = vrot.slane %v1407_v53, 7  ;;  %v7120_v20 = vshll.u32 %v2398_v4, 16  ;;  %v1347_v21 = vrot.slane %v1333_v60, %v6839_v5  ;;  %v9567_v37 = vmov 0 }
  0x6d   : > { %v715_v14 = vsel %vm6938_vm6, %v657_v15, %v714_v25  ;;  %v1868_v36 = vrot.slane %v1854_v19, %v6839_v5  ;;  %v9568_v37 = vsel %vm7137_vm12, 4294967295, %v9567_v37  ;;  %v2452_v53 = vrot.slane %v2450_v29, 5 }
  0x6e   : > { %1667 = vrot.lane.b32.xlu1 %v1636_v61, %s6737_s24  ;;  %1146 = vrot.lane.b32.xlu0 %v1115_v3, %s6738_s25  ;;  %v1869_v61 = vcombine.high %v1861_v48, %v1861_v48  ;;  %v1129_v3 = vrot.slane %v1108_v51, %v6839_v5  ;;  %v7114_v16 = vpack.i.bf16 %v1409_v1, %v1405_v0  ;;  %v2448_v47 = vrot.slane %v7120_v20, 5 }
  0x6f   : > { %716 = vst [vmem:[#allocation2 + $0x40] sm:$0x11] %v715_v14  ;;  %9569 = vst [vmem:[#allocation5_spill] sm:$0xff] %v9568_v37  ;;  %v1926_v51 = vrot.slane %v1924_v26, 6  ;;  %v1890_v43 = vrot.slane %v1868_v36, %v6839_v5  ;;  %v4482_v0 = vcombine.low %v7152_v50, %v7152_v50  ;;  %v7220_v19 = vrot.slane %v7152_v50, %v6839_v5  ;;  %v1202_v26 = vld [vmem:[#allocation2] sm:$0x22] }
  0x70   : > { %v1883_v13 = vrot.slane %v1869_v61, %v6839_v5  ;;  %v4751_v61 = vrot.slane %v4744_v40, %v6839_v5  ;;  %v7245_v14 = vrot.slane %v4483_v10, %v6839_v5  ;;  %v7248_v29 = vrot.slane %v4338_v11, %v6839_v5  ;;  %v2759_v40 = vld [vmem:[#allocation2 + $0x54] sm:$0x11]  ;;  %v2245_v50 = vld [vmem:[#allocation2] sm:$0x88]  ;;  %v962_v10 = vld [vmem:[#allocation2] sm:$0x11] }
  0x71   : > { %v7260_v36 = vrot.slane %v7164_v56, %v6839_v5  ;;  %v9599_v11 = vmov 0 }
  0x72   : > { %2710 = vrot.lane.b32.xlu1 %v2679_v12, %s6739_s26  ;;  %2189 = vrot.lane.b32.xlu0 %v2158_v49, %s6740_s27  ;;  %v2376_v12 = vcombine.high %v7056_v33, %v7056_v33  ;;  %v635_v49 = vcombine.high %v541_v2, %v541_v2  ;;  %v650_v33 = vcombine.high %v642_v7, %v642_v7  ;;  %v7194_v7 = vshll.u32 %v1890_v43, 16 }
  0x73   : > { %v6607_v2 = vpack.i.bf16 %v2452_v53, %v2448_v47  ;;  %v5037_v4 = vcombine.low %v4751_v61, %v4751_v61  ;;  %v4759_v60 = vcombine.high %v4751_v61, %v4751_v61  ;;  %v7216_v18 = vrot.slane %v4751_v61, %v6839_v5 }
  0x74   : > { %v2390_v27 = vrot.slane %v2376_v12, %v6839_v5  ;;  %v664_v41 = vrot.slane %v650_v33, %v6839_v5  ;;  %v7284_v53 = vshll.u32 %v7220_v19, 16 }
  0x75   : > { %v7233_v25 = vrot.slane %v4759_v60, %v6839_v5 }
  0x76   : > { %6578 = vrot.lane.b32.xlu1 %v6577_v22, %s6741_s28  ;;  %6573 = vrot.lane.b32.xlu0 %v6572_v24, %s6742_s29  ;;  %v649_v22 = vrot.slane %v635_v49, %v6839_v5  ;;  %v711_v24 = vld [vmem:[#allocation2 + $0x38] sm:$0x11]  ;;  %v2412_v48 = vrot.slane %v2390_v27, %v6839_v5  ;;  %v718_v55 = vsel %vm6938_vm6, %v664_v41, %v717_v52  ;;  %v9586_v52 = vmov 0 }
  0x77   : > { %v712_v28 = vsel %vm6938_vm6, %v634_v9, %v711_v24  ;;  %719 = vst [vmem:[#allocation2 + $0x48] sm:$0x11] %v718_v55  ;;  %v7230_v24 = vrot.slane %v5037_v4, %v6839_v5  ;;  %v1726_v4 = vld [vmem:[#allocation2 + $0x8] sm:$0x44] }
  0x78   : > { %713 = vst [vmem:[#allocation2 + $0x38] sm:$0x11] %v712_v28  ;;  %v1934_v28 = vrot.slane %v7194_v7, 6  ;;  %v1205_v7 = vld [vmem:[#allocation2 + $0x8] sm:$0x22] }
  0x7a   : > { %6588 = vrot.lane.b32.xlu1 %v6587_v30, %s6743_s30  ;;  %6583 = vrot.lane.b32.xlu0 %v6582_v34, %s6744_s16  ;;  %v1928_v30 = vshll.u32 %v1883_v13, 16  ;;  %v671_v34 = vrot.slane %v649_v22, %v6839_v5  ;;  %v9577_v22 = vmov 0 }
  0x7b   : > { %v9578_v22 = vsel %vm7225_vm8, 4294967295, %v9577_v22 }
  0x7c   : > { %v723_v42 = vsel %vm7137_vm12, %v671_v34, %v722_v32  ;;  %9579 = vst [vmem:[#allocation7_spill] sm:$0xff] %v9578_v22 }
  0x7d   : > { %724 = vst [vmem:[#allocation2 + $0x50] sm:$0x1] %v723_v42  ;;  %v9584_v42 = vmov 0 }
  0x7e   : > { %1669 = vrot.lane.b32.xlu1 %v1643_v39, %s6737_s24  ;;  %1148 = vrot.lane.b32.xlu0 %v1122_v44, %s6738_s25  ;;  %v1369_v39 = vrot.slane %v1347_v21, %v6839_v5 }
  0x82   : > { %2712 = vrot.lane.b32.xlu1 %v2686_v58, %s6739_s26  ;;  %2191 = vrot.lane.b32.xlu0 %v2165_v54, %s6740_s27  ;;  %v1930_v54 = vrot.slane %v1928_v30, 6  ;;  %v7166_v58 = vshll.u32 %v1369_v39, 16 }
  0x84   : > { %v1413_v12 = vrot.slane %v7166_v58, 7 }
  0x86   : > { %1671 = vrot.lane.b32.xlu1 %v1650_v59, %s6737_s24  ;;  %1150 = vrot.lane.b32.xlu0 %v1129_v3, %s6738_s25  ;;  %v857_v59 = vrot.slane %v835_v35, %v6839_v5  ;;  %v6602_v3 = vpack.i.bf16 %v1930_v54, %v1926_v51  ;;  %v7287_v51 = vshll.u32 %v7248_v29, 16 }
  0x88   : > { %v7145_v44 = vpop.permute.xlu1 %1655  ;;  %v7147_v45 = vpop.permute.xlu0 %1132  ;;  %v889_v13 = vshll.u32 %v857_v59, 16 }
  0x89   : > { %v1153_v20 = vrot.slane %v7147_v45, 4  ;;  %v1675_v30 = vrot.slane %v7145_v44, 4 }
  0x8a   : > { %2714 = vrot.lane.b32.xlu1 %v2693_v63, %s6739_s26  ;;  %2193 = vrot.lane.b32.xlu0 %v7095_v57, %s6740_s27  ;;  %v9570_v63 = vmov 0  ;;  %v7180_v57 = vshll.u32 %v2412_v48, 16 }
  0x8b   : > { %v9571_v63 = vsel %vm7176_vm10, 4294967295, %v9570_v63 }
  0x8c   : > { %v7170_v46 = vpop.permute.xlu1 %1651  ;;  %v7172_v62 = vpop.permute.xlu0 %2694  ;;  %9572 = vst [vmem:[#allocation6_spill] sm:$0xff] %v9571_v63  ;;  %v2456_v9 = vrot.slane %v7180_v57, 5 }
  0x8d   : > { %v2716_v32 = vrot.slane %v7172_v62, 4  ;;  %v1673_v48 = vrot.slane %v7170_v46, 4 }
  0x8e   : > { %6598 = vrot.lane.b32.xlu1 %v7114_v16, %s6741_s28  ;;  %6593 = vrot.lane.b32.xlu0 %v7103_v8, %s6742_s29  ;;  %v7213_v16 = vrot.slane %v4482_v0, %v6839_v5  ;;  %v5316_v0 = vcombine.high %v7164_v56, %v7164_v56 }
  0x90   : > { %v7201_v49 = vpop.permute.xlu1 %2175  ;;  %v1131_v15 = vpop.permute.xlu0 %1130 }
  0x91   : > { %v1152_v21 = vrot.slane %v1131_v15, 4  ;;  %v2196_v38 = vrot.slane %v7201_v49, 4 }
  0x92   : > { %6608 = vrot.lane.b32.xlu1 %v6607_v2, %s6743_s30  ;;  %6603 = vrot.lane.b32.xlu0 %v6602_v3, %s6744_s16  ;;  %v1723_v3 = vld [vmem:[#allocation2] sm:$0x44] }
  0x93   : > { %v1163_v31 = vsel %vm9582_vm1, %v1152_v21, %v1153_v20  ;;  %vm7279_vm1 = vmand %vm9485_vm2, %vm9484_vm0  ;;  %v532_v21 = vld [vmem:[%s9461_s5] sm:$0xff] }
  0x94   : > { %v1165_v33 = vsel %vm9583_vm3, %v1131_v15, %v1163_v31  ;;  %v7256_v34 = vpop.permute.xlu1 %2696  ;;  %v2174_v35 = vpop.permute.xlu0 %2173  ;;  %vm7270_vm3 = vmor %vm7239_vm13, %vm7225_vm8  ;;  %v9587_v52 = vsel %vm7279_vm1, 4294967295, %v9586_v52  ;;  %vm9589_vm13 = vcmask 1043456   ;;  %v2762_v31 = vld [vmem:[#allocation2 + $0x5c] sm:$0x11] }
  0x95   : > { %v1203_v39 = vsel %vm7207_vm9, %v1165_v33, %v1202_v26  ;;  %v2717_v41 = vrot.slane %v7256_v34, 4  ;;  %v9585_v42 = vsel %vm7270_vm3, 4294967295, %v9584_v42  ;;  %v2195_v47 = vrot.slane %v2174_v35, 4  ;;  %9588 = vst [vmem:[#allocation8_spill] sm:$0xff] %v9587_v52  ;;  %vm9590_vm5 = vmmov %vm9589_vm13 }
  0x96   : > { %1204 = vst [vmem:[#allocation2] sm:$0x22] %v1203_v39  ;;  %1434 = vrot.lane.b32.xlu1 %v1413_v12, %s6741_s28  ;;  %911 = vrot.lane.b32.xlu0 %v889_v13, %s6742_s29  ;;  %vm7297_vm0 = vmand %vm9591_vm14, %vm9486_vm11  ;;  %vm9598_vm14 = vsmask.f32 7938 }
  0x97   : > { %v2727_v54 = vsel %vm9589_vm13, %v2716_v32, %v2717_v41  ;;  %v2206_v55 = vsel %vm9590_vm5, %v2195_v47, %v2196_v38  ;;  %vm9602_vm11 = vmmov %vm9590_vm5  ;;  %v7369_v47 = vld.sshfl [vmem:[%s7044_s22 + $0x8] sm:$0x55 pattern:$0x73625140] }
  0x98   : > { %v2729_v58 = vsel %vm9594_vm7, %v7172_v62, %v2727_v54  ;;  %v2208_v59 = vsel %vm9595_vm15, %v2174_v35, %v2206_v55  ;;  %v1654_v61 = vpop.permute.xlu1 %1653  ;;  %v7304_v57 = vpop.permute.xlu0 %1134  ;;  %vm7317_vm7 = vmor %vm7297_vm0, %vm7279_vm1  ;;  %v7376_v54 = vrot.slane %v5316_v0, %v6839_v5  ;;  %v9612_v55 = vmov 0 }
  0x99   : > { %v2760_v1 = vsel %vm6938_vm6, %v2729_v58, %v2759_v40  ;;  %v2246_v2 = vsel %vm7270_vm3, %v2208_v59, %v2245_v50  ;;  %v1674_v60 = vrot.slane %v1654_v61, 4  ;;  %v1154_v62 = vrot.slane %v7304_v57, 4  ;;  %vm7327_vm15 = vmand %vm9590_vm5, %vm9598_vm14  ;;  %v534_v50 = vld [vmem:[%s9462_s6] sm:$0xff]  ;;  %v535_v58 = vld [vmem:[%s9462_s6 + $0x8] sm:$0xff] }
  0x9a   : > { %2761 = vst [vmem:[#allocation2 + $0x54] sm:$0x11] %v2760_v1  ;;  %2247 = vst [vmem:[#allocation2] sm:$0x88] %v2246_v2  ;;  %2477 = vrot.lane.b32.xlu1 %v2456_v9, %s6743_s30  ;;  %1955 = vrot.lane.b32.xlu0 %v1934_v28, %s6744_s16  ;;  %v9600_v11 = vsel %vm7327_vm15, 4294967295, %v9599_v11  ;;  %v533_v9 = vld [vmem:[%s9461_s5 + $0x8] sm:$0xff] }
  0x9b   : > { %9601 = vst [vmem:[#allocation9_spill] sm:$0xff] %v9600_v11  ;;  %v1684_v12 = vsel %vm9602_vm11, %v1673_v48, %v1674_v60  ;;  %vm9603_vm0 = vmmov %vm9590_vm5  ;;  %vm9605_vm11 = vsmask.f32 7954  ;;  %vm9606_vm14 = vcmask 1047556   ;;  %v4942_v59 = vrot.slane %v7284_v53, 6 }
  0x9c   : > { %v1687_v13 = vsel %vm9603_vm0, %v1674_v60, %v1675_v30  ;;  %vm9604_vm13 = vmmov %vm9603_vm0  ;;  %vm9609_vm0 = vcmask 891904   ;;  %v7357_v32 = vpop.permute.xlu1 %2698  ;;  %v7359_v33 = vpop.permute.xlu0 %2177  ;;  %v4664_v0 = vrot.slane %v7284_v53, 7  ;;  %v6678_v1 = vld [vmem:[%s7044_s22 + $0x8] ss:$0 sps:$4 sm:$0xff]   ;;  %v4668_v60 = vrot.slane %v7287_v51, 7 }
  0x9d   : > { %v1166_v15 = vsel %vm9604_vm13, %v1153_v20, %v1154_v62  ;;  %vm7348_vm5 = vmand %vm9606_vm14, %vm9605_vm11  ;;  %v1686_v27 = vsel %vm9609_vm0, %v7170_v46, %v1684_v12  ;;  %vm9611_vm13 = vcmask 1031168   ;;  %v2718_v40 = vrot.slane %v7357_v32, 4  ;;  %v6679_v12 = vld [vmem:[%s7044_s22 + $0x8] ss:$0 sps:$4 sm:$0xff]  }
  0x9e   : > { %vm9610_vm2 = vmmov %vm9609_vm0  ;;  %v1167_v20 = vsel %vm9611_vm13, %v7147_v45, %v1166_v15  ;;  %v1724_v35 = vsel %vm7317_vm7, %v1686_v27, %v1723_v3  ;;  %v2248_v45 = vld [vmem:[#allocation2 + $0x8] sm:$0x88]  ;;  %v2197_v48 = vrot.slane %v7359_v33, 4  ;;  %2860 = vperm.xlu1 %6613, %v533_v9   ;;  %2855 = vperm.xlu0 %6612, %v532_v21   ;;  %vm9614_vm11 = vcmask 1043456   ;;  %v1729_v9 = vld [vmem:[#allocation2 + $0x10] sm:$0x44] }
  0x9f   : > { %v1688_v28 = vsel %vm9610_vm2, %v1654_v61, %v1687_v13  ;;  %v1206_v46 = vsel %vm7207_vm9, %v1167_v20, %v1205_v7  ;;  %1725 = vst [vmem:[#allocation2] sm:$0x44] %v1724_v35  ;;  %vm7382_vm2 = vmor %vm7348_vm5, %vm7327_vm15  ;;  %v2730_v43 = vsel %vm9614_vm11, %v2717_v41, %v2718_v40  ;;  %v4946_v61 = vrot.slane %v7287_v51, 6 }
  0xa0   : > { %v1727_v39 = vsel %vm7317_vm7, %v1688_v28, %v1726_v4  ;;  %1207 = vst [vmem:[#allocation2 + $0x8] sm:$0x22] %v1206_v46  ;;  %v9613_v55 = vsel %vm7382_vm2, 4294967295, %v9612_v55  ;;  %vm9615_vm5 = vcmask 736256   ;;  %vm9616_vm0 = vmmov %vm9614_vm11  ;;  %v7405_v3 = vpop.permute.xlu1 %1657  ;;  %v7407_v4 = vpop.permute.xlu0 %1136  ;;  %v4519_v7 = vcombine.low %v7369_v47, %v7369_v47  ;;  %v1208_v28 = vld [vmem:[#allocation2 + $0x10] sm:$0x22] }
  0xa1   : > { %1728 = vst [vmem:[#allocation2 + $0x8] sm:$0x44] %v1727_v39  ;;  %v2731_v2 = vsel %vm9615_vm5, %v7256_v34, %v2730_v43  ;;  %v2209_v41 = vsel %vm9616_vm0, %v2196_v38, %v2197_v48  ;;  %v2796_v13 = vld [vmem:[#allocation2 + $0x54] sm:$0xff]  ;;  %vm9617_vm11 = vcmask 752640   ;;  %v9507_v38 = vrot.slane %v7405_v3, 4 }
  0xa2   : > { %v2763_v34 = vsel %vm6938_vm6, %v2731_v2, %v2762_v31  ;;  %v2210_v15 = vsel %vm9617_vm11, %v7201_v49, %v2209_v41  ;;  %v9506_v21 = vrot.slane %v7407_v4, 4  ;;  %v7421_v26 = vsel %vm7382_vm2, 0, %v2796_v13  ;;  %3493 = vperm.xlu1 %6613, %v534_v50   ;;  %3498 = vperm.xlu0 %6612, %v535_v58   ;;  %v2251_v41 = vld [vmem:[#allocation2 + $0x10] sm:$0x88] }
  0xa3   : > { %2764 = vst [vmem:[#allocation2 + $0x5c] sm:$0x11] %v2763_v34  ;;  %v2249_v27 = vsel %vm7270_vm3, %v2210_v15, %v2248_v45  ;;  %v5220_v20 = vrot.slane %v7284_v53, 5  ;;  %v5224_v49 = vrot.slane %v7287_v51, 5  ;;  %vm9618_vm5 = vsmask.f32 7942 }
  0xa4   : > { %vm9619_vm0 = vcmask 1041409   ;;  %v9620_v31 = vmov 0  ;;  %2798 = vst [vmem:[#allocation2 + $0x54] sm:$0xff] %v7421_v26  ;;  %2250 = vst [vmem:[#allocation2 + $0x8] sm:$0x88] %v2249_v27  ;;  %vm9623_vm14 = vcmask 1043456   ;;  %v7444_v46 = vpack.i.bf16 %v4946_v61, %v4942_v59  ;;  %v7459_v58 = vpop.permute.xlu1 %2700 }
  0xa5   : > { %vm7429_vm11 = vmand %vm9619_vm0, %vm9618_vm5  ;;  %v1689_v35 = vsel %vm9623_vm14, %v1675_v30, %v9507_v38  ;;  %v7447_v45 = vrot.slane %v6678_v1, %v6839_v5  ;;  %vm9625_vm0 = vsmask.f32 7958  ;;  %vm9626_vm13 = vcmask 1045509  }
  0xa6   : > { %v9621_v31 = vsel %vm7429_vm11, 4294967295, %v9620_v31  ;;  %vm9624_vm8 = vmmov %vm9623_vm14  ;;  %vm9629_vm14 = vcmask 891904   ;;  %vm9630_vm1 = vcmask 1031168   ;;  %v7464_v59 = vrot.slane %v6679_v12, %v6839_v5  ;;  %4534 = vrot.lane.b32.xlu1 %v7213_v16, %s6738_s25  ;;  %4536 = vrot.lane.b32.xlu0 %v7220_v19, %s6738_s25 }
  0xa7   : > { %9622 = vst [vmem:[#allocation10_spill] sm:$0xff] %v9621_v31  ;;  %v1168_v39 = vsel %vm9624_vm8, %v1154_v62, %v9506_v21  ;;  %vm7451_vm15 = vmand %vm9626_vm13, %vm9625_vm0  ;;  %v1690_v30 = vsel %vm9629_vm14, %v7145_v44, %v1689_v35  ;;  %v7461_v62 = vpop.permute.xlu0 %2179  ;;  %v9505_v2 = vrot.slane %v7459_v58, 4  ;;  %v7476_v12 = vpack.i.bf16 %v4668_v60, %v4664_v0 }
  0xa8   : > { %v1169_v43 = vsel %vm9630_vm1, %v7304_v57, %v1168_v39  ;;  %v1730_v61 = vsel %vm7317_vm7, %v1690_v30, %v1729_v9  ;;  %v9503_v44 = vrot.slane %v7461_v62, 4  ;;  %v2765_v57 = vld [vmem:[#allocation2 + $0x64] sm:$0x11]  ;;  %v7479_v13 = vrot.slane %v4519_v7, %v6839_v5  ;;  %vm7487_vm1 = vmor %vm7451_vm15, %vm7429_vm11 }
  0xa9   : > { %v1209_v1 = vsel %vm7207_vm9, %v1169_v43, %v1208_v28  ;;  %1731 = vst [vmem:[#allocation2 + $0x10] sm:$0x44] %v1730_v61  ;;  %v7481_v34 = vpack.i.bf16 %v5224_v49, %v5220_v20  ;;  %v9631_v15 = vmov 0  ;;  %vm9633_vm13 = vmmov %vm9624_vm8  ;;  %v5075_v7 = vcombine.low %v7447_v45, %v7447_v45  ;;  %v1484_v61 = vld [vmem:[#allocation2] sm:$0x22] }
  0xaa   : > { %1210 = vst [vmem:[#allocation2 + $0x10] sm:$0x22] %v1209_v1  ;;  %v9632_v15 = vsel %vm7487_vm1, 4294967295, %v9631_v15  ;;  %v2732_v0 = vsel %vm9633_vm13, %v2718_v40, %v9505_v2  ;;  %vm9634_vm0 = vmmov %vm9624_vm8  ;;  %vm9635_vm15 = vsmask.f32 7950  ;;  %vm9636_vm8 = vcmask 1043459   ;;  %4812 = vrot.lane.b32.xlu1 %v7216_v18, %s6737_s24  ;;  %4814 = vrot.lane.b32.xlu0 %v7233_v25, %s6737_s24 }
  0xab   : > { %v2211_v60 = vsel %vm9634_vm0, %v2197_v48, %v9503_v44  ;;  %vm7507_vm5 = vmand %vm9636_vm8, %vm9635_vm15  ;;  %v9637_v27 = vmov 0  ;;  %vm9640_vm13 = vcmask 736256   ;;  %vm9641_vm11 = vcmask 752640   ;;  %v7515_v48 = vpop.permute.xlu1 %6518  ;;  %v7517_v20 = vpop.permute.xlu0 %6513  ;;  %v2799_v35 = vld [vmem:[#allocation2 + $0x5c] sm:$0xff] }
  0xac   : > { %v9638_v27 = vsel %vm7507_vm5, 4294967295, %v9637_v27  ;;  %v2733_v40 = vsel %vm9640_vm13, %v7357_v32, %v2732_v0  ;;  %v2212_v28 = vsel %vm9641_vm11, %v7359_v33, %v2211_v60  ;;  %v9502_v32 = vunpack.i.h.bf16 %v7515_v48  ;;  %v1211_v2 = vld [vmem:[#allocation2 + $0x18] sm:$0x22] }
  0xad   : > { %9639 = vst [vmem:[#allocation11_spill] sm:$0xff] %v9638_v27  ;;  %v2766_v39 = vsel %vm6938_vm6, %v2733_v40, %v2765_v57  ;;  %v2252_v50 = vsel %vm7270_vm3, %v2212_v28, %v2251_v41  ;;  %v6520_v30 = vunpack.i.l.bf16 %v7515_v48  ;;  %vm9642_vm11 = vsmask.f32 7938  ;;  %v1732_v41 = vld [vmem:[#allocation2 + $0x18] sm:$0x44] }
  0xae   : > { %vm9643_vm8 = vcmask 1040384   ;;  %v9644_v33 = vmov 0  ;;  %v7535_v43 = vsel %vm7382_vm2, 0, %v2799_v35  ;;  %2767 = vst [vmem:[#allocation2 + $0x64] sm:$0x11] %v2766_v39  ;;  %vm9648_vm0 = vcmask 1044484   ;;  %5090 = vrot.lane.b32.xlu1 %v7230_v24, %s6740_s27  ;;  %5092 = vrot.lane.b32.xlu0 %v7216_v18, %s6740_s27 }
  0xaf   : > { %vm7529_vm15 = vmand %vm9643_vm8, %vm9642_vm11  ;;  %2253 = vst [vmem:[#allocation2 + $0x10] sm:$0x88] %v2252_v50  ;;  %vm9647_vm13 = vsmask.f32 7954  ;;  %v9501_v1 = vunpack.i.h.bf16 %v7517_v20  ;;  %v6515_v57 = vunpack.i.l.bf16 %v7517_v20  ;;  %vm9651_vm11 = vsmask.f32 7966  ;;  %v7576_v50 = vpop.permute.xlu1 %6528  ;;  %v7578_v49 = vpop.permute.xlu0 %6523 }
  0xb0   : > { %v9645_v33 = vsel %vm7529_vm15, 4294967295, %v9644_v33  ;;  %vm7539_vm14 = vmand %vm9648_vm0, %vm9647_vm13  ;;  %vm9652_vm8 = vcmask 1047559   ;;  %2801 = vst [vmem:[#allocation2 + $0x5c] sm:$0xff] %v7535_v43  ;;  %v7558_v0 = vrot.slane %v9502_v32, 4  ;;  %v1436_v60 = vrot.slane %v6520_v30, 4 }
  0xb1   : > { %9646 = vst [vmem:[#allocation12_spill] sm:$0xff] %v9645_v33  ;;  %vm7551_vm10 = vmand %vm9652_vm8, %vm9651_vm11  ;;  %v7561_v40 = vrot.slane %v5075_v7, %v6839_v5  ;;  %v7564_v28 = vshll.u32 %v7260_v36, 16  ;;  %vm9655_vm0 = vsmask.f32 7946  ;;  %vm9656_vm13 = vcmask 1042434  }
  0xb2   : > { %vm7568_vm4 = vmand %vm9656_vm13, %vm9655_vm0  ;;  %v9657_v25 = vmov 0  ;;  %v7574_v35 = vrot.slane %v9501_v1, 4  ;;  %v913_v39 = vrot.slane %v6515_v57, 4  ;;  %v7581_v7 = vshll.u32 %v7376_v54, 16  ;;  %5367 = vrot.lane.b32.xlu1 %v7220_v19, %s6739_s26  ;;  %5369 = vrot.lane.b32.xlu0 %v7248_v29, %s6739_s26  ;;  %v1490_v37 = vld [vmem:[#allocation2 + $0x10] sm:$0x22] }
  0xb3   : > { %v9658_v25 = vsel %vm7568_vm4, 4294967295, %v9657_v25  ;;  %vm9660_vm11 = vcmask 1043456   ;;  %vm7589_vm8 = vmor %vm7539_vm14, %vm7529_vm15  ;;  %v6530_v32 = vunpack.i.l.bf16 %v7576_v50  ;;  %vm9663_vm0 = vsmask.f32 7962 }
  0xb4   : > { %9659 = vst [vmem:[#allocation13_spill] sm:$0xff] %v9658_v25  ;;  %v1447_v9 = vsel %vm9660_vm11, %v1436_v60, %v7558_v0  ;;  %vm9664_vm13 = vcmask 1046534   ;;  %vm9667_vm11 = vcmask 900096   ;;  %vm9668_vm14 = vcmask 1043456  }
  0xb5   : > { %vm7598_vm12 = vmand %vm9664_vm13, %vm9663_vm0  ;;  %v1449_v60 = vsel %vm9667_vm11, %v6520_v30, %v1447_v9  ;;  %v925_v21 = vsel %vm9668_vm14, %v913_v39, %v7574_v35  ;;  %v6525_v38 = vunpack.i.l.bf16 %v7578_v49  ;;  %vm9669_vm0 = vcmask 1039360  }
  0xb6   : > { %v1485_v44 = vsel %vm7487_vm1, %v1449_v60, %v1484_v61  ;;  %v927_v1 = vsel %vm9669_vm0, %v6515_v57, %v925_v21  ;;  %v9670_v11 = vunpack.i.h.bf16 %v7576_v50  ;;  %v2479_v30 = vrot.slane %v6530_v32, 4  ;;  %vm7623_vm13 = vmor %vm7551_vm10, %vm7507_vm5  ;;  %v7633_v60 = vpop.permute.xlu0 %1138  ;;  %4538 = vrot.lane.b32.xlu1 %v7245_v14, %s6738_s25  ;;  %4816 = vrot.lane.b32.xlu0 %v7220_v19, %s6737_s24 }
  0xb7   : > { %1486 = vst [vmem:[#allocation2] sm:$0x22] %v1485_v44  ;;  %v963_v39 = vsel %vm7589_vm8, %v927_v1, %v962_v10  ;;  %v9673_v24 = vunpack.i.h.bf16 %v7578_v49  ;;  %v1957_v57 = vrot.slane %v6525_v38, 4  ;;  %v2802_v44 = vld [vmem:[#allocation2 + $0x64] sm:$0xff]  ;;  %vm9674_vm11 = vmmov %vm9668_vm14  ;;  %v9675_v1 = vmov 0 }
  0xb8   : > { %v7615_v9 = vrot.slane %v9670_v11, 4  ;;  %v7631_v11 = vpop.permute.xlu1 %1659  ;;  %964 = vst [vmem:[#allocation2] sm:$0x11] %v963_v39  ;;  %vm7641_vm10 = vmor %vm7598_vm12, %vm7568_vm4  ;;  %v7649_v27 = vsel %vm7382_vm2, 0, %v2802_v44  ;;  %vm9677_vm14 = vcmask 744448   ;;  %vm9679_vm12 = vcmask 883712  }
  0xb9   : > { %v7629_v21 = vrot.slane %v9673_v24, 4  ;;  %v9676_v1 = vsel %vm7641_vm10, 4294967295, %v9675_v1  ;;  %vm9678_vm0 = vmmov %vm9674_vm11  ;;  %2804 = vst [vmem:[#allocation2 + $0x64] sm:$0xff] %v7649_v27  ;;  %v2005_v44 = vld [vmem:[#allocation2] sm:$0x44]  ;;  %v9683_v31 = vrot.slane %v7633_v60, 4  ;;  %v7708_v14 = vrot.slane %v7369_v47, %v6839_v5 }
  0xba   : > { %v2490_v10 = vsel %vm9674_vm11, %v2479_v30, %v7615_v9  ;;  %v2527_v30 = vld [vmem:[#allocation2] sm:$0x88]  ;;  %vm9682_vm11 = vmmov %vm9678_vm0  ;;  %v9684_v33 = vrot.slane %v7407_v4, 4  ;;  %5094 = vrot.lane.b32.xlu1 %v7213_v16, %s6740_s27  ;;  %5371 = vrot.lane.b32.xlu0 %v7260_v36, %s6739_s26 }
  0xbb   : > { %v2492_v39 = vsel %vm9677_vm14, %v6530_v32, %v2490_v10  ;;  %v1968_v25 = vsel %vm9678_vm0, %v1957_v57, %v7629_v21  ;;  %v9680_v32 = vrot.slane %v7631_v11, 4  ;;  %v9681_v10 = vrot.slane %v7405_v3, 4  ;;  %vm9685_vm14 = vmmov %vm9678_vm0 }
  0xbc   : > { %v2528_v24 = vsel %vm7623_vm13, %v2492_v39, %v2527_v30  ;;  %v1970_v61 = vsel %vm9679_vm12, %v6525_v38, %v1968_v25  ;;  %v1170_v22 = vsel %vm9685_vm14, %v9684_v33, %v9683_v31  ;;  %vm9686_vm0 = vcmask 891904   ;;  %v7678_v25 = vpop.permute.xlu1 %2702  ;;  %v7680_v30 = vpop.permute.xlu0 %2181  ;;  %vm9690_vm14 = vmmov %vm9682_vm11 }
  0xbd   : > { %v1691_v57 = vsel %vm9682_vm11, %v9681_v10, %v9680_v32  ;;  %2529 = vst [vmem:[#allocation2] sm:$0x88] %v2528_v24  ;;  %v2006_v52 = vsel %vm7641_vm10, %v1970_v61, %v2005_v44  ;;  %vm9687_vm12 = vcmask 1031168   ;;  %v5352_v32 = vcombine.high %v7369_v47, %v7369_v47  ;;  %v2768_v61 = vld [vmem:[#allocation2 + $0x6c] sm:$0x11] }
  0xbe   : > { %v1692_v39 = vsel %vm9686_vm0, %v7405_v3, %v1691_v57  ;;  %v1171_v38 = vsel %vm9687_vm12, %v7407_v4, %v1170_v22  ;;  %2007 = vst [vmem:[#allocation2] sm:$0x44] %v2006_v52  ;;  %v9525_v3 = vrot.slane %v7678_v25, 4  ;;  %v9523_v24 = vrot.slane %v7680_v30, 4  ;;  %v2254_v22 = vld [vmem:[#allocation2 + $0x18] sm:$0x88]  ;;  %4540 = vrot.lane.b32.xlu1 %v7260_v36, %s6738_s25  ;;  %4818 = vrot.lane.b32.xlu0 %v7248_v29, %s6737_s24 }
  0xbf   : > { %v1733_v31 = vsel %vm7317_vm7, %v1692_v39, %v1732_v41  ;;  %v1212_v33 = vsel %vm7207_vm9, %v1171_v38, %v1211_v2  ;;  %v4950_v52 = vrot.slane %v7564_v28, 6  ;;  %v4954_v4 = vrot.slane %v7581_v7, 6 }
  0xc0   : > { %1734 = vst [vmem:[#allocation2 + $0x18] sm:$0x44] %v1733_v31  ;;  %1213 = vst [vmem:[#allocation2 + $0x18] sm:$0x22] %v1212_v33  ;;  %v9688_v41 = vrot.slane %v7459_v58, 4  ;;  %v9689_v44 = vrot.slane %v7461_v62, 4  ;;  %v7714_v38 = vpop.permute.xlu1 %6538  ;;  %v7716_v31 = vpop.permute.xlu0 %6533 }
  0xc1   : > { %vm9691_vm0 = vcmask 736256   ;;  %vm9692_vm12 = vcmask 752640  }
  0xc2   : > { %v2734_v2 = vsel %vm9682_vm11, %v9688_v41, %v9525_v3  ;;  %v2213_v10 = vsel %vm9690_vm14, %v9689_v44, %v9523_v24  ;;  %v9522_v44 = vunpack.i.h.bf16 %v7714_v38  ;;  %vm9694_vm14 = vmmov %vm9682_vm11  ;;  %v965_v24 = vld [vmem:[#allocation2 + $0x8] sm:$0x11]  ;;  %v9696_v3 = vunpack.i.h.bf16 %v7515_v48  ;;  %5096 = vrot.lane.b32.xlu1 %v7220_v19, %s6740_s27  ;;  %5373 = vrot.lane.b32.xlu0 %v7376_v54, %s6739_s26 }
  0xc3   : > { %v2735_v57 = vsel %vm9691_vm0, %v7459_v58, %v2734_v2  ;;  %v2214_v39 = vsel %vm9692_vm12, %v7461_v62, %v2213_v10  ;;  %v6540_v58 = vunpack.i.l.bf16 %v7714_v38  ;;  %v9524_v62 = vunpack.i.h.bf16 %v7716_v31  ;;  %vm9695_vm0 = vmmov %vm9682_vm11 }
  0xc4   : > { %v2769_v41 = vsel %vm6938_vm6, %v2735_v57, %v2768_v61  ;;  %v2255_v47 = vsel %vm7270_vm3, %v2214_v39, %v2254_v22  ;;  %v6535_v2 = vunpack.i.l.bf16 %v7716_v31  ;;  %v7732_v61 = vpack.i.bf16 %v4954_v4, %v4950_v52  ;;  %v7744_v16 = vpop.permute.xlu1 %6548  ;;  %v7746_v33 = vpop.permute.xlu0 %6543  ;;  %v968_v39 = vld [vmem:[#allocation2 + $0x10] sm:$0x11]  ;;  %vm9699_vm5 = vmmov %vm9695_vm0 }
  0xc5   : > { %2770 = vst [vmem:[#allocation2 + $0x6c] sm:$0x11] %v2769_v41  ;;  %2256 = vst [vmem:[#allocation2 + $0x18] sm:$0x88] %v2255_v47  ;;  %v7737_v10 = vrot.slane %v9522_v44, 4  ;;  %v1438_v57 = vrot.slane %v6540_v58, 4  ;;  %v7749_v52 = vrot.slane %v5352_v32, %v6839_v5  ;;  %v6550_v22 = vunpack.i.l.bf16 %v7744_v16 }
  0xc6   : > { %9693 = vst [vmem:[#allocation14_spill] sm:$0xff] %v7732_v61  ;;  %v7742_v41 = vrot.slane %v9524_v62, 4  ;;  %v915_v47 = vrot.slane %v6535_v2, 4  ;;  %vm9697_vm12 = vcmask 900096   ;;  %v1487_v32 = vld [vmem:[#allocation2 + $0x8] sm:$0x22]  ;;  %v9539_v29 = vunpack.i.h.bf16 %v7746_v33  ;;  %6620 = vrot.lane.b32.xlu0 %v7476_v12, %s6741_s28 }
  0xc7   : > { %v1450_v4 = vsel %vm9694_vm14, %v7558_v0, %v1438_v57  ;;  %v1452_v44 = vsel %vm9695_vm0, %v1438_v57, %v7737_v10  ;;  %vm9698_vm11 = vmmov %vm9697_vm12  ;;  %v2831_v61 = vld [vmem:[#allocation2] sm:$0xff]  ;;  %v9727_v12 = vrot.slane %v7680_v30, 4 }
  0xc8   : > { %v1451_v63 = vsel %vm9697_vm12, %v9696_v3, %v1450_v4  ;;  %v1453_v6 = vsel %vm9698_vm11, %v6540_v58, %v1452_v44  ;;  %v928_v0 = vsel %vm9699_vm5, %v7574_v35, %v915_v47  ;;  %vm9700_vm14 = vmmov %vm9695_vm0  ;;  %v9701_v3 = vunpack.i.h.bf16 %v7517_v20  ;;  %v7785_v20 = vpop.permute.xlu1 %1661 }
  0xc9   : > { %v930_v57 = vsel %vm9700_vm14, %v915_v47, %v7742_v41  ;;  %v1488_v62 = vsel %vm7487_vm1, %v1451_v63, %v1487_v32  ;;  %v1491_v48 = vsel %vm7487_vm1, %v1453_v6, %v1490_v37  ;;  %vm9702_vm11 = vcmask 1039360   ;;  %v7787_v47 = vpop.permute.xlu0 %1140  ;;  %vm9705_vm12 = vmmov %vm9699_vm5 }
  0xca   : > { %v929_v44 = vsel %vm9702_vm11, %v9701_v3, %v928_v0  ;;  %vm9703_vm0 = vmmov %vm9702_vm11  ;;  %1489 = vst [vmem:[#allocation2 + $0x8] sm:$0x22] %v1488_v62  ;;  %v9704_v35 = vunpack.i.h.bf16 %v7744_v16  ;;  %v2481_v37 = vrot.slane %v6550_v22, 4  ;;  %v6545_v62 = vunpack.i.l.bf16 %v7746_v33  ;;  %v7805_v3 = vld [vmem:[%s9460_s4] sm:$0xff]   ;;  %6630 = vrot.lane.b32.xlu0 %v7481_v34, %s6743_s30  ;;  %v2260_v34 = vld [vmem:[#allocation2 + $0x28] sm:$0x88] }
  0xcb   : > { %v931_v58 = vsel %vm9703_vm0, %v6535_v2, %v930_v57  ;;  %1492 = vst [vmem:[#allocation2 + $0x10] sm:$0x22] %v1491_v48  ;;  %v966_v36 = vsel %vm7589_vm8, %v929_v44, %v965_v24  ;;  %v6355_v24 = vcombine.high %v2831_v61, %v7421_v26  ;;  %v1735_v57 = vld [vmem:[#allocation2 + $0x20] sm:$0x44]  ;;  %v1678_v48 = vrot.slane %v7785_v20, 4  ;;  %vm9710_vm0 = vmmov %vm9699_vm5 }
  0xcc   : > { %v969_v63 = vsel %vm7589_vm8, %v931_v58, %v968_v39  ;;  %v7783_v6 = vrot.slane %v9704_v35, 4  ;;  %v2805_v2 = vld [vmem:[#allocation2 + $0x6c] sm:$0xff]  ;;  %967 = vst [vmem:[#allocation2 + $0x8] sm:$0x11] %v966_v36  ;;  %v6354_v39 = vcombine.low %v2831_v61, %v7421_v26  ;;  %v2493_v32 = vsel %vm9699_vm5, %v7615_v9, %v2481_v37  ;;  %vm9711_vm5 = vmmov %vm9710_vm0 }
  0xcd   : > { %970 = vst [vmem:[#allocation2 + $0x10] sm:$0x11] %v969_v63  ;;  %v7795_v4 = vsel %vm7382_vm2, 0, %v2805_v2  ;;  %v9706_v26 = vunpack.i.h.bf16 %v7576_v50  ;;  %vm9707_vm14 = vcmask 744448   ;;  %v2530_v44 = vld [vmem:[#allocation2 + $0x8] sm:$0x88]  ;;  %2992 = vmatprep.subr.bf16.mxu0 %v6355_v24  ;;  %v7830_v2 = vpop.permute.xlu1 %2704  ;;  %v7832_v24 = vpop.permute.xlu0 %2183 }
  0xce   : > { %v2495_v0 = vsel %vm9705_vm12, %v2481_v37, %v7783_v6  ;;  %2807 = vst [vmem:[#allocation2 + $0x6c] sm:$0xff] %v7795_v4  ;;  %vm9708_vm11 = vmmov %vm9707_vm14  ;;  %v2533_v58 = vld [vmem:[#allocation2 + $0x10] sm:$0x88]  ;;  %v7816_v36 = vrot.slane %v9539_v29, 4  ;;  %v1959_v63 = vrot.slane %v6545_v62, 4  ;;  %2993 = vmatpush1.bf16.msra.mxu0 %v6354_v39  ;;  %v1157_v37 = vrot.slane %v7787_v47, 4 }
  0xcf   : > { %v2494_v9 = vsel %vm9707_vm14, %v9706_v26, %v2493_v32  ;;  %v2496_v61 = vsel %vm9708_vm11, %v6550_v22, %v2495_v0  ;;  %v9709_v22 = vrot.slane %v7631_v11, 4  ;;  %vm9712_vm12 = vmmov %vm9710_vm0  ;;  %vm9713_vm14 = vcmask 891904   ;;  %v1214_v0 = vld [vmem:[#allocation2 + $0x20] sm:$0x22] }
  0xd0   : > { %v2531_v19 = vsel %vm7623_vm13, %v2494_v9, %v2530_v44  ;;  %v2534_v50 = vsel %vm7623_vm13, %v2496_v61, %v2533_v58  ;;  %v1971_v54 = vsel %vm9711_vm5, %v7629_v21, %v1959_v63  ;;  %v1973_v39 = vsel %vm9712_vm12, %v1959_v63, %v7816_v36  ;;  %v2008_v9 = vld [vmem:[#allocation2 + $0x8] sm:$0x44]  ;;  %v2011_v61 = vld [vmem:[#allocation2 + $0x10] sm:$0x44] }
  0xd1   : > { %v1693_v35 = vsel %vm9710_vm0, %v9709_v22, %v1678_v48  ;;  %2532 = vst [vmem:[#allocation2 + $0x8] sm:$0x88] %v2531_v19  ;;  %2535 = vst [vmem:[#allocation2 + $0x10] sm:$0x88] %v2534_v50  ;;  %v2721_v26 = vrot.slane %v7830_v2, 4  ;;  %v9714_v44 = vunpack.i.h.bf16 %v7578_v49  ;;  %vm9715_vm11 = vcmask 883712  }
  0xd2   : > { %v1694_v32 = vsel %vm9713_vm14, %v7631_v11, %v1693_v35  ;;  %vm9716_vm0 = vmmov %vm9715_vm11  ;;  %v9717_v50 = vrot.slane %v7633_v60, 4  ;;  %v2771_v22 = vld [vmem:[#allocation2 + $0x74] sm:$0x11]  ;;  %v9718_v11 = vpack.i.bf16 %v7287_v51, %v7284_v53  ;;  %vm9719_vm12 = vcmask 1031168  }
  0xd3   : > { %v1972_v58 = vsel %vm9715_vm11, %v9714_v44, %v1971_v54  ;;  %v1974_v19 = vsel %vm9716_vm0, %v6545_v62, %v1973_v39  ;;  %v1736_v21 = vsel %vm7317_vm7, %v1694_v32, %v1735_v57  ;;  %v9720_v57 = vrot.slane %v7678_v25, 4  ;;  %vm9721_vm14 = vmmov %vm9711_vm5  ;;  %v2257_v39 = vld [vmem:[#allocation2 + $0x20] sm:$0x88]  ;;  %v7872_v32 = vpop.permute.xlu1 %1663 }
  0xd4   : > { %v1172_v63 = vsel %vm9711_vm5, %v9717_v50, %v1157_v37  ;;  %6615 = vrot.lane.b32.xlu1 %v9718_v11, %s6742_s29  ;;  %v2009_v49 = vsel %vm7641_vm10, %v1972_v58, %v2008_v9  ;;  %v2012_v35 = vsel %vm7641_vm10, %v1974_v19, %v2011_v61  ;;  %1737 = vst [vmem:[#allocation2 + $0x20] sm:$0x44] %v1736_v21  ;;  %vm9722_vm11 = vcmask 130048   ;;  %v7874_v9 = vpop.permute.xlu0 %1142  ;;  %v1738_v19 = vld [vmem:[#allocation2 + $0x28] sm:$0x44] }
  0xd5   : > { %v1173_v62 = vsel %vm9719_vm12, %v7633_v60, %v1172_v63  ;;  %v2736_v54 = vsel %vm9721_vm14, %v9720_v57, %v2721_v26  ;;  %6375 = vmatmul.mubr.msk.bf16.vlgmr.msra.gmra.mxu0 %vm9722_vm11, %v7805_v3  ;;  %2010 = vst [vmem:[#allocation2 + $0x8] sm:$0x44] %v2009_v49  ;;  %2013 = vst [vmem:[#allocation2 + $0x10] sm:$0x44] %v2012_v35  ;;  %vm9723_vm0 = vcmask 736256   ;;  %v2200_v60 = vrot.slane %v7832_v24, 4 }
  0xd6   : > { %v1215_v53 = vsel %vm7207_vm9, %v1173_v62, %v1214_v0  ;;  %v2737_v51 = vsel %vm9723_vm0, %v7678_v25, %v2736_v54  ;;  %v9724_v61 = vmov 0   ;;  %v9725_v44 = vrot.slane %v7564_v28, 7  ;;  %v1217_v49 = vld [vmem:[#allocation2 + $0x28] sm:$0x22]  ;;  %vm9729_vm14 = vmmov %vm9711_vm5 }
  0xd7   : > { %3096 = vmatprep.mubr.bf16.mxu0 %v9724_v61  ;;  %v9726_v58 = vrot.slane %v7581_v7, 7  ;;  %1216 = vst [vmem:[#allocation2 + $0x20] sm:$0x22] %v1215_v53  ;;  %v2772_v25 = vsel %vm6938_vm6, %v2737_v51, %v2771_v22  ;;  %v9538_v21 = vrot.slane %v7872_v32, 4  ;;  %v9537_v50 = vrot.slane %v7874_v9, 4  ;;  %vm9730_vm11 = vmmov %vm9711_vm5 }
  0xd8   : > { %v5228_v63 = vrot.slane %v7564_v28, 5  ;;  %2773 = vst [vmem:[#allocation2 + $0x74] sm:$0x11] %v2772_v25  ;;  %v2215_v11 = vsel %vm9711_vm5, %v9727_v12, %v2200_v60  ;;  %6625 = vrot.lane.b32.xlu1 %v7444_v46, %s6744_s16  ;;  %v5232_v35 = vrot.slane %v7581_v7, 5  ;;  %v7897_v22 = vshll.u32 %v7708_v14, 16 }
  0xd9   : > { %v7883_v0 = vpack.i.bf16 %v9726_v58, %v9725_v44  ;;  %v7900_v62 = vshll.u32 %v7749_v52, 16  ;;  %vm9728_vm12 = vcmask 752640   ;;  %v1695_v54 = vsel %vm9729_vm14, %v1678_v48, %v9538_v21  ;;  %v7920_v58 = vpop.permute.xlu0 %2185  ;;  %v2774_v12 = vld [vmem:[#allocation2 + $0x7c] sm:$0x11]  ;;  %vm9735_vm14 = vmmov %vm9730_vm11 }
  0xda   : > { %v2216_v57 = vsel %vm9728_vm12, %v7680_v30, %v2215_v11  ;;  %v1174_v46 = vsel %vm9730_vm11, %v1157_v37, %v9537_v50  ;;  %vm9731_vm0 = vcmask 891904   ;;  %vm9732_vm5 = vcmask 1031168   ;;  %v7918_v30 = vpop.permute.xlu1 %2706  ;;  %v7927_v37 = vld [vmem:[%s7044_s22] sm:$0xff]  ;;  %vm9734_vm12 = vmmov %vm9730_vm11  ;;  %v1493_v50 = vld [vmem:[#allocation2 + $0x18] sm:$0x22] }
  0xdb   : > { %v2258_v53 = vsel %vm7270_vm3, %v2216_v57, %v2257_v39  ;;  %v1696_v51 = vsel %vm9731_vm0, %v7785_v20, %v1695_v54  ;;  %v1175_v44 = vsel %vm9732_vm5, %v7787_v47, %v1174_v46  ;;  %v9536_v47 = vrot.slane %v7918_v30, 4  ;;  %vm9739_vm5 = vmmov %vm9734_vm12 }
  0xdc   : > { %2259 = vst [vmem:[#allocation2 + $0x20] sm:$0x88] %v2258_v53  ;;  %v1739_v39 = vsel %vm7317_vm7, %v1696_v51, %v1738_v19  ;;  %v1218_v20 = vsel %vm7207_vm9, %v1175_v44, %v1217_v49  ;;  %v9535_v25 = vrot.slane %v7920_v58, 4  ;;  %4542 = vrot.lane.b32.xlu1 %v7479_v13, %s6738_s25  ;;  %v7937_v11 = vpack.i.bf16 %v5232_v35, %v5228_v63  ;;  %v2832_v63 = vld [vmem:[#allocation2 + $0x8] sm:$0xff]  ;;  %v2833_v35 = vld [vmem:[#allocation2 + $0x10] sm:$0xff] }
  0xdd   : > { %1740 = vst [vmem:[#allocation2 + $0x28] sm:$0x44] %v1739_v39  ;;  %1219 = vst [vmem:[#allocation2 + $0x28] sm:$0x22] %v1218_v20  ;;  %v9733_v19 = vcombine.high %v7464_v59, %v7464_v59  ;;  %v2738_v54 = vsel %vm9734_vm12, %v2721_v26, %v9536_v47  ;;  %v7958_v53 = vrot.slane %v7927_v37, %v6839_v5  ;;  %vm9736_vm11 = vcmask 736256  }
  0xde   : > { %v2217_v13 = vsel %vm9735_vm14, %v2200_v60, %v9535_v25  ;;  %v2739_v51 = vsel %vm9736_vm11, %v7830_v2, %v2738_v54  ;;  %vm9737_vm0 = vcmask 752640   ;;  %v6357_v26 = vcombine.high %v2832_v63, %v7535_v43  ;;  %v7966_v20 = vpop.permute.xlu1 %6558  ;;  %v7968_v60 = vpop.permute.xlu0 %6553  ;;  %vm9740_vm12 = vmmov %vm9739_vm5  ;;  %v1496_v21 = vld [vmem:[#allocation2 + $0x20] sm:$0x22] }
  0xdf   : > { %v7943_v57 = vrot.slane %v9733_v19, %v6839_v5  ;;  %v2218_v44 = vsel %vm9737_vm0, %v7832_v24, %v2217_v13  ;;  %v6358_v39 = vcombine.low %v2833_v35, %v7649_v27  ;;  %v9738_v19 = vrot.slane %v7464_v59, %v6839_v5  ;;  %v2808_v46 = vld [vmem:[#allocation2 + $0x74] sm:$0xff] }
  0xe0   : > { %v2775_v2 = vsel %vm6938_vm6, %v2739_v51, %v2774_v12  ;;  %v2261_v24 = vsel %vm7270_vm3, %v2218_v44, %v2260_v34  ;;  %v6359_v54 = vcombine.high %v2833_v35, %v7649_v27  ;;  %v6356_v13 = vcombine.low %v2832_v63, %v7535_v43  ;;  %3035 = vmatprep.subr.bf16.mxu1 %v6357_v26  ;;  %v4298_v34 = vld [vmem:[#allocation3 + $0x30] sm:$0x11] }
  0xe1   : > { %4820 = vrot.lane.b32.xlu0 %v9738_v19, %s6737_s24  ;;  %v7982_v49 = vsel %vm7382_vm2, 0, %v2808_v46  ;;  %2776 = vst [vmem:[#allocation2 + $0x7c] sm:$0x11] %v2775_v2  ;;  %2262 = vst [vmem:[#allocation2 + $0x28] sm:$0x88] %v2261_v24  ;;  %v9534_v59 = vunpack.i.h.bf16 %v7966_v20  ;;  %v6560_v19 = vunpack.i.l.bf16 %v7966_v20  ;;  %v9533_v12 = vunpack.i.h.bf16 %v7968_v60  ;;  %5098 = vrot.lane.b32.xlu1 %v7561_v40, %s6740_s27 }
  0xe2   : > { %2810 = vst [vmem:[#allocation2 + $0x74] sm:$0xff] %v7982_v49  ;;  %3078 = vmatprep.subr.bf16.mxu0 %v6359_v54  ;;  %3036 = vmatpush1.bf16.msra.mxu1 %v6356_v13  ;;  %v6555_v27 = vunpack.i.l.bf16 %v7968_v60  ;;  %v8001_v40 = vpop.permute.xlu1 %6568  ;;  %v8003_v51 = vpop.permute.xlu0 %6563  ;;  %v4248_v44 = vrot.slane %v7958_v53, %v6839_v5  ;;  %vm9741_vm14 = vcmask 130048   ;;  %v9742_v25 = vpack.i.bf16 %v7581_v7, %v7564_v28 }
  0xe3   : > { %3079 = vmatpush1.bf16.msra.mxu0 %v6358_v39  ;;  %v7995_v63 = vrot.slane %v9534_v59, 4  ;;  %v1440_v35 = vrot.slane %v6560_v19, 4  ;;  %v7999_v46 = vrot.slane %v9533_v12, 4  ;;  %v6571_v39 = vunpack.i.h.bf16 %v8001_v40  ;;  %v971_v12 = vld [vmem:[#allocation2 + $0x18] sm:$0x11] }
  0xe4   : > { %v917_v26 = vrot.slane %v6555_v27, 4  ;;  %v6570_v2 = vunpack.i.l.bf16 %v8001_v40  ;;  %v974_v59 = vld [vmem:[#allocation2 + $0x20] sm:$0x11]  ;;  %v6565_v48 = vunpack.i.l.bf16 %v8003_v51  ;;  %v4299_v47 = vsel %vm6938_vm6, %v4248_v44, %v4298_v34 }
  0xe5   : > { %5375 = vrot.lane.b32.xlu0 %v7708_v14, %s6739_s26  ;;  %v1454_v54 = vsel %vm9739_vm5, %v7737_v10, %v1440_v35  ;;  %v1456_v13 = vsel %vm9740_vm12, %v1440_v35, %v7995_v63  ;;  %6376 = vmatmul.mubr.msk.bf16.vlgmr.msra.gmra.mxu1 %vm9741_vm14, %v7805_v3  ;;  %v9743_v10 = vunpack.i.h.bf16 %v7714_v38  ;;  %vm9744_vm11 = vcmask 900096   ;;  %vm9746_vm12 = vmmov %vm9739_vm5  ;;  %4300 = vst [vmem:[#allocation3 + $0x30] sm:$0x11] %v4299_v47 }
  0xe6   : > { %6635 = vrot.lane.b32.xlu1 %v9742_v25, %s6742_s29  ;;  %vm9745_vm0 = vmmov %vm9744_vm11  ;;  %v932_v29 = vsel %vm9739_vm5, %v7742_v41, %v917_v26  ;;  %v934_v24 = vsel %vm9746_vm12, %v917_v26, %v7999_v46  ;;  %6377 = vmatmul.mubr.msk.bf16.vlgmr.msra.gmra.mxu0 %vm9741_vm14, %v7805_v3  ;;  %v9747_v38 = vunpack.i.h.bf16 %v7716_v31  ;;  %v8043_v41 = vpop.permute.xlu1 %1665  ;;  %v8045_v34 = vpop.permute.xlu0 %1144  ;;  %v8054_v31 = vrot.slane %v6571_v39, 4  ;;  %v9751_v26 = vld [vmem:[#allocation14_spill] sm:$0xff] }
  0xe7   : > { %v1455_v43 = vsel %vm9744_vm11, %v9743_v10, %v1454_v54  ;;  %v1457_v35 = vsel %vm9745_vm0, %v6560_v19, %v1456_v13  ;;  %vm9748_vm11 = vcmask 1039360   ;;  %3139 = vmatprep.mubr.bf16.mxu1 %v9724_v61  ;;  %3182 = vmatprep.mubr.bf16.mxu0 %v9724_v61  ;;  %vm9752_vm12 = vmmov %vm9739_vm5  ;;  %v1159_v54 = vrot.slane %v8045_v34, 4 }
  0xe8   : > { %v1494_v28 = vsel %vm7487_vm1, %v1455_v43, %v1493_v50  ;;  %v1497_v7 = vsel %vm7487_vm1, %v1457_v35, %v1496_v21  ;;  %v933_v25 = vsel %vm9748_vm11, %v9747_v38, %v932_v29  ;;  %vm9749_vm0 = vmmov %vm9748_vm11  ;;  %v2811_v44 = vld [vmem:[#allocation2 + $0x7c] sm:$0xff]  ;;  %v2483_v29 = vrot.slane %v6570_v2, 4 }
  0xe9   : > { %v935_v19 = vsel %vm9749_vm0, %v6555_v27, %v934_v24  ;;  %1495 = vst [vmem:[#allocation2 + $0x18] sm:$0x22] %v1494_v28  ;;  %1498 = vst [vmem:[#allocation2 + $0x20] sm:$0x22] %v1497_v7  ;;  %v972_v50 = vsel %vm7589_vm8, %v933_v25, %v971_v12  ;;  %6640 = vrot.lane.b32.xlu0 %v7883_v0, %s6741_s28  ;;  %v8061_v47 = vsel %vm7382_vm2, 0, %v2811_v44  ;;  %v9750_v12 = vunpack.i.h.bf16 %v8003_v51 }
  0xea   : > { %v975_v21 = vsel %vm7589_vm8, %v935_v19, %v974_v59  ;;  %973 = vst [vmem:[#allocation2 + $0x18] sm:$0x11] %v972_v50  ;;  %v1961_v59 = vrot.slane %v6565_v48, 4  ;;  %v1680_v43 = vrot.slane %v8043_v41, 4  ;;  %6645 = vrot.lane.b32.xlu1 %v9751_v26, %s6744_s16  ;;  %2813 = vst [vmem:[#allocation2 + $0x7c] sm:$0xff] %v8061_v47  ;;  %v2497_v0 = vsel %vm9739_vm5, %v7783_v6, %v2483_v29  ;;  %v8086_v44 = vpop.permute.xlu1 %2708  ;;  %v8088_v50 = vpop.permute.xlu0 %2187 }
  0xeb   : > { %976 = vst [vmem:[#allocation2 + $0x20] sm:$0x11] %v975_v21  ;;  %v8065_v27 = vrot.slane %v9750_v12, 4  ;;  %v2499_v24 = vsel %vm9752_vm12, %v2483_v29, %v8054_v31  ;;  %v4225_v13 = vcombine.high %v7927_v37, %v7927_v37  ;;  %v9753_v10 = vunpack.i.h.bf16 %v7744_v16  ;;  %v2536_v7 = vld [vmem:[#allocation2 + $0x18] sm:$0x88]  ;;  %vm9756_vm0 = vmmov %vm9739_vm5 }
  0xec   : > { %vm9754_vm14 = vcmask 744448   ;;  %v2539_v38 = vld [vmem:[#allocation2 + $0x20] sm:$0x88]  ;;  %v1975_v25 = vsel %vm9756_vm0, %v7816_v36, %v1961_v59  ;;  %vm9757_vm5 = vmmov %vm9756_vm0  ;;  %v1741_v19 = vld [vmem:[#allocation2 + $0x30] sm:$0x44]  ;;  %v9758_v29 = vunpack.i.h.bf16 %v7746_v33  ;;  %vm9759_vm12 = vcmask 883712  }
  0xed   : > { %v2498_v35 = vsel %vm9754_vm14, %v9753_v10, %v2497_v0  ;;  %vm9755_vm11 = vmmov %vm9754_vm14  ;;  %v1977_v6 = vsel %vm9757_vm5, %v1961_v59, %v8065_v27  ;;  %v2017_v21 = vld [vmem:[#allocation2 + $0x20] sm:$0x44]  ;;  %v1220_v59 = vld [vmem:[#allocation2 + $0x30] sm:$0x22]  ;;  %6650 = vrot.lane.b32.xlu0 %v7937_v11, %s6743_s30  ;;  %v9761_v33 = vrot.slane %v7872_v32, 4  ;;  %vm9764_vm5 = vcmask 891904  }
  0xee   : > { %v2500_v28 = vsel %vm9755_vm11, %v6570_v2, %v2499_v24  ;;  %v2537_v16 = vsel %vm7623_vm13, %v2498_v35, %v2536_v7  ;;  %v2014_v2 = vld [vmem:[#allocation2 + $0x18] sm:$0x44]  ;;  %v1976_v36 = vsel %vm9759_vm12, %v9758_v29, %v1975_v25  ;;  %vm9760_vm14 = vmmov %vm9759_vm12  ;;  %4544 = vrot.lane.b32.xlu1 %v7708_v14, %s6738_s25  ;;  %vm9765_vm12 = vcmask 1031168  }
  0xef   : > { %v2540_v37 = vsel %vm7623_vm13, %v2500_v28, %v2539_v38  ;;  %v1978_v12 = vsel %vm9760_vm14, %v6565_v48, %v1977_v6  ;;  %2538 = vst [vmem:[#allocation2 + $0x18] sm:$0x88] %v2537_v16  ;;  %v2015_v26 = vsel %vm7641_vm10, %v1976_v36, %v2014_v2  ;;  %vm9762_vm11 = vmmov %vm9756_vm0  ;;  %v9763_v48 = vrot.slane %v7874_v9, 4  ;;  %v2777_v6 = vld [vmem:[#allocation2 + $0x84] sm:$0x11]  ;;  %v8126_v2 = vpop.permute.xlu0 %1146 }
  0xf0   : > { %2541 = vst [vmem:[#allocation2 + $0x20] sm:$0x88] %v2540_v37  ;;  %v2018_v0 = vsel %vm7641_vm10, %v1978_v12, %v2017_v21  ;;  %v1697_v24 = vsel %vm9762_vm11, %v9761_v33, %v1680_v43  ;;  %2016 = vst [vmem:[#allocation2 + $0x18] sm:$0x44] %v2015_v26  ;;  %v2723_v28 = vrot.slane %v8086_v44, 4  ;;  %v2202_v7 = vrot.slane %v8088_v50, 4  ;;  %v8124_v37 = vpop.permute.xlu1 %1667 }
  0xf1   : > { %v1176_v10 = vsel %vm9756_vm0, %v9763_v48, %v1159_v54  ;;  %2019 = vst [vmem:[#allocation2 + $0x20] sm:$0x44] %v2018_v0  ;;  %v1698_v11 = vsel %vm9764_vm5, %v7872_v32, %v1697_v24  ;;  %v2263_v16 = vld [vmem:[#allocation2 + $0x30] sm:$0x88]  ;;  %v8129_v32 = vrot.slane %v4225_v13, %v6839_v5  ;;  %vm9768_vm14 = vmmov %vm9756_vm0  ;;  %v9769_v36 = vrot.slane %v7920_v58, 4  ;;  %4822 = vrot.lane.b32.xlu0 %v7943_v57, %s6737_s24 }
  0xf2   : > { %v1177_v35 = vsel %vm9765_vm12, %v7874_v9, %v1176_v10  ;;  %v1742_v38 = vsel %vm7317_vm7, %v1698_v11, %v1741_v19  ;;  %v9766_v9 = vcombine.high %v7958_v53, %v7958_v53  ;;  %v9767_v19 = vrot.slane %v7918_v30, 4  ;;  %vm9770_vm11 = vmmov %vm9756_vm0  ;;  %v4301_v26 = vld [vmem:[#allocation3] sm:$0x11]  ;;  %v4304_v53 = vld [vmem:[#allocation3 + $0x58] sm:$0x11] }
  0xf3   : > { %v1221_v25 = vsel %vm7207_vm9, %v1177_v35, %v1220_v59  ;;  %1743 = vst [vmem:[#allocation2 + $0x30] sm:$0x44] %v1742_v38  ;;  %v2219_v12 = vsel %vm9770_vm11, %v9769_v36, %v2202_v7  ;;  %v1681_v59 = vrot.slane %v8124_v37, 4  ;;  %v1160_v13 = vrot.slane %v8126_v2, 4  ;;  %v1744_v24 = vld [vmem:[#allocation2 + $0x38] sm:$0x44]  ;;  %vm9774_vm12 = vmmov %vm9770_vm11 }
  0xf4   : > { %v4255_v21 = vrot.slane %v9766_v9, %v6839_v5  ;;  %1222 = vst [vmem:[#allocation2 + $0x30] sm:$0x22] %v1221_v25  ;;  %v2740_v29 = vsel %vm9768_vm14, %v9767_v19, %v2723_v28  ;;  %vm9771_vm0 = vcmask 736256   ;;  %vm9772_vm5 = vcmask 752640   ;;  %v1223_v48 = vld [vmem:[#allocation2 + $0x38] sm:$0x22]  ;;  %vm9775_vm14 = vmmov %vm9770_vm11 }
  0xf5   : > { %v2741_v0 = vsel %vm9771_vm0, %v7918_v30, %v2740_v29  ;;  %v2220_v33 = vsel %vm9772_vm5, %v7920_v58, %v2219_v12  ;;  %v9773_v10 = vrot.slane %v7447_v45, %v6839_v5  ;;  %v4680_v11 = vrot.slane %v7897_v22, 7  ;;  %5377 = vrot.lane.b32.xlu0 %v7749_v52, %s6739_s26  ;;  %vm9779_vm5 = vmmov %vm9774_vm12 }
  0xf6   : > { %v4262_v57 = vrot.slane %v8129_v32, %v6839_v5  ;;  %v2778_v35 = vsel %vm6938_vm6, %v2741_v0, %v2777_v6  ;;  %v2264_v30 = vsel %vm7270_vm3, %v2220_v33, %v2263_v16  ;;  %v1699_v58 = vsel %vm9774_vm12, %v1680_v43, %v1681_v59  ;;  %v8172_v6 = vpop.permute.xlu1 %2710  ;;  %v8174_v16 = vpop.permute.xlu0 %2189  ;;  %vm9780_vm12 = vmmov %vm9779_vm5 }
  0xf7   : > { %5100 = vrot.lane.b32.xlu1 %v9773_v10, %s6740_s27  ;;  %v1178_v45 = vsel %vm9775_vm14, %v1159_v54, %v1160_v13  ;;  %2779 = vst [vmem:[#allocation2 + $0x84] sm:$0x11] %v2778_v35  ;;  %2265 = vst [vmem:[#allocation2 + $0x30] sm:$0x88] %v2264_v30  ;;  %vm9776_vm11 = vcmask 891904   ;;  %vm9777_vm0 = vcmask 1031168   ;;  %v4302_v9 = vsel %vm6938_vm6, %v4255_v21, %v4301_v26 }
  0xf8   : > { %v1700_v38 = vsel %vm9776_vm11, %v8043_v41, %v1699_v58  ;;  %v1179_v25 = vsel %vm9777_vm0, %v8045_v34, %v1178_v45  ;;  %v4305_v43 = vsel %vm6938_vm6, %v4262_v57, %v4304_v53  ;;  %v2780_v41 = vld [vmem:[#allocation2 + $0x8c] sm:$0x11]  ;;  %v2724_v29 = vrot.slane %v8172_v6, 4  ;;  %v2266_v34 = vld [vmem:[#allocation2 + $0x38] sm:$0x88]  ;;  %v2835_v12 = vld [vmem:[#allocation2 + $0x20] sm:$0xff] }
  0xf9   : > { %v1745_v54 = vsel %vm7317_vm7, %v1700_v38, %v1744_v24  ;;  %v1224_v19 = vsel %vm7207_vm9, %v1179_v25, %v1223_v48  ;;  %v2203_v36 = vrot.slane %v8174_v16, 4  ;;  %4303 = vst [vmem:[#allocation3] sm:$0x11] %v4302_v9  ;;  %4306 = vst [vmem:[#allocation3 + $0x58] sm:$0x11] %v4305_v43  ;;  %v2834_v21 = vld [vmem:[#allocation2 + $0x18] sm:$0xff]  ;;  %v9778_v26 = vpack.i.bf16 %v7900_v62, %v7897_v22 }
  0xfa   : > { %1746 = vst [vmem:[#allocation2 + $0x38] sm:$0x44] %v1745_v54  ;;  %1225 = vst [vmem:[#allocation2 + $0x38] sm:$0x22] %v1224_v19  ;;  %v5236_v53 = vrot.slane %v7897_v22, 5  ;;  %v2742_v0 = vsel %vm9779_vm5, %v2723_v28, %v2724_v29  ;;  %v6360_v24 = vcombine.low %v2834_v21, %v7795_v4  ;;  %v6361_v48 = vcombine.high %v2834_v21, %v7795_v4  ;;  %v8207_v58 = vpop.permute.xlu1 %6578  ;;  %v8209_v28 = vpop.permute.xlu0 %6573 }
  0xfb   : > { %6655 = vrot.lane.b32.xlu1 %v9778_v26, %s6742_s29  ;;  %v2221_v33 = vsel %vm9780_vm12, %v2202_v7, %v2203_v36  ;;  %vm9781_vm14 = vcmask 736256   ;;  %vm9782_vm11 = vcmask 752640   ;;  %v6362_v35 = vcombine.low %v2835_v12, %v7982_v49  ;;  %4693 = vrot.lane.b32.xlu0 %v4680_v11, %s6741_s28  ;;  %vm9784_vm12 = vmmov %vm9779_vm5 }
  0xfc   : > { %v2743_v10 = vsel %vm9781_vm14, %v8086_v44, %v2742_v0  ;;  %v2222_v57 = vsel %vm9782_vm11, %v8088_v50, %v2221_v33  ;;  %v6363_v30 = vcombine.high %v2835_v12, %v7982_v49  ;;  %3121 = vmatprep.subr.bf16.mxu1 %v6361_v48  ;;  %v6581_v44 = vunpack.i.h.bf16 %v8207_v58  ;;  %v977_v33 = vld [vmem:[#allocation2 + $0x28] sm:$0x11] }
  0xfd   : > { %v2781_v7 = vsel %vm6938_vm6, %v2743_v10, %v2780_v41  ;;  %v2267_v4 = vsel %vm7270_vm3, %v2222_v57, %v2266_v34  ;;  %v6580_v45 = vunpack.i.l.bf16 %v8207_v58  ;;  %3122 = vmatpush1.bf16.msra.mxu1 %v6360_v24  ;;  %v6576_v49 = vunpack.i.h.bf16 %v8209_v28  ;;  %v980_v24 = vld [vmem:[#allocation2 + $0x30] sm:$0x11] }
  0xfe   : > { %2782 = vst [vmem:[#allocation2 + $0x8c] sm:$0x11] %v2781_v7  ;;  %2268 = vst [vmem:[#allocation2 + $0x38] sm:$0x88] %v2267_v4  ;;  %3164 = vmatprep.subr.bf16.mxu0 %v6363_v30  ;;  %v6575_v50 = vunpack.i.l.bf16 %v8209_v28  ;;  %v2814_v38 = vld [vmem:[#allocation2 + $0x84] sm:$0xff]  ;;  %v8222_v25 = vrot.slane %v6581_v44, 4  ;;  %v8237_v21 = vpop.permute.xlu1 %6588  ;;  %v8239_v12 = vpop.permute.xlu0 %6583  ;;  %v9786_v57 = vunpack.i.h.bf16 %v7966_v20 }
  0xff   : > { %3165 = vmatpush1.bf16.msra.mxu0 %v6362_v35  ;;  %v1442_v9 = vrot.slane %v6580_v45, 4  ;;  %v9783_v43 = vrot.slane %v7897_v22, 6  ;;  %v4684_v11 = vrot.slane %v7900_v62, 7  ;;  %v5240_v54 = vrot.slane %v7900_v62, 5  ;;  %5249 = vrot.lane.b32.xlu0 %v5236_v53, %s6743_s30  ;;  %v1499_v30 = vld [vmem:[#allocation2 + $0x28] sm:$0x22] }
 0x100   : > { %v8231_v19 = vsel %vm7382_vm2, 0, %v2814_v38  ;;  %v8235_v41 = vrot.slane %v6576_v49, 4  ;;  %v919_v34 = vrot.slane %v6575_v50, 4  ;;  %v4962_v22 = vrot.slane %v7900_v62, 6  ;;  %v1502_v7 = vld [vmem:[#allocation2 + $0x30] sm:$0x22] }
 0x101   : > { %4971 = vrot.lane.b32.xlu1 %v9783_v43, %s6744_s16  ;;  %2816 = vst [vmem:[#allocation2 + $0x84] sm:$0xff] %v8231_v19  ;;  %v1458_v26 = vsel %vm9779_vm5, %v7995_v63, %v1442_v9  ;;  %v1460_v0 = vsel %vm9784_vm12, %v1442_v9, %v8222_v25  ;;  %v6591_v48 = vunpack.i.h.bf16 %v8237_v21  ;;  %v6590_v10 = vunpack.i.l.bf16 %v8237_v21  ;;  %vm9789_vm12 = vmmov %vm9779_vm5  ;;  %v1755_v62 = vld [vmem:[#allocation2 + $0x50] sm:$0x4] }
 0x102   : > { %vm9785_vm14 = vcmask 130048   ;;  %vm9787_vm11 = vcmask 900096   ;;  %v936_v4 = vsel %vm9779_vm5, %v7999_v46, %v919_v34  ;;  %v938_v38 = vsel %vm9789_vm12, %v919_v34, %v8235_v41 }
 0x103   : > { %6378 = vmatmul.mubr.msk.bf16.vlgmr.msra.gmra.mxu1 %vm9785_vm14, %v7805_v3  ;;  %v1459_v35 = vsel %vm9787_vm11, %v9786_v57, %v1458_v26  ;;  %vm9788_vm0 = vmmov %vm9787_vm11  ;;  %v9791_v9 = vunpack.i.h.bf16 %v7968_v60  ;;  %v8277_v26 = vrot.slane %v6591_v48, 4  ;;  %v8279_v60 = vpop.permute.xlu1 %1669  ;;  %v8281_v57 = vpop.permute.xlu0 %1148  ;;  %4973 = vrot.lane.b32.xlu0 %v4962_v22, %s6744_s16  ;;  %vm9796_vm12 = vcmask 744448   ;;  %s6351_s16 = sshll.u32 %s10033_s19, 3 }
 0x104   : > { %v1461_v63 = vsel %vm9788_vm0, %v6580_v45, %v1460_v0  ;;  %vm9790_vm4 = vmmov %vm9785_vm14  ;;  %v1500_v53 = vsel %vm7487_vm1, %v1459_v35, %v1499_v30  ;;  %vm9792_vm0 = vcmask 1039360   ;;  %3225 = vmatprep.mubr.bf16.mxu1 %v9724_v61  ;;  %v2485_v0 = vrot.slane %v6590_v10, 4  ;;  %v1747_v35 = vld [vmem:[#allocation2 + $0x40] sm:$0x44]  ;;  %s513_s17 = scalar_lea.vmem %s9470_s14, %s6351_s16  ;;  %s517_s24 = scalar_lea.vmem %s9471_s15, %s6351_s16 }
 0x105   : > { %6379 = vmatmul.mubr.msk.bf16.vlgmr.msra.gmra.mxu0 %vm9790_vm4, %v7805_v3  ;;  %v1503_v20 = vsel %vm7487_vm1, %v1461_v63, %v1502_v7  ;;  %v937_v45 = vsel %vm9792_vm0, %v9791_v9, %v936_v4  ;;  %vm9793_vm14 = vmmov %vm9792_vm0  ;;  %1501 = vst [vmem:[#allocation2 + $0x28] sm:$0x22] %v1500_v53  ;;  %4695 = vrot.lane.b32.xlu1 %v4684_v11, %s6741_s28  ;;  %v1682_v63 = vrot.slane %v8279_v60, 4  ;;  %v1161_v30 = vrot.slane %v8281_v57, 4  ;;  %v4214_v53 = vld [vmem:[%s9466_s10] sm:$0xff] }
 0x106   : > { %v939_v43 = vsel %vm9793_vm14, %v6575_v50, %v938_v38  ;;  %1504 = vst [vmem:[#allocation2 + $0x30] sm:$0x22] %v1503_v20  ;;  %v978_v46 = vsel %vm7589_vm8, %v937_v45, %v977_v33  ;;  %3268 = vmatprep.mubr.bf16.mxu0 %v9724_v61  ;;  %v2817_v50 = vld [vmem:[#allocation2 + $0x8c] sm:$0xff]  ;;  %v6586_v33 = vunpack.i.h.bf16 %v8239_v12  ;;  %vm9794_vm4 = vmmov %vm9779_vm5  ;;  %v1226_v38 = vld [vmem:[#allocation2 + $0x40] sm:$0x22]  ;;  %vm9804_vm5 = vcmask 256002  }
 0x107   : > { %v981_v34 = vsel %vm7589_vm8, %v939_v43, %v980_v24  ;;  %979 = vst [vmem:[#allocation2 + $0x28] sm:$0x11] %v978_v46  ;;  %v6585_v24 = vunpack.i.l.bf16 %v8239_v12  ;;  %v8292_v7 = vsel %vm7382_vm2, 0, %v2817_v50  ;;  %v2501_v11 = vsel %vm9794_vm4, %v8054_v31, %v2485_v0  ;;  %vm9795_vm11 = vmmov %vm9794_vm4  ;;  %v2542_v9 = vld [vmem:[#allocation2 + $0x28] sm:$0x88]  ;;  %5455 = vperm.xlu0 %6612, %v4214_v53  }
 0x108   : > { %982 = vst [vmem:[#allocation2 + $0x30] sm:$0x11] %v981_v34  ;;  %v2503_v4 = vsel %vm9795_vm11, %v2485_v0, %v8277_v26  ;;  %2819 = vst [vmem:[#allocation2 + $0x8c] sm:$0xff] %v8292_v7  ;;  %v2502_v22 = vsel %vm9796_vm12, %v6571_v39, %v2501_v11  ;;  %v2545_v45 = vld [vmem:[#allocation2 + $0x30] sm:$0x88]  ;;  %v8308_v31 = vrot.slane %v6586_v33, 4  ;;  %v1180_v39 = vsel %vm9794_vm4, %v1160_v13, %v1161_v30  ;;  %v8326_v0 = vpop.permute.xlu0 %2191 }
 0x109   : > { %vm9797_vm0 = vmmov %vm9796_vm12  ;;  %v1963_v43 = vrot.slane %v6585_v24, 4  ;;  %v2543_v46 = vsel %vm7623_vm13, %v2502_v22, %v2542_v9  ;;  %5251 = vrot.lane.b32.xlu1 %v5240_v54, %s6743_s30  ;;  %v2020_v54 = vld [vmem:[#allocation2 + $0x28] sm:$0x44]  ;;  %v2023_v22 = vld [vmem:[#allocation2 + $0x30] sm:$0x44] }
 0x10a   : > { %v2504_v20 = vsel %vm9797_vm0, %v6590_v10, %v2503_v4  ;;  %vm9798_vm14 = vmmov %vm9794_vm4  ;;  %v8324_v10 = vpop.permute.xlu1 %2712  ;;  %2544 = vst [vmem:[#allocation2 + $0x28] sm:$0x88] %v2543_v46  ;;  %vm9801_vm0 = vcmask 891904   ;;  %v2204_v46 = vrot.slane %v8326_v0, 4 }
 0x10b   : > { %v2546_v34 = vsel %vm7623_vm13, %v2504_v20, %v2545_v45  ;;  %v1701_v40 = vsel %vm9798_vm14, %v1681_v59, %v1682_v63  ;;  %vm9799_vm11 = vmmov %vm9794_vm4  ;;  %vm9802_vm14 = vcmask 1031168   ;;  %v9807_v20 = vunpack.i.h.bf16 %v8003_v51 }
 0x10c   : > { %2547 = vst [vmem:[#allocation2 + $0x30] sm:$0x88] %v2546_v34  ;;  %v1979_v50 = vsel %vm9799_vm11, %v8065_v27, %v1963_v43  ;;  %vm9800_vm12 = vmmov %vm9794_vm4  ;;  %v1702_v11 = vsel %vm9801_vm0, %v8124_v37, %v1701_v40  ;;  %v1181_v13 = vsel %vm9802_vm14, %v8126_v2, %v1180_v39  ;;  %vm9803_vm4 = vsmask.f32 2304  ;;  %v4215_v27 = vld [vmem:[%s9466_s10 + $0x8] sm:$0xff] }
 0x10d   : > { %v1981_v59 = vsel %vm9800_vm12, %v1963_v43, %v8308_v31  ;;  %vm8341_vm15 = vmand %vm9804_vm5, %vm9803_vm4  ;;  %vm9808_vm11 = vcmask 883712   ;;  %v1748_v9 = vsel %vm7317_vm7, %v1702_v11, %v1747_v35  ;;  %v1227_v45 = vsel %vm7207_vm9, %v1181_v13, %v1226_v38  ;;  %v4216_v43 = vld [vmem:[%s9467_s11] sm:$0xff]  ;;  %v1234_v38 = vld [vmem:[#allocation2 + $0x50] sm:$0x2]  ;;  %5460 = vperm.xlu1 %6613, %v4215_v27  }
 0x10e   : > { %v1980_v37 = vsel %vm9808_vm11, %v9807_v20, %v1979_v50  ;;  %vm9809_vm12 = vmmov %vm9808_vm11  ;;  %1749 = vst [vmem:[#allocation2 + $0x40] sm:$0x44] %v1748_v9  ;;  %vm9810_vm5 = vsmask.f32 1280  ;;  %vm9811_vm0 = vcmask 254977   ;;  %v1672_v39 = vpop.permute.xlu1 %1671  ;;  %v1151_v50 = vpop.permute.xlu0 %1150  ;;  %vm9544_vm4 = vcmask 257027   ;;  %5815 = vperm.xlu0 %6612, %v4216_v43  }
 0x10f   : > { %v1982_v2 = vsel %vm9809_vm12, %v6585_v24, %v1981_v59  ;;  %v2021_v53 = vsel %vm7641_vm10, %v1980_v37, %v2020_v54  ;;  %1228 = vst [vmem:[#allocation2 + $0x40] sm:$0x22] %v1227_v45  ;;  %v2725_v24 = vrot.slane %v8324_v10, 4  ;;  %vm8367_vm14 = vmand %vm9811_vm0, %vm9810_vm5  ;;  %v2783_v34 = vld [vmem:[#allocation2 + $0x94] sm:$0x11]  ;;  %vm9814_vm11 = vcmask 1043456  }
 0x110   : > { %v2024_v51 = vsel %vm7641_vm10, %v1982_v2, %v2023_v22  ;;  %2022 = vst [vmem:[#allocation2 + $0x28] sm:$0x44] %v2021_v53  ;;  %v2269_v40 = vld [vmem:[#allocation2 + $0x40] sm:$0x88]  ;;  %vm9815_vm12 = vmmov %vm9814_vm11  ;;  %v1683_v13 = vrot.slane %v1672_v39, 4  ;;  %v1756_v54 = vsel %vm8341_vm15, %v1672_v39, %v1755_v62  ;;  %v4217_v22 = vld [vmem:[%s9467_s11 + $0x8] sm:$0xff] }
 0x111   : > { %2025 = vst [vmem:[#allocation2 + $0x30] sm:$0x44] %v2024_v51  ;;  %v2744_v59 = vsel %vm9814_vm11, %v2724_v29, %v2725_v24  ;;  %v2223_v11 = vsel %vm9815_vm12, %v2203_v36, %v2204_v46  ;;  %vm9816_vm5 = vcmask 736256   ;;  %vm9817_vm0 = vcmask 752640   ;;  %v1750_v29 = vld [vmem:[#allocation2 + $0x48] sm:$0x44]  ;;  %vm9818_vm15 = vmmov %vm9814_vm11  ;;  %5820 = vperm.xlu1 %6613, %v4217_v22  }
 0x112   : > { %v2745_v27 = vsel %vm9816_vm5, %v8172_v6, %v2744_v59  ;;  %v2224_v20 = vsel %vm9817_vm0, %v8174_v16, %v2223_v11  ;;  %1757 = vst [vmem:[#allocation2 + $0x50] sm:$0x4] %v1756_v54  ;;  %v1162_v37 = vrot.slane %v1151_v50, 4  ;;  %v1235_v36 = vsel %vm8367_vm14, %v1151_v50, %v1234_v38  ;;  %v2789_v2 = vld [vmem:[#allocation2 + $0xa4] sm:$0x1]  ;;  %vm9823_vm5 = vmmov %vm9818_vm15  ;;  %v2715_v51 = vpop.permute.xlu1 %2714 }
 0x113   : > { %v2784_v4 = vsel %vm6938_vm6, %v2745_v27, %v2783_v34  ;;  %v2270_v62 = vsel %vm7270_vm3, %v2224_v20, %v2269_v40  ;;  %v1703_v6 = vsel %vm9818_vm15, %v1682_v63, %v1683_v13  ;;  %v1229_v9 = vld [vmem:[#allocation2 + $0x48] sm:$0x22]  ;;  %1236 = vst [vmem:[#allocation2 + $0x50] sm:$0x2] %v1235_v36  ;;  %vm9819_vm11 = vsmask.f32 3328  ;;  %v2194_v63 = vpop.permute.xlu0 %2193 }
 0x114   : > { %vm8397_vm12 = vmand %vm9544_vm4, %vm9819_vm11  ;;  %v2277_v45 = vld [vmem:[#allocation2 + $0x50] sm:$0x8]  ;;  %2785 = vst [vmem:[#allocation2 + $0x94] sm:$0x11] %v2784_v4  ;;  %vm9822_vm14 = vcmask 891904   ;;  %v1182_v53 = vsel %vm9823_vm5, %v1161_v30, %v1162_v37  ;;  %vm9824_vm0 = vcmask 1031168   ;;  %v4241_v16 = vcombine.high %v8129_v32, %v8129_v32 }
 0x115   : > { %2271 = vst [vmem:[#allocation2 + $0x40] sm:$0x88] %v2270_v62  ;;  %v1704_v43 = vsel %vm9822_vm14, %v8279_v60, %v1703_v6  ;;  %v1183_v38 = vsel %vm9824_vm0, %v8281_v57, %v1182_v53  ;;  %v2726_v34 = vrot.slane %v2715_v51, 4  ;;  %v9825_v40 = vld [vmem:[#allocation5_spill] sm:$0xff]  ;;  %v2786_v50 = vld [vmem:[#allocation2 + $0x9c] sm:$0x11]  ;;  %v2278_v59 = vsel %vm8397_vm12, %v2194_v63, %v2277_v45  ;;  %vm9827_vm14 = vmmov %vm9823_vm5 }
 0x116   : > { %v1751_v35 = vsel %vm7317_vm7, %v1704_v43, %v1750_v29  ;;  %vm9826_vm15 = vnez %v9825_v40  ;;  %v1230_v60 = vsel %vm7207_vm9, %v1183_v38, %v1229_v9  ;;  %v2205_v30 = vrot.slane %v2194_v63, 4  ;;  %v2272_v13 = vld [vmem:[#allocation2 + $0x48] sm:$0x88]  ;;  %2279 = vst [vmem:[#allocation2 + $0x50] sm:$0x8] %v2278_v59  ;;  %vm9829_vm0 = vmmov %vm9827_vm14  ;;  %v8422_v37 = vpop.permute.xlu1 %6598 }
 0x117   : > { %v2790_v39 = vsel %vm9826_vm15, %v2715_v51, %v2789_v2  ;;  %1752 = vst [vmem:[#allocation2 + $0x48] sm:$0x44] %v1751_v35  ;;  %1231 = vst [vmem:[#allocation2 + $0x48] sm:$0x22] %v1230_v60  ;;  %vm2826_vm11 = vcmask 257024   ;;  %v2746_v11 = vsel %vm9827_vm14, %v2725_v24, %v2726_v34  ;;  %v2836_v57 = vld [vmem:[#allocation2 + $0x28] sm:$0xff]  ;;  %v8424_v36 = vpop.permute.xlu0 %6593  ;;  %v6600_v62 = vunpack.i.l.bf16 %v8422_v37 }
 0x118   : > { %2791 = vst [vmem:[#allocation2 + $0xa4] sm:$0x1] %v2790_v39  ;;  %v2837_v54 = vld [vmem:[#allocation2 + $0x30] sm:$0xff]  ;;  %vm9828_vm5 = vcmask 736256   ;;  %v2225_v27 = vsel %vm9829_vm0, %v2204_v46, %v2205_v30  ;;  %v6364_v20 = vcombine.low %v2836_v57, %v8061_v47  ;;  %v6365_v29 = vcombine.high %v2836_v57, %v8061_v47 }
 0x119   : > { %v2747_v22 = vsel %vm9828_vm5, %v8324_v10, %v2746_v11  ;;  %vm9830_vm12 = vcmask 752640   ;;  %v6366_v4 = vcombine.low %v2837_v54, %v8231_v19  ;;  %v6367_v10 = vcombine.high %v2837_v54, %v8231_v19  ;;  %vm9835_vm5 = vmmov %vm9829_vm0  ;;  %v983_v11 = vld [vmem:[#allocation2 + $0x38] sm:$0x11] }
 0x11a   : > { %v2787_v24 = vsel %vm6938_vm6, %v2747_v22, %v2786_v50  ;;  %v2226_v2 = vsel %vm9830_vm12, %v8326_v0, %v2225_v27  ;;  %3207 = vmatprep.subr.bf16.mxu1 %v6365_v29  ;;  %v6601_v47 = vunpack.i.h.bf16 %v8422_v37  ;;  %v6596_v6 = vunpack.i.h.bf16 %v8424_v36  ;;  %v8458_v63 = vpop.permute.xlu1 %6608  ;;  %v1505_v27 = vld [vmem:[#allocation2 + $0x38] sm:$0x22] }
 0x11b   : > { %2788 = vst [vmem:[#allocation2 + $0x9c] sm:$0x11] %v2787_v24  ;;  %v2273_v46 = vsel %vm7270_vm3, %v2226_v2, %v2272_v13  ;;  %v2820_v9 = vld [vmem:[#allocation2 + $0x94] sm:$0xff]  ;;  %vm9831_vm15 = vsmask.f32 7938  ;;  %3250 = vmatprep.subr.bf16.mxu0 %v6367_v10  ;;  %3208 = vmatpush1.bf16.msra.mxu1 %v6364_v20  ;;  %v6595_v19 = vunpack.i.l.bf16 %v8424_v36  ;;  %v1444_v53 = vrot.slane %v6600_v62, 4  ;;  %v8460_v35 = vpop.permute.xlu0 %6603 }
 0x11c   : > { %vm8439_vm14 = vmand %vm2826_vm11, %vm9831_vm15  ;;  %2274 = vst [vmem:[#allocation2 + $0x48] sm:$0x88] %v2273_v46  ;;  %v8448_v45 = vsel %vm7382_vm2, 0, %v2820_v9  ;;  %3251 = vmatpush1.bf16.msra.mxu0 %v6366_v4  ;;  %v8452_v43 = vrot.slane %v6601_v47, 4  ;;  %v8456_v51 = vrot.slane %v6596_v6, 4  ;;  %v6611_v40 = vunpack.i.h.bf16 %v8458_v63 }
 0x11d   : > { %2822 = vst [vmem:[#allocation2 + $0x94] sm:$0xff] %v8448_v45  ;;  %v921_v34 = vrot.slane %v6595_v19, 4  ;;  %v6610_v39 = vunpack.i.l.bf16 %v8458_v63  ;;  %v6606_v60 = vunpack.i.h.bf16 %v8460_v35  ;;  %vm9834_vm11 = vmmov %vm9829_vm0  ;;  %v986_v13 = vld [vmem:[#allocation2 + $0x40] sm:$0x11]  ;;  %vm9836_vm0 = vcmask 130048  }
 0x11e   : > { %v1462_v30 = vsel %vm9834_vm11, %v8222_v25, %v1444_v53  ;;  %v1464_v59 = vsel %vm9835_vm5, %v1444_v53, %v8452_v43  ;;  %6380 = vmatmul.mubr.msk.bf16.vlgmr.msra.gmra.mxu1 %vm9836_vm0, %v7805_v3  ;;  %v6605_v57 = vunpack.i.l.bf16 %v8460_v35  ;;  %vm9837_vm12 = vcmask 900096   ;;  %v1508_v20 = vld [vmem:[#allocation2 + $0x40] sm:$0x22]  ;;  %vm9840_vm11 = vmmov %vm9835_vm5  ;;  %v1435_v4 = vpop.permute.xlu1 %1434 }
 0x11f   : > { %v2828_v38 = vld [vmem:[#allocation2 + $0xa4] sm:$0xf]  ;;  %v1463_v54 = vsel %vm9837_vm12, %v6581_v44, %v1462_v30  ;;  %vm9838_vm15 = vmmov %vm9837_vm12  ;;  %v942_v29 = vsel %vm9840_vm11, %v921_v34, %v8456_v51  ;;  %3311 = vmatprep.mubr.bf16.mxu1 %v9724_v61  ;;  %v2488_v46 = vrot.slane %v6611_v40, 4  ;;  %v1966_v0 = vrot.slane %v6606_v60, 4 }
 0x120   : > { %v2829_v50 = vsel %vm8439_vm14, 0, %v2828_v38  ;;  %v1465_v22 = vsel %vm9838_vm15, %v6600_v62, %v1464_v59  ;;  %vm9839_vm14 = vmmov %vm9835_vm5  ;;  %v1506_v24 = vsel %vm7487_vm1, %v1463_v54, %v1505_v27  ;;  %vm9844_vm15 = vsmask.f32 7942  ;;  %v1515_v38 = vld [vmem:[#allocation2 + $0x50] sm:$0x2] }
 0x121   : > { %2830 = vst [vmem:[#allocation2 + $0xa4] sm:$0xf] %v2829_v50  ;;  %v940_v25 = vsel %vm9839_vm14, %v8235_v41, %v921_v34  ;;  %vm9841_vm5 = vmmov %vm9836_vm0  ;;  %v1509_v58 = vsel %vm7487_vm1, %v1465_v22, %v1508_v20  ;;  %vm9842_vm0 = vcmask 1039360   ;;  %vm9845_vm14 = vcmask 254977   ;;  %v2551_v27 = vld [vmem:[#allocation2 + $0x40] sm:$0x88] }
 0x122   : > { %6381 = vmatmul.mubr.msk.bf16.vlgmr.msra.gmra.mxu0 %vm9841_vm5, %v7805_v3  ;;  %v941_v44 = vsel %vm9842_vm0, %v6576_v49, %v940_v25  ;;  %vm9843_vm12 = vmmov %vm9842_vm0  ;;  %v912_v3 = vpop.permute.xlu0 %911  ;;  %v2823_v10 = vld [vmem:[#allocation2 + $0x9c] sm:$0xff]  ;;  %1507 = vst [vmem:[#allocation2 + $0x38] sm:$0x22] %v1506_v24  ;;  %v2487_v62 = vrot.slane %v6610_v39, 4  ;;  %v1446_v53 = vrot.slane %v1435_v4, 4  ;;  %v2478_v24 = vpop.permute.xlu1 %2477  ;;  %vm9869_vm3 = vcmask 1039360  }
 0x123   : > { %v943_v2 = vsel %vm9843_vm12, %v6595_v19, %v942_v29  ;;  %vm8495_vm4 = vmand %vm9845_vm14, %vm9844_vm15  ;;  %1510 = vst [vmem:[#allocation2 + $0x40] sm:$0x22] %v1509_v58  ;;  %v984_v28 = vsel %vm7589_vm8, %v941_v44, %v983_v11  ;;  %3354 = vmatprep.mubr.bf16.mxu0 %v9724_v61  ;;  %v8509_v9 = vsel %vm7382_vm2, 0, %v2823_v10  ;;  %v1965_v19 = vrot.slane %v6605_v57, 4  ;;  %v989_v29 = vld [vmem:[#allocation2 + $0x48] sm:$0x11] }
 0x124   : > { %v987_v49 = vsel %vm7589_vm8, %v943_v2, %v986_v13  ;;  %985 = vst [vmem:[#allocation2 + $0x38] sm:$0x11] %v984_v28  ;;  %2825 = vst [vmem:[#allocation2 + $0x9c] sm:$0xff] %v8509_v9  ;;  %v2505_v34 = vsel %vm9840_vm11, %v8277_v26, %v2487_v62  ;;  %v1516_v30 = vsel %vm8495_vm4, %v1435_v4, %v1515_v38  ;;  %vm9849_vm0 = vsmask.f32 7938 }
 0x125   : > { %988 = vst [vmem:[#allocation2 + $0x40] sm:$0x11] %v987_v49  ;;  %vm9848_vm5 = vmmov %vm9840_vm11  ;;  %vm9850_vm12 = vcmask 253952   ;;  %v923_v11 = vrot.slane %v912_v3, 4  ;;  %v993_v13 = vld [vmem:[#allocation2 + $0x50] sm:$0x1] }
 0x126   : > { %v2507_v50 = vsel %vm9848_vm5, %v2487_v62, %v2488_v46  ;;  %vm8521_vm15 = vmand %vm9850_vm12, %vm9849_vm0  ;;  %vm9853_vm14 = vcmask 744448   ;;  %v2548_v26 = vld [vmem:[#allocation2 + $0x38] sm:$0x88]  ;;  %1517 = vst [vmem:[#allocation2 + $0x50] sm:$0x2] %v1516_v30  ;;  %vm9860_vm12 = vcmask 257027   ;;  %v1956_v41 = vpop.permute.xlu0 %1955 }
 0x127   : > { %v2506_v54 = vsel %vm9853_vm14, %v6591_v48, %v2505_v34  ;;  %vm9854_vm2 = vmmov %vm9853_vm14  ;;  %v2026_v44 = vld [vmem:[#allocation2 + $0x38] sm:$0x44]  ;;  %v2029_v48 = vld [vmem:[#allocation2 + $0x40] sm:$0x44]  ;;  %vm9859_vm0 = vsmask.f32 7950 }
 0x128   : > { %v2508_v22 = vsel %vm9854_vm2, %v6610_v39, %v2507_v50  ;;  %vm9855_vm11 = vmmov %vm9848_vm5  ;;  %v2549_v58 = vsel %vm7623_vm13, %v2506_v54, %v2548_v26  ;;  %vm9857_vm2 = vcmask 883712   ;;  %v1511_v49 = vld [vmem:[#allocation2 + $0x48] sm:$0x22]  ;;  %v2489_v62 = vrot.slane %v2478_v24, 4  ;;  %v4310_v50 = vld [vmem:[#allocation3 + $0x50] sm:$0x11] }
 0x129   : > { %v1983_v20 = vsel %vm9855_vm11, %v8308_v31, %v1965_v19  ;;  %vm9856_vm4 = vmmov %vm9848_vm5  ;;  %v2552_v21 = vsel %vm7623_vm13, %v2508_v22, %v2551_v27  ;;  %2550 = vst [vmem:[#allocation2 + $0x38] sm:$0x88] %v2549_v58  ;;  %v1967_v34 = vrot.slane %v1956_v41, 4  ;;  %v2554_v59 = vld [vmem:[#allocation2 + $0x48] sm:$0x88] }
 0x12a   : > { %v1985_v25 = vsel %vm9856_vm4, %v1965_v19, %v1966_v0  ;;  %v1984_v39 = vsel %vm9857_vm2, %v6586_v33, %v1983_v20  ;;  %vm9858_vm5 = vmmov %vm9857_vm2  ;;  %2553 = vst [vmem:[#allocation2 + $0x40] sm:$0x88] %v2552_v21  ;;  %v944_v33 = vsel %vm9856_vm4, %v8456_v51, %v923_v11  ;;  %vm9864_vm2 = vsmask.f32 7946  ;;  %v2558_v19 = vld [vmem:[#allocation2 + $0x50] sm:$0x8] }
 0x12b   : > { %v1986_v2 = vsel %vm9858_vm5, %v6605_v57, %v1985_v25  ;;  %vm8542_vm14 = vmand %vm9860_vm12, %vm9859_vm0  ;;  %v2027_v4 = vsel %vm7641_vm10, %v1984_v39, %v2026_v44  ;;  %vm9865_vm5 = vcmask 256002   ;;  %vm9868_vm12 = vcmask 900096   ;;  %v2032_v22 = vld [vmem:[#allocation2 + $0x48] sm:$0x44]  ;;  %v6727_v21 = vld [vmem:[%s9460_s4] sm:$0xff]  }
 0x12c   : > { %v2030_v10 = vsel %vm7641_vm10, %v1986_v2, %v2029_v48  ;;  %vm9863_vm11 = vmmov %vm9856_vm4  ;;  %2028 = vst [vmem:[#allocation2 + $0x38] sm:$0x44] %v2027_v4  ;;  %v994_v51 = vsel %vm8521_vm15, %v912_v3, %v993_v13  ;;  %v2559_v37 = vsel %vm8542_vm14, %v2478_v24, %v2558_v19  ;;  %v4307_v3 = vld [vmem:[#allocation3 + $0x18] sm:$0x11]  ;;  %vm9871_vm15 = vcmask 744448   ;;  %v9877_v20 = vld [vmem:[#allocation4_spill] sm:$0xff] }
 0x12d   : > { %v1466_v12 = vsel %vm9863_vm11, %v8452_v43, %v1446_v53  ;;  %vm8556_vm0 = vmand %vm9865_vm5, %vm9864_vm2  ;;  %2031 = vst [vmem:[#allocation2 + $0x40] sm:$0x44] %v2030_v10  ;;  %v945_v43 = vsel %vm9869_vm3, %v6596_v6, %v944_v33  ;;  %v4269_v13 = vrot.slane %v4241_v16, %v6839_v5  ;;  %vm9873_vm14 = vcmask 883712   ;;  %v4569_v10 = vld [vmem:[#allocation3 + $0x30] sm:$0x22] }
 0x12e   : > { %v1467_v28 = vsel %vm9868_vm12, %v6601_v47, %v1466_v12  ;;  %v990_v38 = vsel %vm7589_vm8, %v945_v43, %v989_v29  ;;  %995 = vst [vmem:[#allocation2 + $0x50] sm:$0x1] %v994_v51  ;;  %v2036_v47 = vld [vmem:[#allocation2 + $0x50] sm:$0x4]  ;;  %vm9870_vm3 = vmmov %vm9856_vm4  ;;  %vm9552_vm4 = vcmask 258052   ;;  %v8617_v29 = vpop.permute.xlu1 %2860 }
 0x12f   : > { %v1512_v53 = vsel %vm7487_vm1, %v1467_v28, %v1511_v49  ;;  %991 = vst [vmem:[#allocation2 + $0x48] sm:$0x11] %v990_v38  ;;  %v2509_v36 = vsel %vm9870_vm3, %v2488_v46, %v2489_v62  ;;  %2560 = vst [vmem:[#allocation2 + $0x50] sm:$0x8] %v2559_v37  ;;  %v2037_v6 = vsel %vm8556_vm0, %v1956_v41, %v2036_v47  ;;  %vm9874_vm2 = vsmask.f32 4352 }
 0x130   : > { %1513 = vst [vmem:[#allocation2 + $0x48] sm:$0x22] %v1512_v53  ;;  %v2510_v30 = vsel %vm9871_vm15, %v6611_v40, %v2509_v36  ;;  %vm9872_vm11 = vmmov %vm9870_vm3  ;;  %v4311_v46 = vsel %vm6938_vm6, %v7708_v14, %v4310_v50  ;;  %v4308_v5 = vsel %vm6938_vm6, %v4269_v13, %v4307_v3  ;;  %v4316_v14 = vld [vmem:[#allocation3 + $0x20] sm:$0x11]  ;;  %vm9878_vm0 = vnez %v9877_v20  ;;  %v4847_v51 = vld [vmem:[#allocation3 + $0x30] sm:$0x44] }
 0x131   : > { %v1987_v11 = vsel %vm9872_vm11, %v1966_v0, %v1967_v34  ;;  %2038 = vst [vmem:[#allocation2 + $0x50] sm:$0x4] %v2037_v6  ;;  %v2555_v54 = vsel %vm7623_vm13, %v2510_v30, %v2554_v59  ;;  %4312 = vst [vmem:[#allocation3 + $0x50] sm:$0x11] %v4311_v46  ;;  %vm9879_vm3 = vcmask 130048   ;;  %vm9549_vm11 = vmmov 0  }
 0x132   : > { %v1988_v63 = vsel %vm9873_vm14, %v6606_v60, %v1987_v11  ;;  %2556 = vst [vmem:[#allocation2 + $0x48] sm:$0x88] %v2555_v54  ;;  %4309 = vst [vmem:[#allocation3 + $0x18] sm:$0x11] %v4308_v5  ;;  %v8629_v48 = vpop.permute.xlu1 %3493  ;;  %vm9881_vm14 = vcmask 1043456  }
 0x133   : > { %v2033_v40 = vsel %vm7641_vm10, %v1988_v63, %v2032_v22  ;;  %v2838_v32 = vld [vmem:[#allocation2 + $0x38] sm:$0xff]  ;;  %vm8599_vm5 = vmand %vm9552_vm4, %vm9874_vm2  ;;  %v5402_v46 = vld [vmem:[#allocation3 + $0x8] sm:$0x11] }
 0x134   : > { %2034 = vst [vmem:[#allocation2 + $0x48] sm:$0x44] %v2033_v40  ;;  %v2839_v16 = vld [vmem:[#allocation2 + $0x40] sm:$0xff]  ;;  %v6368_v60 = vcombine.low %v2838_v32, %v8292_v7  ;;  %v6369_v0 = vcombine.high %v2838_v32, %v8292_v7  ;;  %vm9551_vm12 = vmor %vm8599_vm5, %vm9878_vm0  ;;  %v8619_v7 = vpop.permute.xlu0 %2855  ;;  %v5125_v36 = vld [vmem:[#allocation3 + $0x30] sm:$0x88] }
 0x135   : > { %v6370_v26 = vcombine.low %v2839_v16, %v8448_v45  ;;  %v6371_v27 = vcombine.high %v2839_v16, %v8448_v45  ;;  %v4317_v25 = vsel %vm9551_vm12, %v7749_v52, %v4316_v14  ;;  %v9555_v45 = vmov 0.0   ;;  %vm9880_vm15 = vmmov %vm9879_vm3  ;;  %v4572_v16 = vld [vmem:[#allocation3] sm:$0x22] }
 0x136   : > { %3293 = vmatprep.subr.bf16.mxu1 %v6369_v0  ;;  %4318 = vst [vmem:[#allocation3 + $0x20] sm:$0x11] %v4317_v25  ;;  %v4535_v2 = vpop.permute.xlu1 %4534  ;;  %vm9882_vm2 = vmmov %vm9879_vm3  ;;  %vm9886_vm12 = vcmask 891904  }
 0x137   : > { %3336 = vmatprep.subr.bf16.mxu0 %v6371_v27  ;;  %3294 = vmatpush1.bf16.msra.mxu1 %v6368_v60  ;;  %v4546_v41 = vrot.slane %v4535_v2, 4  ;;  %v4850_v60 = vld [vmem:[#allocation3] sm:$0x44] }
 0x138   : > { %3337 = vmatpush1.bf16.msra.mxu0 %v6370_v26  ;;  %v6677_v24 = vld [vmem:[#allocation2 + $0x50] ss:$84 sps:$4 sm:$0xff]   ;;  %v8631_v39 = vpop.permute.xlu0 %3498 }
 0x139   : > { %6464 = vmatprep.subr.bf16.mxu0 %v9555_v45 }
 0x13a   : > { %6382 = vmatmul.mubr.msk.bf16.vlgmr.msra.gmra.mxu1 %vm9879_vm3, %v6727_v21  ;;  %vm9883_vm3 = vmmov %vm9882_vm2  ;;  %v4813_v12 = vpop.permute.xlu1 %4812 }
 0x13b   : > { %v2840_v58 = vld [vmem:[#allocation2 + $0x48] sm:$0xff]  ;;  %6383 = vmatmul.mubr.msk.bf16.vlgmr.msra.gmra.mxu0 %vm9880_vm15, %v6727_v21  ;;  %3397 = vmatprep.mubr.bf16.mxu1 %v9724_v61  ;;  %vm9884_vm15 = vcmask 1031168   ;;  %v4824_v28 = vrot.slane %v4813_v12, 4 }
 0x13c   : > { %v6372_v52 = vcombine.low %v2840_v58, %v8509_v9  ;;  %v6373_v44 = vcombine.high %v2840_v58, %v8509_v9  ;;  %6465 = vmatpush3.bf16.msra.mxu0 %v6677_v24  ;;  %6466 = vmatprep.mubr.msk.bf16.mxu0 %vm9549_vm11, %v9555_v45  ;;  %v4537_v31 = vpop.permute.xlu0 %4536  ;;  %vm9885_vm11 = vmmov %vm9881_vm14 }
 0x13d   : > { %v4547_v4 = vrot.slane %v4537_v31, 4  ;;  %v4460_v56 = vld [vmem:[#allocation3 + $0x20] sm:$0x11] }
 0x13e   : > { %3379 = vmatprep.subr.bf16.mxu1 %v6373_v44  ;;  %v5091_v19 = vpop.permute.xlu1 %5090 }
 0x13f   : > { %3380 = vmatpush1.bf16.msra.mxu1 %v6372_v52  ;;  %v4552_v9 = vsel %vm9881_vm14, %v4546_v41, %v4547_v4  ;;  %v5102_v37 = vrot.slane %v5091_v19, 4  ;;  %vm9887_vm14 = vmmov %vm9885_vm11  ;;  %v5128_v41 = vld [vmem:[#allocation3] sm:$0x88] }
 0x140   : > { %v4553_v33 = vsel %vm9884_vm15, %v4535_v2, %v4552_v9  ;;  %v4815_v57 = vpop.permute.xlu0 %4814  ;;  %v8667_v9 = vld [vmem:[%s9458_s2] sm:$0xff] }
 0x141   : > { %v4570_v49 = vsel %vm7207_vm9, %v4553_v33, %v4569_v10  ;;  %v4825_v43 = vrot.slane %v4815_v57, 4 }
 0x142   : > { %6384 = vmatmul.mubr.msk.bf16.vlgmr.msra.gmra.mxu1 %vm9882_vm2, %v6727_v21  ;;  %4571 = vst [vmem:[#allocation3 + $0x30] sm:$0x22] %v4570_v49  ;;  %v5368_v3 = vpop.permute.xlu1 %5367  ;;  %vm9888_vm2 = vcmask 752640   ;;  %v6387_v49 = vcombine.high %v8667_v9, %v8667_v9 }
 0x143   : > { %6467 = vmatmul.mubr.msk.bf16.vlgmr.msra.gmra.mxu0 %vm9883_vm3, %v6727_v21  ;;  %v4830_v62 = vsel %vm9885_vm11, %v4824_v28, %v4825_v43  ;;  %v5379_v59 = vrot.slane %v5368_v3, 4  ;;  %vm9889_vm11 = vnez %v9585_v42  ;;  %vm9891_vm3 = vcmask 736256  }
 0x144   : > { %v4831_v53 = vsel %vm9886_vm12, %v4813_v12, %v4830_v62  ;;  %v5093_v38 = vpop.permute.xlu0 %5092  ;;  %vm9890_vm12 = vmmov %vm9887_vm14  ;;  %3718 = vmatprep.mubr.bf16.mxu1 %v6387_v49 }
 0x145   : > { %v4848_v47 = vsel %vm7317_vm7, %v4831_v53, %v4847_v51  ;;  %v5103_v34 = vrot.slane %v5093_v38, 4  ;;  %vm9892_vm15 = vmmov %vm9890_vm12 }
 0x146   : > { %4849 = vst [vmem:[#allocation3 + $0x30] sm:$0x44] %v4848_v47  ;;  %v4539_v22 = vpop.permute.xlu1 %4538  ;;  %v4853_v47 = vld [vmem:[#allocation3 + $0x58] sm:$0x44] }
 0x147   : > { %v5108_v6 = vsel %vm9887_vm14, %v5102_v37, %v5103_v34  ;;  %v4548_v5 = vrot.slane %v4539_v22, 4  ;;  %vm9893_vm14 = vmmov %vm9890_vm12  ;;  %v4575_v37 = vld [vmem:[#allocation3 + $0x58] sm:$0x22] }
 0x148   : > { %v5109_v50 = vsel %vm9888_vm2, %v5091_v19, %v5108_v6  ;;  %v5370_v30 = vpop.permute.xlu0 %5369  ;;  %vm9894_vm2 = vcmask 1031168  }
 0x149   : > { %v5126_v11 = vsel %vm9889_vm11, %v5109_v50, %v5125_v36  ;;  %v5380_v13 = vrot.slane %v5370_v30, 4  ;;  %v4554_v0 = vsel %vm9892_vm15, %v4547_v4, %v4548_v5  ;;  %v5405_v4 = vld [vmem:[#allocation3 + $0x38] sm:$0x11] }
 0x14a   : > { %5127 = vst [vmem:[#allocation3 + $0x30] sm:$0x88] %v5126_v11  ;;  %v4555_v27 = vsel %vm9894_vm2, %v4537_v31, %v4554_v0  ;;  %v5095_v25 = vpop.permute.xlu1 %5094  ;;  %vm9899_vm2 = vcmask 736256  }
 0x14b   : > { %v5385_v54 = vsel %vm9890_vm12, %v5379_v59, %v5380_v13  ;;  %vm9895_vm12 = vcmask 891904   ;;  %v4573_v21 = vsel %vm7207_vm9, %v4555_v27, %v4572_v16  ;;  %v5104_v52 = vrot.slane %v5095_v25, 4 }
 0x14c   : > { %v5386_v63 = vsel %vm9891_vm3, %v5368_v3, %v5385_v54  ;;  %v4817_v40 = vpop.permute.xlu0 %4816  ;;  %4574 = vst [vmem:[#allocation3] sm:$0x22] %v4573_v21  ;;  %vm9896_vm3 = vmmov %vm9893_vm14  ;;  %v5131_v54 = vld [vmem:[#allocation3 + $0x58] sm:$0x88] }
 0x14d   : > { %v5403_v14 = vsel %vm6938_vm6, %v5386_v63, %v5402_v46  ;;  %v4826_v32 = vrot.slane %v4817_v40, 4  ;;  %v5110_v10 = vsel %vm9896_vm3, %v5103_v34, %v5104_v52  ;;  %vm9897_vm15 = vmmov %vm9896_vm3 }
 0x14e   : > { %5404 = vst [vmem:[#allocation3 + $0x8] sm:$0x11] %v5403_v14  ;;  %v8670_v33 = vpop.permute.xlu1 %4540 }
 0x14f   : > { %v4832_v26 = vsel %vm9893_vm14, %v4825_v43, %v4826_v32  ;;  %vm9898_vm14 = vcmask 752640   ;;  %v4549_v62 = vrot.slane %v8670_v33, 4 }
 0x150   : > { %v4833_v24 = vsel %vm9895_vm12, %v4815_v57, %v4832_v26  ;;  %v5372_v58 = vpop.permute.xlu0 %5371  ;;  %v5111_v12 = vsel %vm9898_vm14, %v5093_v38, %v5110_v10  ;;  %vm9900_vm12 = vnez %v9613_v55  ;;  %vm9902_vm14 = vcmask 1031168  }
 0x151   : > { %v4851_v44 = vsel %vm7317_vm7, %v4833_v24, %v4850_v60  ;;  %v5381_v2 = vrot.slane %v5372_v58, 4  ;;  %v5129_v51 = vsel %vm9889_vm11, %v5111_v12, %v5128_v41  ;;  %v4556_v34 = vsel %vm9896_vm3, %v4548_v5, %v4549_v62 }
 0x152   : > { %4852 = vst [vmem:[#allocation3] sm:$0x44] %v4851_v44  ;;  %5130 = vst [vmem:[#allocation3] sm:$0x88] %v5129_v51  ;;  %v4557_v6 = vsel %vm9902_vm14, %v4539_v22, %v4556_v34  ;;  %v8692_v3 = vpop.permute.xlu1 %5096  ;;  %v5408_v22 = vld [vmem:[#allocation3 + $0x28] sm:$0x11] }
 0x153   : > { %v5387_v31 = vsel %vm9897_vm15, %v5380_v13, %v5381_v2  ;;  %vm9901_vm15 = vmmov %vm9896_vm3  ;;  %v4576_v59 = vsel %vm7207_vm9, %v4557_v6, %v4575_v37  ;;  %v5105_v11 = vrot.slane %v8692_v3, 4  ;;  %vm9905_vm14 = vcmask 752640  }
 0x154   : > { %v5388_v57 = vsel %vm9899_vm2, %v5370_v30, %v5387_v31  ;;  %v8673_v28 = vpop.permute.xlu0 %4818  ;;  %vm9903_vm2 = vcmask 891904   ;;  %4577 = vst [vmem:[#allocation3 + $0x58] sm:$0x22] %v4576_v59  ;;  %v4998_v59 = vld [vmem:[#allocation3 + $0x30] sm:$0x44] }
 0x155   : > { %v5420_v43 = vld [vmem:[#allocation3 + $0x8] sm:$0xff]  ;;  %v5406_v19 = vsel %vm6938_vm6, %v5388_v57, %v5405_v4  ;;  %v4827_v53 = vrot.slane %v8673_v28, 4  ;;  %v5112_v63 = vsel %vm9896_vm3, %v5104_v52, %v5105_v11 }
 0x156   : > { %v5421_v38 = vsel %vm9900_vm12, 0, %v5420_v43  ;;  %5407 = vst [vmem:[#allocation3 + $0x38] sm:$0x11] %v5406_v19  ;;  %v5113_v5 = vsel %vm9905_vm14, %v5095_v25, %v5112_v63  ;;  %v8710_v14 = vpop.permute.xlu1 %6615  ;;  %v4720_v43 = vld [vmem:[#allocation3 + $0x30] sm:$0x22]  ;;  %vm9908_vm14 = vmmov %vm9896_vm3 }
 0x157   : > { %5422 = vst [vmem:[#allocation3 + $0x8] sm:$0xff] %v5421_v38  ;;  %v4834_v36 = vsel %vm9901_vm15, %v4826_v32, %v4827_v53  ;;  %vm9904_vm15 = vmmov %vm9896_vm3  ;;  %v5132_v0 = vsel %vm9889_vm11, %v5113_v5, %v5131_v54  ;;  %v6618_v26 = vunpack.i.h.bf16 %v8710_v14  ;;  %v6617_v27 = vunpack.i.l.bf16 %v8710_v14 }
 0x158   : > { %v4835_v50 = vsel %vm9903_vm2, %v4817_v40, %v4834_v36  ;;  %v8695_v30 = vpop.permute.xlu0 %5373  ;;  %vm9906_vm2 = vcmask 736256   ;;  %5133 = vst [vmem:[#allocation3 + $0x58] sm:$0x88] %v5132_v0  ;;  %v5276_v0 = vld [vmem:[#allocation3 + $0x30] sm:$0x88] }
 0x159   : > { %v4854_v13 = vsel %vm7317_vm7, %v4835_v50, %v4853_v47  ;;  %v5382_v46 = vrot.slane %v8695_v30, 4  ;;  %v8727_v52 = vrot.slane %v6618_v26, 4  ;;  %v4420_v44 = vrot.slane %v6617_v27, 4  ;;  %v8749_v47 = vld [vmem:[%s9458_s2 + $0x8] sm:$0xff] }
 0x15a   : > { %4855 = vst [vmem:[#allocation3 + $0x58] sm:$0x44] %v4854_v13  ;;  %v8729_v41 = vpop.permute.xlu1 %6625 }
 0x15b   : > { %v5389_v40 = vsel %vm9904_vm15, %v5381_v2, %v5382_v46  ;;  %v4443_v2 = vld [vmem:[#allocation3 + $0x30] sm:$0x11]  ;;  %v4426_v12 = vsel %vm9896_vm3, %v4420_v44, %v8727_v52  ;;  %v6628_v57 = vunpack.i.h.bf16 %v8729_v41  ;;  %v6627_v49 = vunpack.i.l.bf16 %v8729_v41  ;;  %v4578_v44 = vld [vmem:[#allocation3 + $0x18] sm:$0x22] }
 0x15c   : > { %v5390_v32 = vsel %vm9906_vm2, %v5372_v58, %v5389_v40  ;;  %v8713_v16 = vpop.permute.xlu0 %6620  ;;  %vm9907_vm15 = vcmask 1039360   ;;  %vm9909_vm2 = vcmask 900096  }
 0x15d   : > { %v5423_v60 = vld [vmem:[#allocation3 + $0x38] sm:$0xff]  ;;  %v5409_v24 = vsel %vm6938_vm6, %v5390_v32, %v5408_v22  ;;  %v6623_v58 = vunpack.i.h.bf16 %v8713_v16  ;;  %v6622_v21 = vunpack.i.l.bf16 %v8713_v16  ;;  %v4427_v19 = vsel %vm9907_vm15, %v6617_v27, %v4426_v12 }
 0x15e   : > { %v5424_v25 = vsel %vm9900_vm12, 0, %v5423_v60  ;;  %5410 = vst [vmem:[#allocation3 + $0x28] sm:$0x11] %v5409_v24  ;;  %v4444_v34 = vsel %vm7589_vm8, %v4427_v19, %v4443_v2  ;;  %v8755_v36 = vrot.slane %v6628_v57, 4  ;;  %v4975_v6 = vrot.slane %v6627_v49, 4  ;;  %v8760_v54 = vpop.permute.xlu1 %4542 }
 0x15f   : > { %5425 = vst [vmem:[#allocation3 + $0x38] sm:$0xff] %v5424_v25  ;;  %v8733_v4 = vrot.slane %v6623_v58, 4  ;;  %v4697_v10 = vrot.slane %v6622_v21, 4  ;;  %4445 = vst [vmem:[#allocation3 + $0x30] sm:$0x11] %v4444_v34  ;;  %v4550_v60 = vrot.slane %v8760_v54, 4  ;;  %v6389_v24 = vcombine.high %v8749_v47, %v8749_v47 }
 0x160   : > { %v8735_v31 = vpop.permute.xlu0 %6630  ;;  %v4981_v32 = vsel %vm9896_vm3, %v4975_v6, %v8755_v36  ;;  %vm9910_vm15 = vcmask 883712  }
 0x161   : > { %v6633_v51 = vunpack.i.h.bf16 %v8735_v31  ;;  %v4703_v38 = vsel %vm9908_vm14, %v4697_v10, %v8733_v4  ;;  %v6632_v37 = vunpack.i.l.bf16 %v8735_v31  ;;  %vm9911_vm14 = vmmov %vm9896_vm3  ;;  %v4856_v10 = vld [vmem:[#allocation3 + $0x18] sm:$0x44]  ;;  %3758 = vmatprep.mubr.bf16.mxu0 %v6389_v24  ;;  %v5137_v31 = vld [vmem:[#allocation3 + $0x50] sm:$0x88] }
 0x162   : > { %v4704_v50 = vsel %vm9909_vm2, %v6622_v21, %v4703_v38  ;;  %v4982_v21 = vsel %vm9910_vm15, %v6627_v49, %v4981_v32  ;;  %vm9912_vm2 = vmmov %vm9896_vm3  ;;  %vm9913_vm3 = vcmask 744448   ;;  %v8796_v6 = vpop.permute.xlu1 %5098 }
 0x163   : > { %v4721_v13 = vsel %vm7487_vm1, %v4704_v50, %v4720_v43  ;;  %v8764_v22 = vrot.slane %v6633_v51, 4  ;;  %v5253_v63 = vrot.slane %v6632_v37, 4  ;;  %v4999_v12 = vsel %vm7641_vm10, %v4982_v21, %v4998_v59  ;;  %vm9914_vm15 = vmmov %vm9912_vm2 }
 0x164   : > { %v8766_v40 = vpop.permute.xlu0 %4820  ;;  %4722 = vst [vmem:[#allocation3 + $0x30] sm:$0x22] %v4721_v13  ;;  %v4558_v43 = vsel %vm9912_vm2, %v4549_v62, %v4550_v60  ;;  %5000 = vst [vmem:[#allocation3 + $0x30] sm:$0x44] %v4999_v12  ;;  %vm9916_vm2 = vcmask 891904  }
 0x165   : > { %v5426_v5 = vld [vmem:[#allocation3 + $0x28] sm:$0xff]  ;;  %v4828_v27 = vrot.slane %v8766_v40, 4  ;;  %v5259_v2 = vsel %vm9911_vm14, %v5253_v63, %v8764_v22  ;;  %vm9915_vm14 = vcmask 1031168   ;;  %v5134_v13 = vld [vmem:[#allocation3 + $0x18] sm:$0x88] }
 0x166   : > { %v5427_v25 = vsel %vm9900_vm12, 0, %v5426_v5  ;;  %v5260_v19 = vsel %vm9913_vm3, %v6632_v37, %v5259_v2  ;;  %v4559_v38 = vsel %vm9915_vm14, %v8670_v33, %v4558_v43  ;;  %v5411_v63 = vld [vmem:[#allocation3 + $0x48] sm:$0x11]  ;;  %vm9917_vm3 = vmmov %vm9914_vm15  ;;  %vm9919_vm14 = vcmask 752640  }
 0x167   : > { %5428 = vst [vmem:[#allocation3 + $0x28] sm:$0xff] %v5427_v25  ;;  %v4836_v49 = vsel %vm9914_vm15, %v4827_v53, %v4828_v27  ;;  %v5277_v34 = vsel %vm7623_vm13, %v5260_v19, %v5276_v0  ;;  %v4579_v50 = vsel %vm7207_vm9, %v4559_v38, %v4578_v44  ;;  %v5106_v53 = vrot.slane %v8796_v6, 4  ;;  %vm9918_vm15 = vmmov %vm9917_vm3  ;;  %v8820_v0 = vpop.permute.xlu1 %6635 }
 0x168   : > { %v4837_v62 = vsel %vm9916_vm2, %v8673_v28, %v4836_v49  ;;  %v8800_v37 = vpop.permute.xlu0 %5375  ;;  %5278 = vst [vmem:[#allocation3 + $0x30] sm:$0x88] %v5277_v34  ;;  %4580 = vst [vmem:[#allocation3 + $0x18] sm:$0x22] %v4579_v50  ;;  %vm9920_vm2 = vcmask 736256   ;;  %v6637_v44 = vunpack.i.l.bf16 %v8820_v0 }
 0x169   : > { %v4857_v59 = vsel %vm7317_vm7, %v4837_v62, %v4856_v10  ;;  %v5383_v33 = vrot.slane %v8800_v37, 4  ;;  %v5114_v28 = vsel %vm9917_vm3, %v5105_v11, %v5106_v53  ;;  %v6638_v11 = vunpack.i.h.bf16 %v8820_v0  ;;  %v4449_v10 = vld [vmem:[#allocation3 + $0x58] sm:$0x11] }
 0x16a   : > { %4858 = vst [vmem:[#allocation3 + $0x18] sm:$0x44] %v4857_v59  ;;  %v5115_v32 = vsel %vm9919_vm14, %v8692_v3, %v5114_v28  ;;  %v4422_v43 = vrot.slane %v6637_v44, 4  ;;  %vm9926_vm14 = vsmask.f32 5376 }
 0x16b   : > { %v5391_v5 = vsel %vm9918_vm15, %v5382_v46, %v5383_v33  ;;  %v5135_v21 = vsel %vm9889_vm11, %v5115_v32, %v5134_v13  ;;  %v8836_v12 = vrot.slane %v6638_v11, 4  ;;  %v8838_v19 = vpop.permute.xlu1 %6645  ;;  %v4726_v32 = vld [vmem:[#allocation3 + $0x58] sm:$0x22] }
 0x16c   : > { %v5392_v24 = vsel %vm9920_vm2, %v8695_v30, %v5391_v5  ;;  %v8824_v25 = vpop.permute.xlu0 %6640  ;;  %5136 = vst [vmem:[#allocation3 + $0x18] sm:$0x88] %v5135_v21  ;;  %v4446_v30 = vld [vmem:[#allocation3] sm:$0x11]  ;;  %vm9921_vm2 = vmmov %vm9917_vm3  ;;  %v6648_v59 = vunpack.i.h.bf16 %v8838_v19  ;;  %v6647_v13 = vunpack.i.l.bf16 %v8838_v19  ;;  %vm9923_vm3 = vcmask 1039360  }
 0x16d   : > { %v5412_v46 = vsel %vm6938_vm6, %v5392_v24, %v5411_v63  ;;  %v6643_v3 = vunpack.i.h.bf16 %v8824_v25  ;;  %v6642_v2 = vunpack.i.l.bf16 %v8824_v25  ;;  %v4428_v62 = vsel %vm9921_vm2, %v8727_v52, %v4422_v43  ;;  %vm9922_vm4 = vmmov %vm9921_vm2  ;;  %v4723_v5 = vld [vmem:[#allocation3] sm:$0x22] }
 0x16e   : > { %5413 = vst [vmem:[#allocation3 + $0x48] sm:$0x11] %v5412_v46  ;;  %v4430_v50 = vsel %vm9922_vm4, %v4422_v43, %v8836_v12  ;;  %v4429_v63 = vsel %vm9923_vm3, %v6618_v26, %v4428_v62  ;;  %vm9924_vm6 = vmmov %vm9923_vm3  ;;  %vm9927_vm4 = vcmask 259077   ;;  %v5001_v46 = vld [vmem:[#allocation3] sm:$0x44] }
 0x16f   : > { %v8842_v49 = vrot.slane %v6643_v3, 4  ;;  %v4699_v38 = vrot.slane %v6642_v2, 4  ;;  %v4431_v28 = vsel %vm9924_vm6, %v6637_v44, %v4430_v50  ;;  %vm9925_vm15 = vmmov %vm9921_vm2  ;;  %v4447_v14 = vsel %vm7589_vm8, %v4429_v63, %v4446_v30  ;;  %v5004_v43 = vld [vmem:[#allocation3 + $0x58] sm:$0x44]  ;;  %v4545_v50 = vpop.permute.xlu1 %4544 }
 0x170   : > { %v8844_v34 = vpop.permute.xlu0 %6650  ;;  %vm8862_vm0 = vmand %vm9927_vm4, %vm9926_vm14  ;;  %v4450_v26 = vsel %vm7589_vm8, %v4431_v28, %v4449_v10  ;;  %v8872_v44 = vrot.slane %v6648_v59, 4  ;;  %4448 = vst [vmem:[#allocation3] sm:$0x11] %v4447_v14  ;;  %vm9930_vm6 = vcmask 900096  }
 0x171   : > { %v4705_v24 = vsel %vm9925_vm15, %v8733_v4, %v4699_v38  ;;  %v4707_v52 = vsel %vm9921_vm2, %v4699_v38, %v8842_v49  ;;  %v4977_v4 = vrot.slane %v6647_v13, 4  ;;  %4451 = vst [vmem:[#allocation3 + $0x58] sm:$0x11] %v4450_v26  ;;  %vm9931_vm3 = vmmov %vm9930_vm6  ;;  %v6653_v30 = vunpack.i.h.bf16 %v8844_v34 }
 0x172   : > { %v4706_v38 = vsel %vm9930_vm6, %v6623_v58, %v4705_v24  ;;  %v4708_v62 = vsel %vm9931_vm3, %v6642_v2, %v4707_v52  ;;  %v6652_v10 = vunpack.i.l.bf16 %v8844_v34  ;;  %vm9932_vm15 = vmmov %vm9921_vm2  ;;  %v9934_v2 = vld [vmem:[#allocation6_spill] sm:$0xff]  ;;  %vm9936_vm6 = vcmask 883712   ;;  %v10014_v34 = vld [vmem:[#allocation11_spill] sm:$0xff] }
 0x173   : > { %v4983_v45 = vsel %vm9932_vm15, %v8755_v36, %v4977_v4  ;;  %vm9933_vm14 = vmmov %vm9921_vm2  ;;  %v4724_v16 = vsel %vm7487_vm1, %v4706_v38, %v4723_v5  ;;  %v4727_v58 = vsel %vm7487_vm1, %v4708_v62, %v4726_v32  ;;  %vm9935_vm2 = vnez %v9934_v2  ;;  %v4587_v5 = vld [vmem:[#allocation3 + $0x20] sm:$0x22]  ;;  %v5279_v62 = vld [vmem:[#allocation3] sm:$0x88] }
 0x174   : > { %v4823_v63 = vpop.permute.xlu0 %4822  ;;  %v4985_v14 = vsel %vm9933_vm14, %v4977_v4, %v8872_v44  ;;  %v4984_v36 = vsel %vm9936_vm6, %v6628_v57, %v4983_v45  ;;  %vm9937_vm3 = vmmov %vm9936_vm6  ;;  %4725 = vst [vmem:[#allocation3] sm:$0x22] %v4724_v16  ;;  %v4551_v26 = vrot.slane %v4545_v50, 4  ;;  %vm9938_vm15 = vsmask.f32 6400 }
 0x175   : > { %v5429_v28 = vld [vmem:[#allocation3 + $0x48] sm:$0xff]  ;;  %v4986_v52 = vsel %vm9937_vm3, %v6647_v13, %v4985_v14  ;;  %4728 = vst [vmem:[#allocation3 + $0x58] sm:$0x22] %v4727_v58  ;;  %vm9939_vm14 = vcmask 260102   ;;  %v5002_v4 = vsel %vm7641_vm10, %v4984_v36, %v5001_v46  ;;  %v4581_v45 = vld [vmem:[#allocation3 + $0x50] sm:$0x22]  ;;  %v5101_v14 = vpop.permute.xlu1 %5100 }
 0x176   : > { %v5430_v24 = vsel %vm9900_vm12, 0, %v5429_v28  ;;  %vm8900_vm1 = vmand %vm9939_vm14, %vm9938_vm15  ;;  %v5005_v41 = vsel %vm7641_vm10, %v4986_v52, %v5004_v43  ;;  %v8910_v57 = vrot.slane %v6653_v30, 4  ;;  %v5255_v13 = vrot.slane %v6652_v10, 4  ;;  %5003 = vst [vmem:[#allocation3] sm:$0x44] %v5002_v4 }
 0x177   : > { %5431 = vst [vmem:[#allocation3 + $0x48] sm:$0xff] %v5430_v24  ;;  %vm9942_vm6 = vsmask.f32 7424  ;;  %vm9943_vm3 = vcmask 261127   ;;  %5006 = vst [vmem:[#allocation3 + $0x58] sm:$0x44] %v5005_v41 }
 0x178   : > { %vm8914_vm4 = vmand %vm9943_vm3, %vm9942_vm6  ;;  %vm9946_vm15 = vcmask 1043456   ;;  %vm9947_vm14 = vcmask 1031168   ;;  %v5282_v28 = vld [vmem:[#allocation3 + $0x58] sm:$0x88]  ;;  %v4829_v16 = vrot.slane %v4823_v63, 4  ;;  %v5378_v58 = vpop.permute.xlu0 %5377  ;;  %v5107_v4 = vrot.slane %v5101_v14, 4 }
 0x179   : > { %v4560_v46 = vsel %vm9946_vm15, %v4550_v60, %v4551_v26  ;;  %v4562_v43 = vsel %vm9947_vm14, %v4545_v50, %v4551_v26  ;;  %vm9948_vm12 = vmmov %vm9947_vm14  ;;  %v9952_v50 = vld [vmem:[#allocation8_spill] sm:$0xff]  ;;  %v4859_v41 = vld [vmem:[#allocation3 + $0x50] sm:$0x44] }
 0x17a   : > { %v4561_v24 = vsel %vm9948_vm12, %v8760_v54, %v4560_v46  ;;  %vm9949_vm6 = vmor %vm8862_vm0, %vm9935_vm2  ;;  %vm9953_vm14 = vnez %v9952_v50  ;;  %v4865_v26 = vld [vmem:[#allocation3 + $0x20] sm:$0x44]  ;;  %vm9954_vm0 = vcmask 744448   ;;  %v5414_v50 = vld [vmem:[#allocation3 + $0x10] sm:$0x11] }
 0x17b   : > { %v4588_v36 = vsel %vm9949_vm6, %v4562_v43, %v4587_v5  ;;  %vm9950_vm3 = vmmov %vm9946_vm15  ;;  %v4582_v54 = vsel %vm7207_vm9, %v4561_v24, %v4581_v45  ;;  %v5143_v5 = vld [vmem:[#allocation3 + $0x20] sm:$0x88] }
 0x17c   : > { %v5261_v52 = vsel %vm9950_vm3, %v8764_v22, %v5255_v13  ;;  %vm9951_vm15 = vmmov %vm9950_vm3  ;;  %4589 = vst [vmem:[#allocation3 + $0x20] sm:$0x22] %v4588_v36  ;;  %v9956_v22 = vld [vmem:[#allocation7_spill] sm:$0xff]  ;;  %v5417_v36 = vld [vmem:[#allocation3 + $0x40] sm:$0x11] }
 0x17d   : > { %v5263_v60 = vsel %vm9951_vm15, %v5255_v13, %v8910_v57  ;;  %vm4864_vm10 = vmor %vm8900_vm1, %vm9953_vm14  ;;  %v5262_v21 = vsel %vm9954_vm0, %v6633_v51, %v5261_v52  ;;  %vm9957_vm2 = vnez %v9956_v22  ;;  %4583 = vst [vmem:[#allocation3 + $0x50] sm:$0x22] %v4582_v54  ;;  %v5384_v52 = vrot.slane %v5378_v58, 4 }
 0x17e   : > { %vm9955_vm12 = vmmov %vm9954_vm0  ;;  %v5280_v8 = vsel %vm7623_vm13, %v5262_v21, %v5279_v62  ;;  %vm9961_vm0 = vcmask 752640  }
 0x17f   : > { %v5264_v2 = vsel %vm9955_vm12, %v6652_v10, %v5263_v60  ;;  %vm9958_vm9 = vmmov %vm9950_vm3  ;;  %vm9959_vm3 = vcmask 891904   ;;  %5281 = vst [vmem:[#allocation3] sm:$0x88] %v5280_v8  ;;  %v5118_v46 = vsel %vm9961_vm0, %v5101_v14, %v5107_v4  ;;  %v9969_v60 = vld [vmem:[#allocation12_spill] sm:$0xff] }
 0x180   : > { %v5283_v45 = vsel %vm7623_vm13, %v5264_v2, %v5282_v28  ;;  %v4838_v51 = vsel %vm9958_vm9, %v4828_v27, %v4829_v16  ;;  %v4840_v10 = vsel %vm9959_vm3, %v4823_v63, %v4829_v16  ;;  %vm9960_vm15 = vmmov %vm9958_vm9  ;;  %v6656_v27 = vpop.permute.xlu1 %6655  ;;  %vm9963_vm9 = vsmask.f32 7954  ;;  %v8972_v28 = vpop.permute.xlu0 %4693 }
 0x181   : > { %5284 = vst [vmem:[#allocation3 + $0x58] sm:$0x88] %v5283_v45  ;;  %v5116_v13 = vsel %vm9960_vm15, %v5106_v53, %v5107_v4  ;;  %vm9962_vm12 = vmmov %vm9959_vm3  ;;  %v4866_v62 = vsel %vm4864_vm10, %v4840_v10, %v4865_v26  ;;  %vm9964_vm3 = vcmask 258052   ;;  %v6658_v14 = vunpack.i.h.bf16 %v6656_v27  ;;  %v4455_v26 = vld [vmem:[#allocation3 + $0x50] sm:$0x11] }
 0x182   : > { %v4839_v43 = vsel %vm9962_vm12, %v8766_v40, %v4838_v51  ;;  %vm8968_vm6 = vmand %vm9964_vm3, %vm9963_vm9  ;;  %4867 = vst [vmem:[#allocation3 + $0x20] sm:$0x44] %v4866_v62  ;;  %v6657_v24 = vunpack.i.l.bf16 %v6656_v27  ;;  %vm9970_vm1 = vnez %v9969_v60  ;;  %v4452_v4 = vld [vmem:[#allocation3 + $0x18] sm:$0x11]  ;;  %vm9976_vm9 = vnez %v9877_v20  ;;  %v4729_v45 = vld [vmem:[#allocation3 + $0x18] sm:$0x22] }
 0x183   : > { %vm9967_vm15 = vmmov %vm9961_vm0  ;;  %v4860_v32 = vsel %vm7317_vm7, %v4839_v43, %v4859_v41  ;;  %v4425_v38 = vrot.slane %v6658_v14, 4  ;;  %vm5435_vm7 = vcmask 261124   ;;  %v5007_v51 = vld [vmem:[#allocation3 + $0x18] sm:$0x44]  ;;  %v9993_v27 = vld [vmem:[#allocation10_spill] sm:$0xff] }
 0x184   : > { %v5117_v53 = vsel %vm9967_vm15, %v8796_v6, %v5116_v13  ;;  %vm9968_vm0 = vmor %vm8914_vm4, %vm9957_vm2  ;;  %4861 = vst [vmem:[#allocation3 + $0x50] sm:$0x44] %v4860_v32  ;;  %v4701_v6 = vrot.slane %v8972_v28, 4  ;;  %v4424_v42 = vrot.slane %v6657_v24, 4  ;;  %vm9972_vm4 = vcmask 736256   ;;  %v8994_v2 = vpop.permute.xlu1 %4971 }
 0x185   : > { %v5144_v40 = vsel %vm9968_vm0, %v5118_v46, %v5143_v5  ;;  %v5138_v16 = vsel %vm9889_vm11, %v5117_v53, %v5137_v31  ;;  %vm4459_vm10 = vmor %vm8968_vm6, %vm9970_vm1  ;;  %vm9971_vm11 = vcmask 1043456   ;;  %v5395_v21 = vsel %vm9972_vm4, %v5378_v58, %v5384_v52  ;;  %v8998_v5 = vpop.permute.xlu0 %5249  ;;  %v4737_v23 = vld [vmem:[#allocation3 + $0x20] sm:$0x22]  ;;  %v4732_v53 = vld [vmem:[#allocation3 + $0x50] sm:$0x22] }
 0x186   : > { %5145 = vst [vmem:[#allocation3 + $0x20] sm:$0x88] %v5144_v40  ;;  %5139 = vst [vmem:[#allocation3 + $0x50] sm:$0x88] %v5138_v16  ;;  %v5393_v54 = vsel %vm9971_vm11, %v5383_v33, %v5384_v52  ;;  %vm9974_vm2 = vcmask 1039360   ;;  %v4979_v58 = vrot.slane %v8994_v2, 4 }
 0x187   : > { %vm9973_vm14 = vmmov %vm9971_vm11  ;;  %v4436_v41 = vsel %vm9974_vm2, %v6658_v14, %v4425_v38  ;;  %vm9978_vm15 = vsmask.f32 7958  ;;  %vm9979_vm0 = vcmask 259077   ;;  %vm9990_vm1 = vcmask 900096   ;;  %v5285_v40 = vld [vmem:[#allocation3 + $0x18] sm:$0x88] }
 0x188   : > { %v4709_v22 = vsel %vm9973_vm14, %v8842_v49, %v4701_v6  ;;  %vm9975_vm12 = vmmov %vm9972_vm4  ;;  %v4461_v35 = vsel %vm4459_vm10, %v4436_v41, %v4460_v56  ;;  %vm9991_vm10 = vcmask 883712   ;;  %v4696_v25 = vpop.permute.xlu1 %4695  ;;  %v5257_v19 = vrot.slane %v8998_v5, 4  ;;  %v10004_v16 = vld [vmem:[#allocation9_spill] sm:$0xff] }
 0x189   : > { %v5394_v8 = vsel %vm9975_vm12, %v8800_v37, %v5393_v54  ;;  %vm9977_vm3 = vmor %vm8599_vm5, %vm9976_vm9  ;;  %vm9984_vm5 = vnez %v9566_v17  ;;  %4462 = vst [vmem:[#allocation3 + $0x20] sm:$0x11] %v4461_v35  ;;  %vm9986_vm9 = vsmask.f32 7954  ;;  %v4710_v46 = vsel %vm9990_vm1, %v6643_v3, %v4709_v22  ;;  %v4974_v63 = vpop.permute.xlu0 %4973 }
 0x18a   : > { %v5418_v33 = vsel %vm9977_vm3, %v5395_v21, %v5417_v36  ;;  %vm9011_vm11 = vmand %vm9979_vm0, %vm9978_vm15  ;;  %v5415_v20 = vsel %vm9984_vm5, %v5394_v8, %v5414_v50  ;;  %vm9994_vm15 = vnez %v9993_v27  ;;  %v4980_v14 = vrot.slane %v4974_v63, 4 }
 0x18b   : > { %vm9982_vm4 = vmmov %vm9973_vm14  ;;  %5419 = vst [vmem:[#allocation3 + $0x40] sm:$0x11] %v5418_v33 }
 0x18c   : > { %v4432_v31 = vsel %vm9982_vm4, %v8836_v12, %v4424_v42  ;;  %vm9983_vm14 = vmmov %vm9982_vm4  ;;  %5416 = vst [vmem:[#allocation3 + $0x10] sm:$0x11] %v5415_v20 }
 0x18d   : > { %v4434_v37 = vsel %vm9983_vm14, %v4424_v42, %v4425_v38  ;;  %v4433_v10 = vsel %vm9974_vm2, %v6638_v11, %v4432_v31  ;;  %vm9985_vm12 = vmmov %vm9974_vm2  ;;  %vm9997_vm14 = vcmask 260102   ;;  %vm10000_vm2 = vsmask.f32 7966  ;;  %v5010_v38 = vld [vmem:[#allocation3 + $0x50] sm:$0x44] }
 0x18e   : > { %v4435_v13 = vsel %vm9985_vm12, %v6657_v24, %v4434_v37  ;;  %vm9031_vm3 = vmand %vm5435_vm7, %vm9986_vm9  ;;  %v4453_v0 = vsel %vm7589_vm8, %v4433_v10, %v4452_v4  ;;  %vm9992_vm7 = vnez %v9632_v15  ;;  %vm10001_vm12 = vcmask 261127   ;;  %v5288_v8 = vld [vmem:[#allocation3 + $0x50] sm:$0x88] }
 0x18f   : > { %vm9989_vm6 = vmmov %vm9982_vm4  ;;  %v4456_v11 = vsel %vm7589_vm8, %v4435_v13, %v4455_v26  ;;  %v4730_v62 = vsel %vm9992_vm7, %v4710_v46, %v4729_v45  ;;  %4454 = vst [vmem:[#allocation3 + $0x18] sm:$0x11] %v4453_v0  ;;  %vm9995_vm4 = vnez %v9676_v1  ;;  %vm9996_vm8 = vsmask.f32 7962  ;;  %v10012_v26 = vld [vmem:[#allocation13_spill] sm:$0xff] }
 0x190   : > { %v4987_v17 = vsel %vm9989_vm6, %v8872_v44, %v4979_v58  ;;  %4457 = vst [vmem:[#allocation3 + $0x50] sm:$0x11] %v4456_v11  ;;  %4731 = vst [vmem:[#allocation3 + $0x18] sm:$0x22] %v4730_v62  ;;  %v4702_v44 = vrot.slane %v4696_v25, 4  ;;  %vm10005_vm6 = vnez %v10004_v16 }
 0x191   : > { %v4988_v43 = vsel %vm9991_vm10, %v6648_v59, %v4987_v17  ;;  %vm9058_vm5 = vmand %vm9997_vm14, %vm9996_vm8  ;;  %vm10006_vm10 = vcmask 1043456   ;;  %vm10007_vm8 = vcmask 900096  }
 0x192   : > { %v5008_v3 = vsel %vm9995_vm4, %v4988_v43, %v5007_v51  ;;  %vm9064_vm9 = vmand %vm10001_vm12, %vm10000_vm2  ;;  %v4711_v24 = vsel %vm10006_vm10, %v4701_v6, %v4702_v44  ;;  %v4713_v36 = vsel %vm10007_vm8, %v4696_v25, %v4702_v44  ;;  %vm10011_vm12 = vcmask 744448   ;;  %v5252_v6 = vpop.permute.xlu1 %5251 }
 0x193   : > { %5009 = vst [vmem:[#allocation3 + $0x18] sm:$0x44] %v5008_v3  ;;  %vm5437_vm1 = vmor %vm9031_vm3, %vm10005_vm6  ;;  %v5258_v22 = vrot.slane %v5252_v6, 4  ;;  %v5432_v41 = vld [vmem:[#allocation3 + $0x10] sm:$0xff] }
 0x194   : > { %vm10008_vm14 = vmmov %vm10006_vm10  ;;  %vm10013_vm10 = vnez %v10012_v26 }
 0x195   : > { %v5265_v52 = vsel %vm10008_vm14, %v8910_v57, %v5257_v19  ;;  %vm10009_vm0 = vmmov %vm10007_vm8  ;;  %v5015_v57 = vld [vmem:[#allocation3 + $0x20] sm:$0x44]  ;;  %v4989_v42 = vsel %vm10008_vm14, %v4979_v58, %v4980_v14  ;;  %v3012_v35 = vpop.f32.mrf.mxu0 }
 0x196   : > { %v4712_v60 = vsel %vm10009_vm0, %v8972_v28, %v4711_v24  ;;  %vm10010_vm2 = vmor %vm9011_vm11, %vm9994_vm15  ;;  %v5266_v50 = vsel %vm10011_vm12, %v6653_v30, %v5265_v52  ;;  %v5438_v28 = vld [vmem:[#allocation3 + $0x40] sm:$0xff]  ;;  %vm10015_vm11 = vnez %v10014_v34  ;;  %vm10016_vm0 = vcmask 883712  }
 0x197   : > { %v4738_v56 = vsel %vm10010_vm2, %v4713_v36, %v4737_v23  ;;  %vm5014_vm8 = vmor %vm9058_vm5, %vm10013_vm10  ;;  %v4733_v54 = vsel %vm9992_vm7, %v4712_v60, %v4732_v53  ;;  %v5286_v21 = vsel %vm7623_vm13, %v5266_v50, %v5285_v40  ;;  %v5293_v30 = vld [vmem:[#allocation3 + $0x20] sm:$0x88]  ;;  %v4990_v4 = vsel %vm10016_vm0, %v8994_v2, %v4989_v42  ;;  %v3014_v51 = vpop.f32.mrf.mxu0 }
 0x198   : > { %4739 = vst [vmem:[#allocation3 + $0x20] sm:$0x22] %v4738_v56  ;;  %vm5292_vm15 = vmor %vm9064_vm9, %vm10015_vm11  ;;  %v9106_v15 = vsel %vm5437_vm1, 0, %v5438_v28  ;;  %v5011_v58 = vsel %vm9995_vm4, %v4990_v4, %v5010_v38  ;;  %vm10018_vm2 = vnez %v9613_v55  ;;  %v3013_v20 = vadd.f32 %v3012_v35, %v8619_v7 }
 0x199   : > { %4734 = vst [vmem:[#allocation3 + $0x50] sm:$0x22] %v4733_v54  ;;  %5287 = vst [vmem:[#allocation3 + $0x18] sm:$0x88] %v5286_v21  ;;  %v9113_v45 = vsel %vm10018_vm2, 0, %v5432_v41  ;;  %v3015_v10 = vadd.f32 %v3014_v51, %v8619_v7  ;;  %v3016_v13 = vpop.f32.mrf.mxu0  ;;  %v6386_v24 = vcombine.low %v8667_v9, %v8667_v9  ;;  %v9172_v51 = vld [vmem:[%s9458_s2 + $0x20] sm:$0xff] }
 0x19a   : > { %vm10017_vm7 = vmmov %vm10016_vm0  ;;  %5440 = vst [vmem:[#allocation3 + $0x40] sm:$0xff] %v9106_v15  ;;  %vm3449_vm4 = vcmp.gt.f32.partialorder %v3013_v20, 0.0  ;;  %v3017_v17 = vadd.f32 %v3016_v13, %v8617_v29 }
 0x19b   : > { %v4991_v33 = vsel %vm10017_vm7, %v4974_v63, %v4980_v14  ;;  %vm10019_vm12 = vmmov %vm10008_vm14  ;;  %vm10020_vm14 = vcmask 744448   ;;  %5012 = vst [vmem:[#allocation3 + $0x50] sm:$0x44] %v5011_v58  ;;  %v3502_v12 = vmul.f32 %v8629_v48, %v3015_v10  ;;  %vm3450_vm5 = vcmp.gt.f32.partialorder %v3015_v10, 0.0  ;;  %v3018_v46 = vpop.f32.mrf.mxu0  ;;  %v521_v63 = vld [vmem:[%s9458_s2 + $0x10] sm:$0xff] }
 0x19c   : > { %v5267_v2 = vsel %vm10019_vm12, %v5257_v19, %v5258_v22  ;;  %v5269_v49 = vsel %vm10020_vm14, %v5252_v6, %v5258_v22  ;;  %v5016_v31 = vsel %vm5014_vm8, %v4991_v33, %v5015_v57  ;;  %5434 = vst [vmem:[#allocation3 + $0x10] sm:$0xff] %v9113_v45  ;;  %vm10021_vm3 = vmmov %vm10020_vm14  ;;  %vm3470_vm9 = vcmp.gt.f32.partialorder %v3017_v17, 0.0 }
 0x19d   : > { %v5268_v55 = vsel %vm10021_vm3, %v8998_v5, %v5267_v2  ;;  %v5294_v1 = vsel %vm5292_vm15, %v5269_v49, %v5293_v30  ;;  %5017 = vst [vmem:[#allocation3 + $0x20] sm:$0x44] %v5016_v31  ;;  %v3501_v5 = vmul.f32 %v8629_v48, %v3013_v20  ;;  %v3522_v18 = vmul.f32 %v8631_v39, %v3017_v17 }
 0x19e   : > { %v5289_v37 = vsel %vm7623_vm13, %v5268_v55, %v5288_v8  ;;  %5295 = vst [vmem:[#allocation3 + $0x20] sm:$0x88] %v5294_v1  ;;  %v3019_v0 = vadd.f32 %v3018_v46, %v8617_v29  ;;  %v3544_v27 = vsel %vm3450_vm5, %v3015_v10, %v3502_v12  ;;  %v6391_v60 = vcombine.high %v521_v63, %v521_v63 }
 0x19f   : > { %5290 = vst [vmem:[#allocation3 + $0x50] sm:$0x88] %v5289_v37  ;;  %v3543_v11 = vsel %vm3449_vm4, %v3013_v20, %v3501_v5  ;;  %v3564_v43 = vsel %vm3470_vm9, %v3017_v17, %v3522_v18  ;;  %v9167_v20 = vld [vmem:[%s9458_s2 + $0x18] sm:$0xff]  ;;  %v6388_v10 = vcombine.low %v8749_v47, %v8749_v47  ;;  %v6390_v5 = vcombine.low %v521_v63, %v521_v63 }
 0x1a0   : > { %vm3471_vm13 = vcmp.gt.f32.partialorder %v3019_v0, 0.0  ;;  %v3523_v62 = vmul.f32 %v8631_v39, %v3019_v0  ;;  %v3585_v25 = vpack.c.bf16 %v3564_v43, %v3543_v11  ;;  %v6393_v13 = vcombine.high %v9167_v20, %v9167_v20 }
 0x1a1   : > { %v6395_v12 = vcombine.high %v9172_v51, %v9172_v51 }
 0x1a2   : > { %v3565_v3 = vsel %vm3471_vm13, %v3019_v0, %v3523_v62 }
 0x1a3   : > { %v3586_v23 = vpack.c.bf16 %v3565_v3, %v3544_v27 }
 0x1a5   : > { %3700 = vmatprep.subr.bf16.mxu1 %v3586_v23  ;;  %v3055_v44 = vpop.f32.mrf.mxu1 }
 0x1a6   : > { %3701 = vmatpush1.bf16.xpose.msra.mxu1 %v3585_v25  ;;  %v3056_v19 = vadd.f32 %v3055_v44, %v8619_v7  ;;  %v3098_v59 = vpop.f32.mrf.mxu0 }
 0x1a7   : > { %v3099_v53 = vadd.f32 %v3098_v59, %v8619_v7  ;;  %v3057_v40 = vpop.f32.mrf.mxu1 }
 0x1a8   : > { %vm3451_vm6 = vcmp.gt.f32.partialorder %v3056_v19, 0.0  ;;  %v3503_v32 = vmul.f32 %v8629_v48, %v3056_v19  ;;  %v3058_v14 = vadd.f32 %v3057_v40, %v8619_v7  ;;  %v3100_v16 = vpop.f32.mrf.mxu0 }
 0x1a9   : > { %v3505_v36 = vmul.f32 %v8629_v48, %v3099_v53  ;;  %v3101_v52 = vadd.f32 %v3100_v16, %v8619_v7  ;;  %v3059_v38 = vpop.f32.mrf.mxu1  ;;  %vm3453_vm1 = vcmp.gt.f32.partialorder %v3099_v53, 0.0 }
 0x1aa   : > { %v3504_v56 = vmul.f32 %v8629_v48, %v3058_v14  ;;  %v3060_v50 = vadd.f32 %v3059_v38, %v8617_v29  ;;  %v3102_v6 = vpop.f32.mrf.mxu0  ;;  %v3545_v26 = vsel %vm3451_vm6, %v3056_v19, %v3503_v32  ;;  %vm3452_vm10 = vcmp.gt.f32.partialorder %v3058_v14, 0.0 }
 0x1ab   : > { %v3506_v57 = vmul.f32 %v8629_v48, %v3101_v52  ;;  %v3103_v42 = vadd.f32 %v3102_v6, %v8617_v29  ;;  %v3061_v28 = vpop.f32.mrf.mxu1  ;;  %vm3454_vm8 = vcmp.gt.f32.partialorder %v3101_v52, 0.0  ;;  %v3547_v34 = vsel %vm3453_vm1, %v3099_v53, %v3505_v36 }
 0x1ac   : > { %vm3472_vm11 = vcmp.gt.f32.partialorder %v3060_v50, 0.0  ;;  %v3524_v9 = vmul.f32 %v8631_v39, %v3060_v50  ;;  %v3062_v54 = vadd.f32 %v3061_v28, %v8617_v29  ;;  %v3104_v21 = vpop.f32.mrf.mxu0  ;;  %v3546_v8 = vsel %vm3452_vm10, %v3058_v14, %v3504_v56 }
 0x1ad   : > { %3719 = vmatmul.mubr.bf16.vlgmr.msra.gmra.mxu1 %v6386_v24  ;;  %vm3474_vm15 = vcmp.gt.f32.partialorder %v3103_v42, 0.0  ;;  %v3526_v30 = vmul.f32 %v8631_v39, %v3103_v42  ;;  %v3105_v22 = vadd.f32 %v3104_v21, %v8617_v29  ;;  %v3548_v2 = vsel %vm3454_vm8, %v3101_v52, %v3506_v57 }
 0x1ae   : > { %3798 = vmatprep.mubr.bf16.mxu1 %v6391_v60  ;;  %v3566_v4 = vsel %vm3472_vm11, %v3060_v50, %v3524_v9  ;;  %vm3473_vm0 = vcmp.gt.f32.partialorder %v3062_v54, 0.0  ;;  %v3525_v41 = vmul.f32 %v8631_v39, %v3062_v54 }
 0x1af   : > { %v3568_v33 = vsel %vm3474_vm15, %v3103_v42, %v3526_v30  ;;  %vm3475_vm7 = vcmp.gt.f32.partialorder %v3105_v22, 0.0  ;;  %v3527_v58 = vmul.f32 %v8631_v39, %v3105_v22  ;;  %v3587_v49 = vpack.c.bf16 %v3566_v4, %v3545_v26  ;;  %v9206_v30 = vld [vmem:[%s9458_s2 + $0x30] sm:$0xff] }
 0x1b0   : > { %v3567_v31 = vsel %vm3473_vm0, %v3062_v54, %v3525_v41  ;;  %v3589_v55 = vpack.c.bf16 %v3568_v33, %v3547_v34  ;;  %v9201_v34 = vld [vmem:[%s9458_s2 + $0x28] sm:$0xff]  ;;  %v6394_v4 = vcombine.low %v9172_v51, %v9172_v51 }
 0x1b1   : > { %v3588_v1 = vpack.c.bf16 %v3567_v31, %v3546_v8  ;;  %v3569_v37 = vsel %vm3475_vm7, %v3105_v22, %v3527_v58  ;;  %v6392_v22 = vcombine.low %v9167_v20, %v9167_v20  ;;  %v6397_v41 = vcombine.high %v9201_v34, %v9201_v34 }
 0x1b2   : > { %v3590_v35 = vpack.c.bf16 %v3569_v37, %v3548_v2  ;;  %v6399_v8 = vcombine.high %v9206_v30, %v9206_v30 }
 0x1b3   : > { %3740 = vmatprep.subr.bf16.mxu0 %v3588_v1 }
 0x1b4   : > { %3780 = vmatprep.subr.bf16.mxu1 %v3590_v35  ;;  %3741 = vmatpush1.bf16.xpose.msra.mxu0 %v3587_v49 }
 0x1b5   : > { %3781 = vmatpush1.bf16.xpose.msra.mxu1 %v3589_v55 }
 0x1bb   : > { %3759 = vmatmul.mubr.bf16.vlgmr.msra.gmra.mxu0 %v6388_v10 }
 0x1bc   : > { %3799 = vmatmul.mubr.bf16.vlgmr.msra.gmra.mxu1 %v6390_v5  ;;  %3838 = vmatprep.mubr.bf16.mxu0 %v6393_v13 }
 0x1bd   : > { %3878 = vmatprep.mubr.bf16.mxu1 %v6395_v12 }
 0x1c3   : > { %v3141_v17 = vpop.f32.mrf.mxu1 }
 0x1c4   : > { %v3142_v46 = vadd.f32 %v3141_v17, %v8619_v7 }
 0x1c5   : > { %v3184_v18 = vpop.f32.mrf.mxu0  ;;  %v3143_v11 = vpop.f32.mrf.mxu1 }
 0x1c6   : > { %v3185_v0 = vadd.f32 %v3184_v18, %v8619_v7  ;;  %vm3455_vm2 = vcmp.gt.f32.partialorder %v3142_v46, 0.0  ;;  %v3507_v47 = vmul.f32 %v8629_v48, %v3142_v46  ;;  %v3144_v43 = vadd.f32 %v3143_v11, %v8619_v7 }
 0x1c7   : > { %v3186_v62 = vpop.f32.mrf.mxu0  ;;  %v3145_v3 = vpop.f32.mrf.mxu1 }
 0x1c8   : > { %v3509_v27 = vmul.f32 %v8629_v48, %v3185_v0  ;;  %v3187_v25 = vadd.f32 %v3186_v62, %v8619_v7  ;;  %vm3457_vm12 = vcmp.gt.f32.partialorder %v3185_v0, 0.0  ;;  %v3508_v23 = vmul.f32 %v8629_v48, %v3144_v43 }
 0x1c9   : > { %v3146_v44 = vadd.f32 %v3145_v3, %v8617_v29  ;;  %v3188_v19 = vpop.f32.mrf.mxu0  ;;  %v3549_v59 = vsel %vm3455_vm2, %v3142_v46, %v3507_v47  ;;  %vm3456_vm14 = vcmp.gt.f32.partialorder %v3144_v43, 0.0  ;;  %v3147_v40 = vpop.f32.mrf.mxu1 }
 0x1ca   : > { %v3510_v63 = vmul.f32 %v8629_v48, %v3187_v25  ;;  %v3189_v53 = vadd.f32 %v3188_v19, %v8617_v29  ;;  %vm3458_vm3 = vcmp.gt.f32.partialorder %v3187_v25, 0.0  ;;  %v3148_v14 = vadd.f32 %v3147_v40, %v8617_v29 }
 0x1cb   : > { %vm3476_vm4 = vcmp.gt.f32.partialorder %v3146_v44, 0.0  ;;  %v3528_v32 = vmul.f32 %v8631_v39, %v3146_v44  ;;  %v3190_v16 = vpop.f32.mrf.mxu0  ;;  %v3551_v24 = vsel %vm3457_vm12, %v3185_v0, %v3509_v27  ;;  %v3550_v56 = vsel %vm3456_vm14, %v3144_v43, %v3508_v23 }
 0x1cc   : > { %vm3478_vm5 = vcmp.gt.f32.partialorder %v3189_v53, 0.0  ;;  %v3530_v36 = vmul.f32 %v8631_v39, %v3189_v53  ;;  %v3191_v52 = vadd.f32 %v3190_v16, %v8617_v29  ;;  %vm3477_vm9 = vcmp.gt.f32.partialorder %v3148_v14, 0.0 }
 0x1cd   : > { %v3570_v38 = vsel %vm3476_vm4, %v3146_v44, %v3528_v32  ;;  %v3529_v60 = vmul.f32 %v8631_v39, %v3148_v14  ;;  %v3552_v26 = vsel %vm3458_vm3, %v3187_v25, %v3510_v63 }
 0x1ce   : > { %v3572_v50 = vsel %vm3478_vm5, %v3189_v53, %v3530_v36  ;;  %vm3479_vm13 = vcmp.gt.f32.partialorder %v3191_v52, 0.0  ;;  %v3531_v6 = vmul.f32 %v8631_v39, %v3191_v52  ;;  %v3591_v57 = vpack.c.bf16 %v3570_v38, %v3549_v59  ;;  %v9242_v36 = vld [vmem:[%s9458_s2 + $0x40] sm:$0xff] }
 0x1cf   : > { %v3571_v42 = vsel %vm3477_vm9, %v3148_v14, %v3529_v60  ;;  %v3593_v28 = vpack.c.bf16 %v3572_v50, %v3551_v24  ;;  %v9237_v24 = vld [vmem:[%s9458_s2 + $0x38] sm:$0xff]  ;;  %v6398_v38 = vcombine.low %v9206_v30, %v9206_v30 }
 0x1d0   : > { %v3592_v9 = vpack.c.bf16 %v3571_v42, %v3550_v56  ;;  %v3573_v54 = vsel %vm3479_vm13, %v3191_v52, %v3531_v6  ;;  %v6396_v52 = vcombine.low %v9201_v34, %v9201_v34  ;;  %v6401_v60 = vcombine.high %v9237_v24, %v9237_v24 }
 0x1d1   : > { %v3594_v21 = vpack.c.bf16 %v3573_v54, %v3552_v26  ;;  %v6403_v56 = vcombine.high %v9242_v36, %v9242_v36 }
 0x1d2   : > { %3820 = vmatprep.subr.bf16.mxu0 %v3592_v9 }
 0x1d3   : > { %3860 = vmatprep.subr.bf16.mxu1 %v3594_v21  ;;  %3821 = vmatpush1.bf16.xpose.msra.mxu0 %v3591_v57 }
 0x1d4   : > { %3861 = vmatpush1.bf16.xpose.msra.mxu1 %v3593_v28 }
 0x1da   : > { %3839 = vmatmul.mubr.bf16.vlgmr.msra.gmra.mxu0 %v6392_v22 }
 0x1db   : > { %3879 = vmatmul.mubr.bf16.vlgmr.msra.gmra.mxu1 %v6394_v4  ;;  %3918 = vmatprep.mubr.bf16.mxu0 %v6397_v41 }
 0x1dc   : > { %3958 = vmatprep.mubr.bf16.mxu1 %v6399_v8 }
 0x1de   : > { %v3227_v33 = vpop.f32.mrf.mxu1 }
 0x1df   : > { %v3228_v2 = vadd.f32 %v3227_v33, %v8619_v7 }
 0x1e0   : > { %v3229_v49 = vpop.f32.mrf.mxu1 }
 0x1e1   : > { %v3230_v31 = vadd.f32 %v3229_v49, %v8619_v7  ;;  %vm3459_vm6 = vcmp.gt.f32.partialorder %v3228_v2, 0.0  ;;  %v3511_v10 = vmul.f32 %v8629_v48, %v3228_v2 }
 0x1e2   : > { %v3270_v58 = vpop.f32.mrf.mxu0  ;;  %v3231_v37 = vpop.f32.mrf.mxu1 }
 0x1e3   : > { %v3271_v35 = vadd.f32 %v3270_v58, %v8619_v7  ;;  %v3232_v20 = vadd.f32 %v3231_v37, %v8617_v29  ;;  %vm3460_vm1 = vcmp.gt.f32.partialorder %v3230_v31, 0.0  ;;  %v3512_v12 = vmul.f32 %v8629_v48, %v3230_v31 }
 0x1e4   : > { %v3272_v55 = vpop.f32.mrf.mxu0  ;;  %v3233_v13 = vpop.f32.mrf.mxu1  ;;  %v3553_v19 = vsel %vm3459_vm6, %v3228_v2, %v3511_v10 }
 0x1e5   : > { %v3273_v1 = vadd.f32 %v3272_v55, %v8619_v7  ;;  %vm3480_vm10 = vcmp.gt.f32.partialorder %v3232_v20, 0.0  ;;  %v3532_v17 = vmul.f32 %v8631_v39, %v3232_v20  ;;  %v3234_v46 = vadd.f32 %v3233_v13, %v8617_v29 }
 0x1e6   : > { %v3274_v51 = vpop.f32.mrf.mxu0  ;;  %v3513_v43 = vmul.f32 %v8629_v48, %v3271_v35  ;;  %vm3461_vm0 = vcmp.gt.f32.partialorder %v3271_v35, 0.0  ;;  %v3554_v23 = vsel %vm3460_vm1, %v3230_v31, %v3512_v12 }
 0x1e7   : > { %v3275_v5 = vadd.f32 %v3274_v51, %v8617_v29  ;;  %v3514_v0 = vmul.f32 %v8629_v48, %v3273_v1  ;;  %vm3462_vm11 = vcmp.gt.f32.partialorder %v3273_v1, 0.0  ;;  %vm3481_vm15 = vcmp.gt.f32.partialorder %v3234_v46, 0.0 }
 0x1e8   : > { %v3276_v18 = vpop.f32.mrf.mxu0  ;;  %v3533_v62 = vmul.f32 %v8631_v39, %v3234_v46  ;;  %v3574_v27 = vsel %vm3480_vm10, %v3232_v20, %v3532_v17  ;;  %v3555_v40 = vsel %vm3461_vm0, %v3271_v35, %v3513_v43  ;;  %vm3679_vm0 = vcmask 261120  }
 0x1e9   : > { %vm3482_vm8 = vcmp.gt.f32.partialorder %v3275_v5, 0.0  ;;  %v3534_v11 = vmul.f32 %v8631_v39, %v3275_v5  ;;  %v3277_v47 = vadd.f32 %v3276_v18, %v8617_v29  ;;  %v3556_v63 = vsel %vm3462_vm11, %v3273_v1, %v3514_v0 }
 0x1ea   : > { %v3575_v44 = vsel %vm3481_vm15, %v3234_v46, %v3533_v62  ;;  %v3595_v32 = vpack.c.bf16 %v3574_v27, %v3553_v19 }
 0x1eb   : > { %vm3483_vm7 = vcmp.gt.f32.partialorder %v3277_v47, 0.0  ;;  %v3535_v25 = vmul.f32 %v8631_v39, %v3277_v47  ;;  %v3576_v3 = vsel %vm3482_vm8, %v3275_v5, %v3534_v11  ;;  %v3596_v59 = vpack.c.bf16 %v3575_v44, %v3554_v23 }
 0x1ec   : > { %v3597_v16 = vpack.c.bf16 %v3576_v3, %v3555_v40 }
 0x1ed   : > { %v3577_v53 = vsel %vm3483_vm7, %v3277_v47, %v3535_v25  ;;  %3900 = vmatprep.subr.bf16.mxu0 %v3596_v59  ;;  %vm10023_vm7 = vmmov 0  }
 0x1ee   : > { %v3598_v14 = vpack.c.bf16 %v3577_v53, %v3556_v63  ;;  %3901 = vmatpush1.bf16.xpose.msra.mxu0 %v3595_v32 }
 0x1f0   : > { %3940 = vmatprep.subr.bf16.mxu1 %v3598_v14 }
 0x1f1   : > { %3941 = vmatpush1.bf16.xpose.msra.mxu1 %v3597_v16 }
 0x1f5   : > { %3919 = vmatmul.mubr.bf16.vlgmr.msra.gmra.mxu0 %v6396_v52 }
 0x1f6   : > { %3998 = vmatprep.mubr.bf16.mxu0 %v6401_v60 }
 0x1f8   : > { %3959 = vmatmul.mubr.bf16.vlgmr.msra.gmra.mxu1 %v6398_v38 }
 0x1f9   : > { %4038 = vmatprep.mubr.bf16.mxu1 %v6403_v56  ;;  %v528_v56 = vld [vmem:[%s9458_s2 + $0x48] sm:$0xff] }
 0x1fa   : > { %v3313_v50 = vpop.f32.mrf.mxu1 }
 0x1fb   : > { %v3356_v6 = vpop.f32.mrf.mxu0  ;;  %v3314_v26 = vadd.f32 %v3313_v50, %v8619_v7 }
 0x1fc   : > { %v3315_v57 = vpop.f32.mrf.mxu1  ;;  %v3357_v28 = vadd.f32 %v3356_v6, %v8619_v7 }
 0x1fd   : > { %v3358_v42 = vpop.f32.mrf.mxu0  ;;  %v3316_v9 = vadd.f32 %v3315_v57, %v8619_v7  ;;  %v3515_v34 = vmul.f32 %v8629_v48, %v3314_v26  ;;  %vm3463_vm2 = vcmp.gt.f32.partialorder %v3314_v26, 0.0 }
 0x1fe   : > { %v3317_v54 = vpop.f32.mrf.mxu1  ;;  %v3359_v30 = vadd.f32 %v3358_v42, %v8619_v7  ;;  %vm3465_vm12 = vcmp.gt.f32.partialorder %v3357_v28, 0.0  ;;  %v3517_v37 = vmul.f32 %v8629_v48, %v3357_v28 }
 0x1ff   : > { %v3360_v21 = vpop.f32.mrf.mxu0  ;;  %v3318_v22 = vadd.f32 %v3317_v54, %v8617_v29  ;;  %v3516_v58 = vmul.f32 %v8629_v48, %v3316_v9  ;;  %v3557_v1 = vsel %vm3463_vm2, %v3314_v26, %v3515_v34  ;;  %vm3464_vm3 = vcmp.gt.f32.partialorder %v3316_v9, 0.0 }
 0x200   : > { %v3361_v4 = vadd.f32 %v3360_v21, %v8617_v29  ;;  %v3319_v41 = vpop.f32.mrf.mxu1  ;;  %vm3466_vm4 = vcmp.gt.f32.partialorder %v3359_v30, 0.0  ;;  %v3518_v35 = vmul.f32 %v8629_v48, %v3359_v30  ;;  %v3559_v3 = vsel %vm3465_vm12, %v3357_v28, %v3517_v37 }
 0x201   : > { %v3362_v8 = vpop.f32.mrf.mxu0  ;;  %v3536_v33 = vmul.f32 %v8631_v39, %v3318_v22  ;;  %vm3484_vm14 = vcmp.gt.f32.partialorder %v3318_v22, 0.0  ;;  %v3320_v2 = vadd.f32 %v3319_v41, %v8617_v29  ;;  %v3558_v11 = vsel %vm3464_vm3, %v3316_v9, %v3516_v58  ;;  %v6701_v41 = vld [vmem:[%s9458_s2 + $0x50] ss:$0 sps:$4 sm:$0xff]   ;;  %v6708_v58 = vld [vmem:[#allocation3 + $0x5c] ss:$-48 sps:$4 sm:$0xff]  }
 0x202   : > { %v3363_v49 = vadd.f32 %v3362_v8, %v8617_v29  ;;  %v3399_v31 = vpop.f32.mrf.mxu1  ;;  %v3538_v20 = vmul.f32 %v8631_v39, %v3361_v4  ;;  %vm3486_vm9 = vcmp.gt.f32.partialorder %v3361_v4, 0.0  ;;  %v6400_v26 = vcombine.low %v9237_v24, %v9237_v24  ;;  %v6702_v8 = vld [vmem:[#allocation3 + $0x30] ss:$-40 sps:$4 sm:$0xff]  }
 0x203   : > { %v3442_v55 = vpop.f32.mrf.mxu0  ;;  %vm3485_vm5 = vcmp.gt.f32.partialorder %v3320_v2, 0.0  ;;  %v3537_v51 = vmul.f32 %v8631_v39, %v3320_v2  ;;  %v3578_v13 = vsel %vm3484_vm14, %v3318_v22, %v3536_v33  ;;  %v3400_v17 = vadd.f32 %v3399_v31, %v8619_v7  ;;  %v6704_v22 = vld [vmem:[#allocation3 + $0x34] ss:$-40 sps:$4 sm:$0xff]   ;;  %v536_v33 = vld [vmem:[%s9463_s7] sm:$0xff] }
 0x204   : > { %v3401_v10 = vpop.f32.mrf.mxu1  ;;  %vm3487_vm13 = vcmp.gt.f32.partialorder %v3363_v49, 0.0  ;;  %v3539_v12 = vmul.f32 %v8631_v39, %v3363_v49  ;;  %v3443_v43 = vadd.f32 %v3442_v55, %v8619_v7  ;;  %v3599_v23 = vpack.c.bf16 %v3578_v13, %v3557_v1  ;;  %v9313_v31 = vld [vmem:[%s9465_s9] sm:$0xff]  }
 0x205   : > { %v6468_v5 = vpop.f32.mrf.mxu0  ;;  %v3402_v46 = vadd.f32 %v3401_v10, %v8619_v7  ;;  %v3579_v47 = vsel %vm3485_vm5, %v3320_v2, %v3537_v51  ;;  %v3580_v44 = vsel %vm3486_vm9, %v3361_v4, %v3538_v20  ;;  %v3560_v7 = vsel %vm3466_vm4, %v3359_v30, %v3518_v35  ;;  %v6711_v2 = vld [vmem:[#allocation3 + $0x4] ss:$56 sps:$4 sm:$0xff]   ;;  %v6706_v55 = vld [vmem:[#allocation3 + $0x58] ss:$-48 sps:$4 sm:$0xff]  }
 0x206   : > { %v3403_v18 = vpop.f32.mrf.mxu1  ;;  %v3600_v25 = vpack.c.bf16 %v3579_v47, %v3558_v11  ;;  %v3581_v59 = vsel %vm3487_vm13, %v3363_v49, %v3539_v12  ;;  %v3601_v52 = vpack.c.bf16 %v3580_v44, %v3559_v3  ;;  %v3519_v38 = vmul.f32 %v8629_v48, %v3400_v17  ;;  %v5445_v49 = vld [vmem:[#allocation3 + $0x50] sm:$0xff]  ;;  %v9328_v35 = vld [vmem:[%s9459_s3] sm:$0xff] }
 0x207   : > { %v3445_v0 = vpop.f32.mrf.mxu0  ;;  %v3404_v62 = vadd.f32 %v3403_v18, %v8617_v29  ;;  %v3520_v53 = vmul.f32 %v8629_v48, %v3402_v46  ;;  %v3602_v16 = vpack.c.bf16 %v3581_v59, %v3560_v7  ;;  %v3521_v60 = vmul.f32 %v8629_v48, %v3443_v43 }
 0x208   : > { %v3446_v27 = vadd.f32 %v3445_v0, %v8617_v29  ;;  %v3405_v19 = vpop.f32.mrf.mxu1  ;;  %3980 = vmatprep.subr.bf16.mxu0 %v3600_v25  ;;  %vm3468_vm10 = vcmp.gt.f32.partialorder %v3402_v46, 0.0  ;;  %vm3467_vm8 = vcmp.gt.f32.partialorder %v3400_v17, 0.0  ;;  %vm3469_vm11 = vcmp.gt.f32.partialorder %v3443_v43, 0.0 }
 0x209   : > { %v6469_v63 = vpop.f32.mrf.mxu0  ;;  %v3540_v40 = vmul.f32 %v8631_v39, %v3404_v62  ;;  %vm3488_vm6 = vcmp.gt.f32.partialorder %v3404_v62, 0.0  ;;  %v3406_v14 = vadd.f32 %v3405_v19, %v8617_v29  ;;  %3981 = vmatpush1.bf16.xpose.msra.mxu0 %v3599_v23  ;;  %4020 = vmatprep.subr.bf16.mxu1 %v3602_v16  ;;  %v3562_v57 = vsel %vm3468_vm10, %v3402_v46, %v3520_v53 }
 0x20a   : > { %v3542_v32 = vmul.f32 %v8631_v39, %v3446_v27  ;;  %vm3490_vm1 = vcmp.gt.f32.partialorder %v3446_v27, 0.0  ;;  %4021 = vmatpush1.bf16.xpose.msra.mxu1 %v3601_v52  ;;  %v10022_v48 = vmov 0.0   ;;  %v6405_v28 = vcombine.high %v528_v56, %v528_v56 }
 0x20b   : > { %vm3489_vm15 = vcmp.gt.f32.partialorder %v3406_v14, 0.0  ;;  %v3541_v50 = vmul.f32 %v8631_v39, %v3406_v14  ;;  %v3582_v6 = vsel %vm3488_vm6, %v3404_v62, %v3540_v40  ;;  %6470 = vmatprep.subr.bf16.mxu1 %v10022_v48  ;;  %v3561_v9 = vsel %vm3467_vm8, %v3400_v17, %v3519_v38 }
 0x20c   : > { %v3584_v29 = vsel %vm3490_vm1, %v3446_v27, %v3542_v32  ;;  %v3563_v54 = vsel %vm3469_vm11, %v3443_v43, %v3521_v60  ;;  %v3603_v34 = vpack.c.bf16 %v3582_v6, %v3561_v9  ;;  %v6402_v30 = vcombine.low %v9242_v36, %v9242_v36  ;;  %v537_v36 = vld [vmem:[%s9463_s7 + $0x8] sm:$0xff] }
 0x20d   : > { %v3583_v42 = vsel %vm3489_vm15, %v3406_v14, %v3541_v50  ;;  %v3605_v39 = vpack.c.bf16 %v3584_v29, %v3563_v54  ;;  %v6404_v4 = vcombine.low %v528_v56, %v528_v56  ;;  %v6427_v1 = vcombine.high %v5445_v49, %v9113_v45 }
 0x20e   : > { %v3604_v21 = vpack.c.bf16 %v3583_v42, %v3562_v57  ;;  %vm10024_vm2 = vcmask 130048   ;;  %v6426_v37 = vcombine.low %v5445_v49, %v9113_v45  ;;  %v6437_v20 = vcombine.high %v9328_v35, %v9328_v35 }
 0x20f   : > { %v3684_v24 = vsel %vm3679_vm0, %v3605_v39, 0  ;;  %vm10025_vm12 = vmmov %vm10024_vm2 }
 0x210   : > { %3999 = vmatmul.mubr.bf16.vlgmr.msra.gmra.mxu0 %v6400_v26  ;;  %4060 = vmatprep.subr.bf16.mxu0 %v3604_v21  ;;  %vm10026_vm14 = vmmov %vm10024_vm2 }
 0x211   : > { %4061 = vmatpush1.bf16.xpose.msra.mxu0 %v3603_v34  ;;  %4078 = vmatprep.mubr.bf16.mxu0 %v6405_v28  ;;  %vm10027_vm3 = vmmov %vm10024_vm2 }
 0x212   : > { %6476 = vmatprep.subr.mxu0 %v10022_v48  ;;  %4039 = vmatmul.mubr.bf16.vlgmr.msra.gmra.mxu1 %v6402_v30  ;;  %vm10028_vm4 = vmmov %vm10024_vm2 }
 0x213   : > { %6471 = vmatpush3.bf16.xpose.msra.mxu1 %v3684_v24  ;;  %6472 = vmatprep.mubr.msk.bf16.mxu1 %vm10023_vm7, %v10022_v48  ;;  %vm10029_vm9 = vmmov %vm10024_vm2 }
 0x214   : > { %5545 = vmatprep.subr.bf16.mxu1 %v6704_v22  ;;  %vm10030_vm8 = vmmov %vm10024_vm2 }
 0x218   : > { %4079 = vmatmul.mubr.bf16.vlgmr.msra.gmra.mxu0 %v6404_v4 }
 0x219   : > { %6477 = vmatpush3.msra.mxu0 %v537_v36  ;;  %6480 = vmatprep.mubr.msk.f32.mxu0 %vm10023_vm7, %v10022_v48 }
 0x21a   : > { %6478 = vmatprep.subr.mxu0 %v10022_v48  ;;  %6473 = vmatmul.mubr.msk.bf16.vlgmr.msra.gmra.mxu1 %vm3679_vm0, %v6701_v41 }
 0x21b   : > { %6479 = vmatpush3.msra.mxu0 %v536_v33  ;;  %5546 = vmatpush1.bf16.msra.mxu1 %v6702_v8  ;;  %v6709_v8 = vld [vmem:[#allocation3] ss:$56 sps:$4 sm:$0xff]  }
 0x21c   : > { %5563 = vmatprep.mubr.bf16.mxu1 %v9724_v61  ;;  %5631 = vmatprep.subr.bf16.mxu1 %v6708_v58 }
 0x21d   : > { %5588 = vmatprep.subr.bf16.mxu0 %v6711_v2  ;;  %v6714_v2 = vld [vmem:[#allocation3 + $0x1c] ss:$48 sps:$4 sm:$0xff]  }
 0x222   : > { %6430 = vmatmul.mubr.msk.bf16.vlgmr.msra.gmra.mxu1 %vm10024_vm2, %v9313_v31 }
 0x223   : > { %5632 = vmatpush1.bf16.msra.mxu1 %v6706_v55  ;;  %5649 = vmatprep.mubr.bf16.mxu1 %v9724_v61  ;;  %v5446_v55 = vld [vmem:[#allocation3 + $0x20] sm:$0xff] }
 0x224   : > { %5717 = vmatprep.subr.bf16.mxu1 %v6427_v1 }
 0x22a   : > { %6432 = vmatmul.mubr.msk.bf16.vlgmr.msra.gmra.mxu1 %vm10025_vm12, %v9313_v31 }
 0x22b   : > { %5718 = vmatpush1.bf16.msra.mxu1 %v6426_v37  ;;  %5735 = vmatprep.mubr.bf16.mxu1 %v9724_v61  ;;  %v6712_v37 = vld [vmem:[#allocation3 + $0x18] ss:$48 sps:$4 sm:$0xff]  }
 0x232   : > { %6434 = vmatmul.mubr.msk.bf16.vlgmr.msra.gmra.mxu1 %vm10026_vm14, %v9313_v31 }
 0x233   : > { %5962 = vmatprep.mubr.bf16.mxu1 %v6437_v20  ;;  %v9334_v20 = vpop.permute.xlu0 %5455 }
 0x26d   : > { %v3720_v51 = vpop.f32.mrf.mxu1 }
 0x26f   : > { %v3722_v45 = vpop.f32.mrf.mxu1 }
 0x270   : > { %v9339_v45 = vpop.permute.xlu1 %5460 }
 0x271   : > { %v3723_v10 = vpop.f32.mrf.mxu1 }
 0x273   : > { %v3724_v5 = vpop.f32.mrf.mxu1 }
 0x27b   : > { %v3760_v13 = vpop.f32.mrf.mxu0 }
 0x27c   : > { %v3761_v12 = vadd.f32 %v3760_v13, %v3720_v51  ;;  %v3800_v17 = vpop.f32.mrf.mxu1  ;;  %v6429_v51 = vcombine.high %v5446_v55, %v9106_v15 }
 0x27d   : > { %v3762_v46 = vpop.f32.mrf.mxu0 }
 0x27e   : > { %v3801_v18 = vadd.f32 %v3800_v17, %v3761_v12  ;;  %v3802_v0 = vpop.f32.mrf.mxu1  ;;  %v9344_v46 = vpop.permute.xlu0 %5815 }
 0x27f   : > { %v3763_v11 = vpop.f32.mrf.mxu0  ;;  %v9347_v0 = vpop.permute.xlu1 %5820 }
 0x280   : > { %v3803_v47 = vpop.f32.mrf.mxu1  ;;  %v6428_v11 = vcombine.low %v5446_v55, %v9106_v15 }
 0x281   : > { %v3764_v43 = vpop.f32.mrf.mxu0 }
 0x282   : > { %v3804_v62 = vpop.f32.mrf.mxu1 }
 0x29a   : > { %v3840_v27 = vpop.f32.mrf.mxu0 }
 0x29b   : > { %v3880_v25 = vpop.f32.mrf.mxu1  ;;  %v3841_v60 = vadd.f32 %v3840_v27, %v3801_v18 }
 0x29c   : > { %v3842_v3 = vpop.f32.mrf.mxu0 }
 0x29d   : > { %v3882_v23 = vpop.f32.mrf.mxu1  ;;  %v3881_v56 = vadd.f32 %v3880_v25, %v3841_v60 }
 0x29e   : > { %v3843_v44 = vpop.f32.mrf.mxu0 }
 0x29f   : > { %v3883_v19 = vpop.f32.mrf.mxu1 }
 0x2a0   : > { %v3844_v59 = vpop.f32.mrf.mxu0 }
 0x2a1   : > { %v3884_v63 = vpop.f32.mrf.mxu1 }
 0x2b5   : > { %v3920_v53 = vpop.f32.mrf.mxu0 }
 0x2b6   : > { %v3921_v50 = vadd.f32 %v3920_v53, %v3881_v56 }
 0x2b7   : > { %v3922_v32 = vpop.f32.mrf.mxu0 }
 0x2b8   : > { %v3960_v40 = vpop.f32.mrf.mxu1 }
 0x2b9   : > { %v3923_v14 = vpop.f32.mrf.mxu0  ;;  %v3961_v29 = vadd.f32 %v3960_v40, %v3921_v50 }
 0x2ba   : > { %v3962_v7 = vpop.f32.mrf.mxu1 }
 0x2bb   : > { %v3924_v52 = vpop.f32.mrf.mxu0 }
 0x2bc   : > { %v3963_v16 = vpop.f32.mrf.mxu1 }
 0x2be   : > { %v3964_v38 = vpop.f32.mrf.mxu1 }
 0x2d0   : > { %v4000_v6 = vpop.f32.mrf.mxu0 }
 0x2d1   : > { %v4001_v57 = vadd.f32 %v4000_v6, %v3961_v29  ;;  %v4208_v6 = vld [vmem:[%s9459_s3 + $0x10] sm:$0xff] }
 0x2d2   : > { %v4002_v26 = vpop.f32.mrf.mxu0  ;;  %v4040_v42 = vpop.f32.mrf.mxu1 }
 0x2d3   : > { %v4041_v21 = vadd.f32 %v4040_v42, %v4001_v57  ;;  %v6436_v42 = vcombine.low %v9328_v35, %v9328_v35 }
 0x2d4   : > { %v4003_v28 = vpop.f32.mrf.mxu0  ;;  %v4042_v9 = vpop.f32.mrf.mxu1 }
 0x2d6   : > { %v4004_v54 = vpop.f32.mrf.mxu0  ;;  %v4043_v34 = vpop.f32.mrf.mxu1 }
 0x2d7   : > { %v6441_v54 = vcombine.high %v4208_v6, %v4208_v6 }
 0x2d8   : > { %v4080_v30 = vpop.f32.mrf.mxu0  ;;  %v4044_v39 = vpop.f32.mrf.mxu1 }
 0x2d9   : > { %v4081_v22 = vadd.f32 %v4080_v30, %v4041_v21 }
 0x2da   : > { %v4082_v24 = vpop.f32.mrf.mxu0  ;;  %v4120_v4 = vpop.f32.mrf.mxu1 }
 0x2db   : > { %v4121_v36 = vadd.f32 %v4120_v4, %v4081_v22 }
 0x2dc   : > { %v4083_v41 = vpop.f32.mrf.mxu0  ;;  %v6474_v33 = vpop.f32.mrf.mxu1 }
 0x2dd   : > { %6481 = vmatmul.mubr.msk.f32.vlgmr.msra.gmra.mxu0 %vm10027_vm3, %v4121_v36 }
 0x2de   : > { %v4084_v58 = vpop.f32.mrf.mxu0  ;;  %v4123_v49 = vpop.f32.mrf.mxu1  ;;  %5589 = vmatpush1.bf16.msra.mxu0 %v6709_v8  ;;  %5606 = vmatprep.mubr.bf16.mxu0 %v9724_v61 }
 0x2df   : > { %5674 = vmatprep.subr.bf16.mxu0 %v6714_v2  ;;  %v6440_v2 = vcombine.low %v4208_v6, %v4208_v6 }
 0x2e0   : > { %v6475_v1 = vpop.f32.mrf.mxu1 }
 0x2e1   : > { %6431 = vmatmul.mubr.msk.bf16.vlgmr.msra.gmra.mxu0 %vm10028_vm4, %v9313_v31 }
 0x2e2   : > { %v5565_v10 = vpop.f32.mrf.mxu1  ;;  %5675 = vmatpush1.bf16.msra.mxu0 %v6712_v37  ;;  %5692 = vmatprep.mubr.bf16.mxu0 %v9724_v61 }
 0x2e3   : > { %5760 = vmatprep.subr.bf16.mxu0 %v6429_v51  ;;  %v5566_v12 = vadd.f32 %v5565_v10, %v9334_v20  ;;  %v9385_v10 = vld [vmem:[%s9459_s3 + $0x8] sm:$0xff] }
 0x2e4   : > { %v5567_v5 = vpop.f32.mrf.mxu1 }
 0x2e5   : > { %v5568_v13 = vadd.f32 %v5567_v5, %v9334_v20  ;;  %v5823_v25 = vmul.f32 %v9344_v46, %v5566_v12  ;;  %vm5789_vm6 = vcmp.gt.f32.partialorder %v5566_v12, 0.0  ;;  %v6439_v5 = vcombine.high %v9385_v10, %v9385_v10 }
 0x2e6   : > { %v5569_v17 = vpop.f32.mrf.mxu1 }
 0x2e7   : > { %v5570_v18 = vadd.f32 %v5569_v17, %v9339_v45  ;;  %v5824_v43 = vmul.f32 %v9344_v46, %v5568_v13  ;;  %vm5790_vm13 = vcmp.gt.f32.partialorder %v5568_v13, 0.0  ;;  %v5847_v53 = vsel %vm5789_vm6, %v5566_v12, %v5823_v25 }
 0x2e8   : > { %v5571_v47 = vpop.f32.mrf.mxu1 }
 0x2e9   : > { %vm5801_vm5 = vcmp.gt.f32.partialorder %v5570_v18, 0.0  ;;  %v5835_v62 = vmul.f32 %v9347_v0, %v5570_v18  ;;  %v5572_v27 = vadd.f32 %v5571_v47, %v9339_v45  ;;  %6433 = vmatmul.mubr.msk.bf16.vlgmr.msra.gmra.mxu0 %vm10029_vm9, %v9313_v31  ;;  %v5848_v59 = vsel %vm5790_vm13, %v5568_v13, %v5824_v43  ;;  %v4210_v13 = vld [vmem:[%s9459_s3 + $0x20] sm:$0xff] }
 0x2ea   : > { %v5651_v3 = vpop.f32.mrf.mxu1  ;;  %5761 = vmatpush1.bf16.msra.mxu0 %v6428_v11  ;;  %5778 = vmatprep.mubr.bf16.mxu0 %v9724_v61  ;;  %v6445_v12 = vcombine.high %v4210_v13, %v4210_v13  ;;  %v6444_v17 = vcombine.low %v4210_v13, %v4210_v13 }
 0x2eb   : > { %vm5802_vm1 = vcmp.gt.f32.partialorder %v5572_v27, 0.0  ;;  %v5836_v15 = vmul.f32 %v9347_v0, %v5572_v27  ;;  %v5859_v23 = vsel %vm5801_vm5, %v5570_v18, %v5835_v62  ;;  %v5652_v40 = vadd.f32 %v5651_v3, %v9334_v20  ;;  %v6408_v18 = vld [vmem:[%s9464_s8] ss:$0 sm:$0xff] }
 0x2ec   : > { %v5653_v44 = vpop.f32.mrf.mxu1  ;;  %v5871_v14 = vpack.c.bf16 %v5859_v23, %v5847_v53 }
 0x2ed   : > { %v5654_v19 = vadd.f32 %v5653_v44, %v9334_v20  ;;  %v5860_v63 = vsel %vm5802_vm1, %v5572_v27, %v5836_v15  ;;  %v5827_v56 = vmul.f32 %v9344_v46, %v5652_v40  ;;  %vm5793_vm15 = vcmp.gt.f32.partialorder %v5652_v40, 0.0 }
 0x2ee   : > { %v5655_v32 = vpop.f32.mrf.mxu1  ;;  %v5872_v7 = vpack.c.bf16 %v5860_v63, %v5848_v59 }
 0x2ef   : > { %v5656_v16 = vadd.f32 %v5655_v32, %v9339_v45  ;;  %v5828_v61 = vmul.f32 %v9344_v46, %v5654_v19  ;;  %vm5794_vm11 = vcmp.gt.f32.partialorder %v5654_v19, 0.0  ;;  %v5851_v21 = vsel %vm5793_vm15, %v5652_v40, %v5827_v56 }
 0x2f0   : > { %v5657_v52 = vpop.f32.mrf.mxu1  ;;  %5944 = vmatprep.subr.bf16.mxu1 %v5872_v7 }
 0x2f1   : > { %vm5805_vm10 = vcmp.gt.f32.partialorder %v5656_v16, 0.0  ;;  %v5839_v38 = vmul.f32 %v9347_v0, %v5656_v16  ;;  %v5658_v60 = vadd.f32 %v5657_v52, %v9339_v45  ;;  %5945 = vmatpush1.bf16.xpose.msra.mxu1 %v5871_v14  ;;  %6435 = vmatmul.mubr.msk.bf16.vlgmr.msra.gmra.mxu0 %vm10030_vm8, %v9313_v31  ;;  %v5852_v31 = vsel %vm5794_vm11, %v5654_v19, %v5828_v61 }
 0x2f2   : > { %v5737_v50 = vpop.f32.mrf.mxu1  ;;  %6002 = vmatprep.mubr.bf16.mxu0 %v6439_v5 }
 0x2f3   : > { %vm5806_vm2 = vcmp.gt.f32.partialorder %v5658_v60, 0.0  ;;  %v5840_v29 = vmul.f32 %v9347_v0, %v5658_v60  ;;  %v5863_v26 = vsel %vm5805_vm10, %v5656_v16, %v5839_v38  ;;  %v5738_v34 = vadd.f32 %v5737_v50, %v9334_v20 }
 0x2f4   : > { %v5739_v57 = vpop.f32.mrf.mxu1  ;;  %v5875_v22 = vpack.c.bf16 %v5863_v26, %v5851_v21 }
 0x2f5   : > { %v5740_v28 = vadd.f32 %v5739_v57, %v9334_v20  ;;  %v5864_v9 = vsel %vm5806_vm2, %v5658_v60, %v5840_v29  ;;  %v5831_v8 = vmul.f32 %v9344_v46, %v5738_v34  ;;  %vm5797_vm3 = vcmp.gt.f32.partialorder %v5738_v34, 0.0 }
 0x2f6   : > { %v5741_v30 = vpop.f32.mrf.mxu1  ;;  %v5876_v39 = vpack.c.bf16 %v5864_v9, %v5852_v31 }
 0x2f7   : > { %v5742_v24 = vadd.f32 %v5741_v30, %v9339_v45  ;;  %v5832_v36 = vmul.f32 %v9344_v46, %v5740_v28  ;;  %vm5798_vm14 = vcmp.gt.f32.partialorder %v5740_v28, 0.0  ;;  %v5855_v1 = vsel %vm5797_vm3, %v5738_v34, %v5831_v8 }
 0x2f8   : > { %v5743_v4 = vpop.f32.mrf.mxu1  ;;  %6024 = vmatprep.subr.bf16.mxu1 %v5876_v39  ;;  %5963 = vmatmul.mubr.bf16.vlgmr.msra.gmra.mxu1 %v6436_v42  ;;  %v6438_v39 = vcombine.low %v9385_v10, %v9385_v10  ;;  %v4211_v10 = vld [vmem:[%s9459_s3 + $0x28] sm:$0xff] }
 0x2f9   : > { %vm5809_vm12 = vcmp.gt.f32.partialorder %v5742_v24, 0.0  ;;  %v5843_v35 = vmul.f32 %v9347_v0, %v5742_v24  ;;  %v5744_v41 = vadd.f32 %v5743_v4, %v9339_v45  ;;  %6025 = vmatpush1.bf16.xpose.msra.mxu1 %v5875_v22  ;;  %6042 = vmatprep.mubr.bf16.mxu1 %v6441_v54  ;;  %v5856_v49 = vsel %vm5798_vm14, %v5740_v28, %v5832_v36  ;;  %v4209_v54 = vld [vmem:[%s9459_s3 + $0x18] sm:$0xff] }
 0x2fa   : > { %v6443_v36 = vcombine.high %v4209_v54, %v4209_v54 }
 0x2fb   : > { %vm5810_vm4 = vcmp.gt.f32.partialorder %v5744_v41, 0.0  ;;  %v5844_v33 = vmul.f32 %v9347_v0, %v5744_v41  ;;  %v5867_v58 = vsel %vm5809_vm12, %v5742_v24, %v5843_v35 }
 0x2fc   : > { %v5879_v51 = vpack.c.bf16 %v5867_v58, %v5855_v1 }
 0x2fd   : > { %v5868_v55 = vsel %vm5810_vm4, %v5744_v41, %v5844_v33 }
 0x2fe   : > { %v5880_v37 = vpack.c.bf16 %v5868_v55, %v5856_v49 }
 0x300   : > { %6104 = vmatprep.subr.bf16.mxu1 %v5880_v37  ;;  %6043 = vmatmul.mubr.bf16.vlgmr.msra.gmra.mxu1 %v6440_v2 }
 0x301   : > { %6105 = vmatpush1.bf16.xpose.msra.mxu1 %v5879_v51  ;;  %6122 = vmatprep.mubr.bf16.mxu1 %v6445_v12 }
 0x302   : > { %6483 = vmatprep.subr.mxu1 %v10022_v48 }
 0x308   : > { %6123 = vmatmul.mubr.bf16.vlgmr.msra.gmra.mxu1 %v6444_v17  ;;  %v6442_v17 = vcombine.low %v4209_v54, %v4209_v54 }
 0x309   : > { %6487 = vmatprep.mubr.msk.f32.mxu1 %vm10023_vm7, %v10022_v48 }
 0x39d   : > { %v4201_v11 = vpop.f32.mrf.mxu0 }
 0x39e   : > { %v4202_v47 = vadd.f32 %v6408_v18, %v4201_v11 }
 0x39f   : > { %v6482_v43 = vpop.f32.mrf.mxu0 }
 0x3a0   : > { %4205 = vst [vmem:[%s513_s17] sm:$0xff] %v4202_v47 }
 0x3a1   : > { %v5608_v62 = vpop.f32.mrf.mxu0 }
 0x3a2   : > { %v5609_v3 = vadd.f32 %v5608_v62, %v9334_v20 }
 0x3a3   : > { %v5610_v27 = vpop.f32.mrf.mxu0 }
 0x3a4   : > { %v5611_v25 = vadd.f32 %v5610_v27, %v9334_v20  ;;  %v5825_v53 = vmul.f32 %v9344_v46, %v5609_v3  ;;  %vm5791_vm9 = vcmp.gt.f32.partialorder %v5609_v3, 0.0 }
 0x3a5   : > { %v5612_v15 = vpop.f32.mrf.mxu0 }
 0x3a6   : > { %v5613_v23 = vadd.f32 %v5612_v15, %v9339_v45  ;;  %v5826_v19 = vmul.f32 %v9344_v46, %v5611_v25  ;;  %vm5792_vm5 = vcmp.gt.f32.partialorder %v5611_v25, 0.0  ;;  %v5849_v38 = vsel %vm5791_vm9, %v5609_v3, %v5825_v53  ;;  %v4219_v53 = vld [vmem:[%s9468_s12 + $0x8] sm:$0xff] }
 0x3a7   : > { %v5614_v44 = vpop.f32.mrf.mxu0  ;;  %6484 = vmatpush3.msra.mxu1 %v4219_v53 }
 0x3a8   : > { %vm5803_vm7 = vcmp.gt.f32.partialorder %v5613_v23, 0.0  ;;  %v5837_v59 = vmul.f32 %v9347_v0, %v5613_v23  ;;  %v5615_v63 = vadd.f32 %v5614_v44, %v9339_v45  ;;  %v5850_v52 = vsel %vm5792_vm5, %v5611_v25, %v5826_v19  ;;  %6485 = vmatprep.subr.mxu1 %v10022_v48 }
 0x3a9   : > { %v5694_v40 = vpop.f32.mrf.mxu0  ;;  %v6446_v25 = vcombine.low %v4211_v10, %v4211_v10 }
 0x3aa   : > { %vm5804_vm13 = vcmp.gt.f32.partialorder %v5615_v63, 0.0  ;;  %v5838_v32 = vmul.f32 %v9347_v0, %v5615_v63  ;;  %v5861_v7 = vsel %vm5803_vm7, %v5613_v23, %v5837_v59  ;;  %v5695_v60 = vadd.f32 %v5694_v40, %v9334_v20  ;;  %v4218_v40 = vld [vmem:[%s9468_s12] sm:$0xff] }
 0x3ab   : > { %v5696_v14 = vpop.f32.mrf.mxu0  ;;  %v5873_v6 = vpack.c.bf16 %v5861_v7, %v5849_v38  ;;  %6486 = vmatpush3.msra.mxu1 %v4218_v40 }
 0x3ac   : > { %v5697_v16 = vadd.f32 %v5696_v14, %v9334_v20  ;;  %v5862_v61 = vsel %vm5804_vm13, %v5615_v63, %v5838_v32  ;;  %v5829_v31 = vmul.f32 %v9344_v46, %v5695_v60  ;;  %vm5795_vm10 = vcmp.gt.f32.partialorder %v5695_v60, 0.0 }
 0x3ad   : > { %v5698_v56 = vpop.f32.mrf.mxu0  ;;  %v5874_v50 = vpack.c.bf16 %v5862_v61, %v5850_v52 }
 0x3ae   : > { %v5699_v29 = vadd.f32 %v5698_v56, %v9339_v45  ;;  %v5830_v57 = vmul.f32 %v9344_v46, %v5697_v16  ;;  %vm5796_vm1 = vcmp.gt.f32.partialorder %v5697_v16, 0.0  ;;  %v5853_v35 = vsel %vm5795_vm10, %v5695_v60, %v5829_v31  ;;  %v6450_v31 = vld [vmem:[%s9469_s13] ss:$0 sm:$0xff] }
 0x3af   : > { %v5700_v26 = vpop.f32.mrf.mxu0  ;;  %5984 = vmatprep.subr.bf16.mxu0 %v5874_v50 }
 0x3b0   : > { %vm5807_vm6 = vcmp.gt.f32.partialorder %v5699_v29, 0.0  ;;  %v5841_v42 = vmul.f32 %v9347_v0, %v5699_v29  ;;  %v5701_v28 = vadd.f32 %v5700_v26, %v9339_v45  ;;  %5985 = vmatpush1.bf16.xpose.msra.mxu0 %v5873_v6  ;;  %v5854_v24 = vsel %vm5796_vm1, %v5697_v16, %v5830_v57 }
 0x3b1   : > { %v5780_v9 = vpop.f32.mrf.mxu0 }
 0x3b2   : > { %vm5808_vm8 = vcmp.gt.f32.partialorder %v5701_v28, 0.0  ;;  %v5842_v21 = vmul.f32 %v9347_v0, %v5701_v28  ;;  %v5865_v34 = vsel %vm5807_vm6, %v5699_v29, %v5841_v42  ;;  %v5781_v41 = vadd.f32 %v5780_v9, %v9334_v20 }
 0x3b3   : > { %v5782_v30 = vpop.f32.mrf.mxu0  ;;  %v5877_v58 = vpack.c.bf16 %v5865_v34, %v5853_v35 }
 0x3b4   : > { %v5783_v22 = vadd.f32 %v5782_v30, %v9334_v20  ;;  %v5866_v4 = vsel %vm5808_vm8, %v5701_v28, %v5842_v21  ;;  %v5833_v20 = vmul.f32 %v9344_v46, %v5781_v41  ;;  %vm5799_vm2 = vcmp.gt.f32.partialorder %v5781_v41, 0.0 }
 0x3b5   : > { %v5784_v8 = vpop.f32.mrf.mxu0  ;;  %v5878_v33 = vpack.c.bf16 %v5866_v4, %v5854_v24 }
 0x3b6   : > { %v5785_v2 = vadd.f32 %v5784_v8, %v9339_v45  ;;  %v5834_v55 = vmul.f32 %v9344_v46, %v5783_v22  ;;  %vm5800_vm15 = vcmp.gt.f32.partialorder %v5783_v22, 0.0  ;;  %v5857_v43 = vsel %vm5799_vm2, %v5781_v41, %v5833_v20 }
 0x3b7   : > { %v5786_v49 = vpop.f32.mrf.mxu0  ;;  %6003 = vmatmul.mubr.bf16.vlgmr.msra.gmra.mxu0 %v6438_v39  ;;  %6064 = vmatprep.subr.bf16.mxu0 %v5878_v33 }
 0x3b8   : > { %vm5811_vm11 = vcmp.gt.f32.partialorder %v5785_v2, 0.0  ;;  %v5845_v1 = vmul.f32 %v9347_v0, %v5785_v2  ;;  %v5787_v37 = vadd.f32 %v5786_v49, %v9339_v45  ;;  %6065 = vmatpush1.bf16.xpose.msra.mxu0 %v5877_v58  ;;  %6082 = vmatprep.mubr.bf16.mxu0 %v6443_v36  ;;  %v5964_v51 = vpop.f32.mrf.mxu1  ;;  %v5858_v18 = vsel %vm5800_vm15, %v5783_v22, %v5834_v55 }
 0x3b9   : > { %v6447_v45 = vcombine.high %v4211_v10, %v4211_v10 }
 0x3ba   : > { %vm5812_vm12 = vcmp.gt.f32.partialorder %v5787_v37, 0.0  ;;  %v5846_v5 = vmul.f32 %v9347_v0, %v5787_v37  ;;  %v5966_v13 = vpop.f32.mrf.mxu1  ;;  %v5869_v12 = vsel %vm5811_vm11, %v5785_v2, %v5845_v1 }
 0x3bb   : > { %v5881_v27 = vpack.c.bf16 %v5869_v12, %v5857_v43 }
 0x3bc   : > { %v5870_v11 = vsel %vm5812_vm12, %v5787_v37, %v5846_v5  ;;  %v5967_v47 = vpop.f32.mrf.mxu1 }
 0x3bd   : > { %v5882_v62 = vpack.c.bf16 %v5870_v11, %v5858_v18 }
 0x3be   : > { %v5968_v46 = vpop.f32.mrf.mxu1 }
 0x3bf   : > { %6083 = vmatmul.mubr.bf16.vlgmr.msra.gmra.mxu0 %v6442_v17  ;;  %6448 = vmatprep.subr.msk.bf16.mxu0 %vm3679_vm0, %v5882_v62 }
 0x3c0   : > { %6145 = vmatpush1.bf16.xpose.msra.mxu0 %v5881_v27  ;;  %6449 = vmatprep.mubr.msk.bf16.mxu0 %vm3679_vm0, %v6447_v45  ;;  %v6044_v0 = vpop.f32.mrf.mxu1  ;;  %vm10031_vm0 = vcmask 130048  }
 0x3c2   : > { %v6046_v3 = vpop.f32.mrf.mxu1 }
 0x3c4   : > { %v6047_v15 = vpop.f32.mrf.mxu1 }
 0x3c6   : > { %v6048_v23 = vpop.f32.mrf.mxu1 }
 0x3c7   : > { %6163 = vmatmul.mubr.bf16.vlgmr.msra.gmra.mxu0 %v6446_v25 }
 0x3c8   : > { %v6124_v44 = vpop.f32.mrf.mxu1 }
 0x3ca   : > { %v6126_v19 = vpop.f32.mrf.mxu1 }
 0x3cc   : > { %v6127_v59 = vpop.f32.mrf.mxu1 }
 0x3ce   : > { %v6128_v63 = vpop.f32.mrf.mxu1 }
 0x477   : > { %v6004_v32 = vpop.f32.mrf.mxu0 }
 0x478   : > { %v6005_v16 = vadd.f32 %v6004_v32, %v5964_v51 }
 0x479   : > { %v6006_v7 = vpop.f32.mrf.mxu0 }
 0x47a   : > { %v6045_v38 = vadd.f32 %v6044_v0, %v6005_v16 }
 0x47b   : > { %v6007_v14 = vpop.f32.mrf.mxu0 }
 0x47d   : > { %v6008_v52 = vpop.f32.mrf.mxu0 }
 0x47f   : > { %v6084_v61 = vpop.f32.mrf.mxu0 }
 0x480   : > { %v6085_v56 = vadd.f32 %v6084_v61, %v6045_v38 }
 0x481   : > { %v6086_v60 = vpop.f32.mrf.mxu0 }
 0x482   : > { %v6125_v29 = vadd.f32 %v6124_v44, %v6085_v56 }
 0x483   : > { %v6087_v50 = vpop.f32.mrf.mxu0 }
 0x485   : > { %v6088_v6 = vpop.f32.mrf.mxu0 }
 0x487   : > { %v6164_v26 = vpop.f32.mrf.mxu0 }
 0x488   : > { %v6165_v57 = vadd.f32 %v6164_v26, %v6125_v29 }
 0x489   : > { %v6166_v42 = vpop.f32.mrf.mxu0 }
 0x48a   : > { %6488 = vmatmul.mubr.msk.f32.vlgmr.msra.gmra.mxu1 %vm10031_vm0, %v6165_v57 }
 0x48b   : > { %v6167_v48 = vpop.f32.mrf.mxu0 }
 0x48d   : > { %v6168_v28 = vpop.f32.mrf.mxu0 }
 0x54a   : > { %v6245_v9 = vpop.f32.mrf.mxu1 }
 0x54b   : > { %v6246_v54 = vadd.f32 %v6450_v31, %v6245_v9 }
 0x54c   : > { %v6489_v21 = vpop.f32.mrf.mxu1 }
 0x54d   : > { %6249 = vst [vmem:[%s517_s24] sm:$0xff] %v6246_v54 }
 0x54e PF: > { %s26_s18 = sadd.s32 1, %s6734_s18  }
 0x54f   : > { %p23_p4 = scmp.ge.s32.totalorder %s26_s18, 4  }
 0x551   :  { %25 = sbr.rel (!%p23_p4) target bundleno = 1 (0x1), region = 121 }

</bundles_post_ra>
